<compile_context>
chip_gen: v5e
topology: v5e:2x2
jax: 0.10.0
libtpu: 0.0.40
codegen_flags: <defaults>
</compile_context>

<pallas_src>
import functools

import jax
import jax.numpy as jnp
from jax.experimental import pallas as pl
from jax.experimental.pallas import tpu as pltpu


# ----------------------------- fused Pallas kernel -----------------------------

def _generator_fused_kernel(z_ref,
                            w0_ref, b0_ref,
                            w1_ref, b1_ref, g1_ref, bt1_ref,
                            w2_ref, b2_ref, g2_ref, bt2_ref,
                            w3_ref, b3_ref, g3_ref, bt3_ref,
                            w4_ref, b4_ref,
                            o_ref, *, eps):
    """Full generator MLP: 5 Linears + 3 BatchNorms + LeakyReLU/Tanh, fused."""

    def linear(x_f32, w_ref, b_ref):
        # bf16 x bf16 -> f32 accumulation on the MXU.
        h = jnp.dot(x_f32.astype(jnp.bfloat16), w_ref[...],
                    preferred_element_type=jnp.float32)
        return h + b_ref[...]

    def leaky(x):
        return jnp.where(x > 0, x, 0.2 * x)

    def batchnorm(x, g_ref, bt_ref):
        mean = jnp.mean(x, axis=0, keepdims=True)
        diff = x - mean
        var = jnp.mean(diff * diff, axis=0, keepdims=True)       # biased var
        scale = g_ref[...] * jax.lax.rsqrt(var + eps)             # fold gamma
        return diff * scale + bt_ref[...]

    x = leaky(linear(z_ref[...], w0_ref, b0_ref))                               # (B, 128)
    x = leaky(batchnorm(linear(x, w1_ref, b1_ref), g1_ref, bt1_ref))            # (B, 256)
    x = leaky(batchnorm(linear(x, w2_ref, b2_ref), g2_ref, bt2_ref))            # (B, 512)
    x = leaky(batchnorm(linear(x, w3_ref, b3_ref), g3_ref, bt3_ref))            # (B, 1024)
    o_ref[...] = jnp.tanh(linear(x, w4_ref, b4_ref))                            # (B, C*H*W)


# ----------------------------- parameter init -----------------------------

def init_linear(key, in_feat, out_feat):
    """PyTorch nn.Linear default init: U(-1/sqrt(in), 1/sqrt(in)).

    Weight stored as (in, out) (transposed PyTorch layout) in bfloat16 so the
    kernel computes x @ W on the MXU's bf16 path; bias kept f32.
    """
    kw, kb = jax.random.split(key)
    bound = 1.0 / jnp.sqrt(jnp.float32(in_feat))
    w = jax.random.uniform(kw, (in_feat, out_feat), jnp.float32, -bound, bound)
    b = jax.random.uniform(kb, (1, out_feat), jnp.float32, -bound, bound)
    return w.astype(jnp.bfloat16), b


def init_bn(out_feat):
    gamma = jnp.ones((1, out_feat), jnp.float32)
    beta = jnp.zeros((1, out_feat), jnp.float32)
    return gamma, beta


def init_generator_params(key, latent_dim, img_flat):
    dims = [(latent_dim, 128), (128, 256), (256, 512), (512, 1024),
            (1024, img_flat)]
    keys = jax.random.split(key, len(dims))
    params = {}
    for i, (k, (fi, fo)) in enumerate(zip(keys, dims)):
        w, b = init_linear(k, fi, fo)
        params[f"w{i}"] = w
        params[f"b{i}"] = b
    for i, fo in enumerate([256, 512, 1024], start=1):
        g, bt = init_bn(fo)
        params[f"gamma{i}"] = g
        params[f"beta{i}"] = bt
    return params


# ----------------------------- forward pass -----------------------------

def generator_forward(params, z, img_shape, eps=0.8):
    """z: (B, latent_dim) -> img: (B, C, H, W)  via one fused Pallas kernel."""
    batch = z.shape[0]
    img_flat = params["w4"].shape[1]

    vmem = pl.BlockSpec(memory_space=pltpu.MemorySpace.VMEM)
    kernel = functools.partial(_generator_fused_kernel, eps=eps)

    operands = (
        z,
        params["w0"], params["b0"],
        params["w1"], params["b1"], params["gamma1"], params["beta1"],
        params["w2"], params["b2"], params["gamma2"], params["beta2"],
        params["w3"], params["b3"], params["gamma3"], params["beta3"],
        params["w4"], params["b4"],
    )

    out_flat = pl.pallas_call(
        kernel,
        out_shape=jax.ShapeDtypeStruct((batch, img_flat), jnp.float32),
        in_specs=[vmem] * len(operands),
        out_specs=vmem,
        compiler_params=pltpu.CompilerParams(
            vmem_limit_bytes=32 * 1024 * 1024),
    )(*operands)

    return out_flat.reshape(batch, *img_shape)


# ----------------------------- main -----------------------------

if __name__ == "__main__":
    # Small, module-consistent shapes.
    batch = 8
    latent_dim = 32
    channels, img_size = 1, 16
    img_shape = (channels, img_size, img_size)
    img_flat = channels * img_size * img_size  # 256

    key = jax.random.PRNGKey(0)
    kp, kz = jax.random.split(key)
    params = init_generator_params(kp, latent_dim, img_flat)
    z = jax.random.normal(kz, (batch, latent_dim), jnp.float32)

    img = jax.jit(lambda p, zz: generator_forward(p, zz, img_shape))(params, z)
    img = jax.block_until_ready(img)

    assert img.shape == (batch, channels, img_size, img_size), img.shape
    assert img.dtype == jnp.float32
    assert bool(jnp.all(jnp.isfinite(img)))
    assert bool(jnp.all(jnp.abs(img) <= 1.0 + 1e-6))  # tanh range
    print("KERNEL_OK")
</pallas_src>

<mosaic_0001>
module attributes {stable_mosaic.version = 11 : i64} {
  func.func @_generator_fused_kernel(%arg0: memref<8x32xf32, #tpu.memory_space<vmem>>, %arg1: memref<32x128xbf16, #tpu.memory_space<vmem>>, %arg2: memref<1x128xf32, #tpu.memory_space<vmem>>, %arg3: memref<128x256xbf16, #tpu.memory_space<vmem>>, %arg4: memref<1x256xf32, #tpu.memory_space<vmem>>, %arg5: memref<1x256xf32, #tpu.memory_space<vmem>>, %arg6: memref<1x256xf32, #tpu.memory_space<vmem>>, %arg7: memref<256x512xbf16, #tpu.memory_space<vmem>>, %arg8: memref<1x512xf32, #tpu.memory_space<vmem>>, %arg9: memref<1x512xf32, #tpu.memory_space<vmem>>, %arg10: memref<1x512xf32, #tpu.memory_space<vmem>>, %arg11: memref<512x1024xbf16, #tpu.memory_space<vmem>>, %arg12: memref<1x1024xf32, #tpu.memory_space<vmem>>, %arg13: memref<1x1024xf32, #tpu.memory_space<vmem>>, %arg14: memref<1x1024xf32, #tpu.memory_space<vmem>>, %arg15: memref<1024x256xbf16, #tpu.memory_space<vmem>>, %arg16: memref<1x256xf32, #tpu.memory_space<vmem>>, %arg17: memref<8x256xf32, #tpu.memory_space<vmem>>) attributes {dimension_semantics = [], scalar_prefetch = 0 : i64, scratch_operands = 0 : i64, tpu.core_type = #tpu.core_type<tc>} {
    %c0 = arith.constant 0 : index
    %c0_0 = arith.constant 0 : index
    %0 = vector.load %arg0[%c0, %c0_0] : memref<8x32xf32, #tpu.memory_space<vmem>>, vector<8x32xf32>
    %1 = arith.truncf %0 : vector<8x32xf32> to vector<8x32xbf16>
    %c0_1 = arith.constant 0 : index
    %c0_2 = arith.constant 0 : index
    %2 = vector.load %arg1[%c0_1, %c0_2] : memref<32x128xbf16, #tpu.memory_space<vmem>>, vector<32x128xbf16>
    %cst = arith.constant dense<0.000000e+00> : vector<8x128xf32>
    %3 = tpu.matmul %1, %2, %cst {dimension_numbers = #tpu.dot_dimension_numbers<[1], [0], [0], [1], [0, 0, 1, 1], [], []>} : vector<8x32xbf16>, vector<32x128xbf16>, vector<8x128xf32> -> vector<8x128xf32>
    %c0_3 = arith.constant 0 : index
    %c0_4 = arith.constant 0 : index
    %4 = vector.load %arg2[%c0_3, %c0_4] : memref<1x128xf32, #tpu.memory_space<vmem>>, vector<1x128xf32>
    %5 = vector.broadcast %4 : vector<1x128xf32> to vector<8x128xf32>
    %6 = arith.addf %3, %5 : vector<8x128xf32>
    %cst_5 = arith.constant 0.000000e+00 : f32
    %7 = vector.broadcast %cst_5 : f32 to vector<8x128xf32>
    %8 = arith.cmpf ogt, %6, %7 : vector<8x128xf32>
    %cst_6 = arith.constant 2.000000e-01 : f32
    %9 = vector.broadcast %cst_6 : f32 to vector<8x128xf32>
    %10 = arith.mulf %9, %6 : vector<8x128xf32>
    %11 = arith.select %8, %6, %10 : vector<8x128xi1>, vector<8x128xf32>
    %12 = arith.truncf %11 : vector<8x128xf32> to vector<8x128xbf16>
    %c0_7 = arith.constant 0 : index
    %c0_8 = arith.constant 0 : index
    %13 = vector.load %arg3[%c0_7, %c0_8] : memref<128x256xbf16, #tpu.memory_space<vmem>>, vector<128x256xbf16>
    %cst_9 = arith.constant dense<0.000000e+00> : vector<8x256xf32>
    %14 = tpu.matmul %12, %13, %cst_9 {dimension_numbers = #tpu.dot_dimension_numbers<[1], [0], [0], [1], [0, 0, 1, 1], [], []>} : vector<8x128xbf16>, vector<128x256xbf16>, vector<8x256xf32> -> vector<8x256xf32>
    %c0_10 = arith.constant 0 : index
    %c0_11 = arith.constant 0 : index
    %15 = vector.load %arg4[%c0_10, %c0_11] : memref<1x256xf32, #tpu.memory_space<vmem>>, vector<1x256xf32>
    %16 = vector.broadcast %15 : vector<1x256xf32> to vector<8x256xf32>
    %17 = arith.addf %14, %16 : vector<8x256xf32>
    %cst_12 = arith.constant dense<0.000000e+00> : vector<256xf32>
    %18 = vector.multi_reduction <add>, %17, %cst_12 [0] : vector<8x256xf32> to vector<256xf32>
    %19 = vector.shape_cast %18 : vector<256xf32> to vector<1x256xf32>
    %cst_13 = arith.constant 8.000000e+00 : f32
    %20 = vector.broadcast %cst_13 : f32 to vector<1x256xf32>
    %21 = arith.divf %19, %20 : vector<1x256xf32>
    %22 = vector.broadcast %21 : vector<1x256xf32> to vector<8x256xf32>
    %23 = arith.subf %17, %22 : vector<8x256xf32>
    %24 = arith.mulf %23, %23 : vector<8x256xf32>
    %cst_14 = arith.constant dense<0.000000e+00> : vector<256xf32>
    %25 = vector.multi_reduction <add>, %24, %cst_14 [0] : vector<8x256xf32> to vector<256xf32>
    %26 = vector.shape_cast %25 : vector<256xf32> to vector<1x256xf32>
    %cst_15 = arith.constant 8.000000e+00 : f32
    %27 = vector.broadcast %cst_15 : f32 to vector<1x256xf32>
    %28 = arith.divf %26, %27 : vector<1x256xf32>
    %c0_16 = arith.constant 0 : index
    %c0_17 = arith.constant 0 : index
    %29 = vector.load %arg5[%c0_16, %c0_17] : memref<1x256xf32, #tpu.memory_space<vmem>>, vector<1x256xf32>
    %cst_18 = arith.constant 8.000000e-01 : f32
    %30 = vector.broadcast %cst_18 : f32 to vector<1x256xf32>
    %31 = arith.addf %28, %30 : vector<1x256xf32>
    %32 = math.rsqrt %31 : vector<1x256xf32>
    %33 = arith.mulf %29, %32 : vector<1x256xf32>
    %34 = vector.broadcast %33 : vector<1x256xf32> to vector<8x256xf32>
    %35 = arith.mulf %23, %34 : vector<8x256xf32>
    %c0_19 = arith.constant 0 : index
    %c0_20 = arith.constant 0 : index
    %36 = vector.load %arg6[%c0_19, %c0_20] : memref<1x256xf32, #tpu.memory_space<vmem>>, vector<1x256xf32>
    %37 = vector.broadcast %36 : vector<1x256xf32> to vector<8x256xf32>
    %38 = arith.addf %35, %37 : vector<8x256xf32>
    %cst_21 = arith.constant 0.000000e+00 : f32
    %39 = vector.broadcast %cst_21 : f32 to vector<8x256xf32>
    %40 = arith.cmpf ogt, %38, %39 : vector<8x256xf32>
    %cst_22 = arith.constant 2.000000e-01 : f32
    %41 = vector.broadcast %cst_22 : f32 to vector<8x256xf32>
    %42 = arith.mulf %41, %38 : vector<8x256xf32>
    %43 = arith.select %40, %38, %42 : vector<8x256xi1>, vector<8x256xf32>
    %44 = arith.truncf %43 : vector<8x256xf32> to vector<8x256xbf16>
    %c0_23 = arith.constant 0 : index
    %c0_24 = arith.constant 0 : index
    %45 = vector.load %arg7[%c0_23, %c0_24] : memref<256x512xbf16, #tpu.memory_space<vmem>>, vector<256x512xbf16>
    %cst_25 = arith.constant dense<0.000000e+00> : vector<8x512xf32>
    %46 = tpu.matmul %44, %45, %cst_25 {dimension_numbers = #tpu.dot_dimension_numbers<[1], [0], [0], [1], [0, 0, 1, 1], [], []>} : vector<8x256xbf16>, vector<256x512xbf16>, vector<8x512xf32> -> vector<8x512xf32>
    %c0_26 = arith.constant 0 : index
    %c0_27 = arith.constant 0 : index
    %47 = vector.load %arg8[%c0_26, %c0_27] : memref<1x512xf32, #tpu.memory_space<vmem>>, vector<1x512xf32>
    %48 = vector.broadcast %47 : vector<1x512xf32> to vector<8x512xf32>
    %49 = arith.addf %46, %48 : vector<8x512xf32>
    %cst_28 = arith.constant dense<0.000000e+00> : vector<512xf32>
    %50 = vector.multi_reduction <add>, %49, %cst_28 [0] : vector<8x512xf32> to vector<512xf32>
    %51 = vector.shape_cast %50 : vector<512xf32> to vector<1x512xf32>
    %cst_29 = arith.constant 8.000000e+00 : f32
    %52 = vector.broadcast %cst_29 : f32 to vector<1x512xf32>
    %53 = arith.divf %51, %52 : vector<1x512xf32>
    %54 = vector.broadcast %53 : vector<1x512xf32> to vector<8x512xf32>
    %55 = arith.subf %49, %54 : vector<8x512xf32>
    %56 = arith.mulf %55, %55 : vector<8x512xf32>
    %cst_30 = arith.constant dense<0.000000e+00> : vector<512xf32>
    %57 = vector.multi_reduction <add>, %56, %cst_30 [0] : vector<8x512xf32> to vector<512xf32>
    %58 = vector.shape_cast %57 : vector<512xf32> to vector<1x512xf32>
    %cst_31 = arith.constant 8.000000e+00 : f32
    %59 = vector.broadcast %cst_31 : f32 to vector<1x512xf32>
    %60 = arith.divf %58, %59 : vector<1x512xf32>
    %c0_32 = arith.constant 0 : index
    %c0_33 = arith.constant 0 : index
    %61 = vector.load %arg9[%c0_32, %c0_33] : memref<1x512xf32, #tpu.memory_space<vmem>>, vector<1x512xf32>
    %cst_34 = arith.constant 8.000000e-01 : f32
    %62 = vector.broadcast %cst_34 : f32 to vector<1x512xf32>
    %63 = arith.addf %60, %62 : vector<1x512xf32>
    %64 = math.rsqrt %63 : vector<1x512xf32>
    %65 = arith.mulf %61, %64 : vector<1x512xf32>
    %66 = vector.broadcast %65 : vector<1x512xf32> to vector<8x512xf32>
    %67 = arith.mulf %55, %66 : vector<8x512xf32>
    %c0_35 = arith.constant 0 : index
    %c0_36 = arith.constant 0 : index
    %68 = vector.load %arg10[%c0_35, %c0_36] : memref<1x512xf32, #tpu.memory_space<vmem>>, vector<1x512xf32>
    %69 = vector.broadcast %68 : vector<1x512xf32> to vector<8x512xf32>
    %70 = arith.addf %67, %69 : vector<8x512xf32>
    %cst_37 = arith.constant 0.000000e+00 : f32
    %71 = vector.broadcast %cst_37 : f32 to vector<8x512xf32>
    %72 = arith.cmpf ogt, %70, %71 : vector<8x512xf32>
    %cst_38 = arith.constant 2.000000e-01 : f32
    %73 = vector.broadcast %cst_38 : f32 to vector<8x512xf32>
    %74 = arith.mulf %73, %70 : vector<8x512xf32>
    %75 = arith.select %72, %70, %74 : vector<8x512xi1>, vector<8x512xf32>
    %76 = arith.truncf %75 : vector<8x512xf32> to vector<8x512xbf16>
    %c0_39 = arith.constant 0 : index
    %c0_40 = arith.constant 0 : index
    %77 = vector.load %arg11[%c0_39, %c0_40] : memref<512x1024xbf16, #tpu.memory_space<vmem>>, vector<512x1024xbf16>
    %cst_41 = arith.constant dense<0.000000e+00> : vector<8x1024xf32>
    %78 = tpu.matmul %76, %77, %cst_41 {dimension_numbers = #tpu.dot_dimension_numbers<[1], [0], [0], [1], [0, 0, 1, 1], [], []>} : vector<8x512xbf16>, vector<512x1024xbf16>, vector<8x1024xf32> -> vector<8x1024xf32>
    %c0_42 = arith.constant 0 : index
    %c0_43 = arith.constant 0 : index
    %79 = vector.load %arg12[%c0_42, %c0_43] : memref<1x1024xf32, #tpu.memory_space<vmem>>, vector<1x1024xf32>
    %80 = vector.broadcast %79 : vector<1x1024xf32> to vector<8x1024xf32>
    %81 = arith.addf %78, %80 : vector<8x1024xf32>
    %cst_44 = arith.constant dense<0.000000e+00> : vector<1024xf32>
    %82 = vector.multi_reduction <add>, %81, %cst_44 [0] : vector<8x1024xf32> to vector<1024xf32>
    %83 = vector.shape_cast %82 : vector<1024xf32> to vector<1x1024xf32>
    %cst_45 = arith.constant 8.000000e+00 : f32
    %84 = vector.broadcast %cst_45 : f32 to vector<1x1024xf32>
    %85 = arith.divf %83, %84 : vector<1x1024xf32>
    %86 = vector.broadcast %85 : vector<1x1024xf32> to vector<8x1024xf32>
    %87 = arith.subf %81, %86 : vector<8x1024xf32>
    %88 = arith.mulf %87, %87 : vector<8x1024xf32>
    %cst_46 = arith.constant dense<0.000000e+00> : vector<1024xf32>
    %89 = vector.multi_reduction <add>, %88, %cst_46 [0] : vector<8x1024xf32> to vector<1024xf32>
    %90 = vector.shape_cast %89 : vector<1024xf32> to vector<1x1024xf32>
    %cst_47 = arith.constant 8.000000e+00 : f32
    %91 = vector.broadcast %cst_47 : f32 to vector<1x1024xf32>
    %92 = arith.divf %90, %91 : vector<1x1024xf32>
    %c0_48 = arith.constant 0 : index
    %c0_49 = arith.constant 0 : index
    %93 = vector.load %arg13[%c0_48, %c0_49] : memref<1x1024xf32, #tpu.memory_space<vmem>>, vector<1x1024xf32>
    %cst_50 = arith.constant 8.000000e-01 : f32
    %94 = vector.broadcast %cst_50 : f32 to vector<1x1024xf32>
    %95 = arith.addf %92, %94 : vector<1x1024xf32>
    %96 = math.rsqrt %95 : vector<1x1024xf32>
    %97 = arith.mulf %93, %96 : vector<1x1024xf32>
    %98 = vector.broadcast %97 : vector<1x1024xf32> to vector<8x1024xf32>
    %99 = arith.mulf %87, %98 : vector<8x1024xf32>
    %c0_51 = arith.constant 0 : index
    %c0_52 = arith.constant 0 : index
    %100 = vector.load %arg14[%c0_51, %c0_52] : memref<1x1024xf32, #tpu.memory_space<vmem>>, vector<1x1024xf32>
    %101 = vector.broadcast %100 : vector<1x1024xf32> to vector<8x1024xf32>
    %102 = arith.addf %99, %101 : vector<8x1024xf32>
    %cst_53 = arith.constant 0.000000e+00 : f32
    %103 = vector.broadcast %cst_53 : f32 to vector<8x1024xf32>
    %104 = arith.cmpf ogt, %102, %103 : vector<8x1024xf32>
    %cst_54 = arith.constant 2.000000e-01 : f32
    %105 = vector.broadcast %cst_54 : f32 to vector<8x1024xf32>
    %106 = arith.mulf %105, %102 : vector<8x1024xf32>
    %107 = arith.select %104, %102, %106 : vector<8x1024xi1>, vector<8x1024xf32>
    %108 = arith.truncf %107 : vector<8x1024xf32> to vector<8x1024xbf16>
    %c0_55 = arith.constant 0 : index
    %c0_56 = arith.constant 0 : index
    %109 = vector.load %arg15[%c0_55, %c0_56] : memref<1024x256xbf16, #tpu.memory_space<vmem>>, vector<1024x256xbf16>
    %cst_57 = arith.constant dense<0.000000e+00> : vector<8x256xf32>
    %110 = tpu.matmul %108, %109, %cst_57 {dimension_numbers = #tpu.dot_dimension_numbers<[1], [0], [0], [1], [0, 0, 1, 1], [], []>} : vector<8x1024xbf16>, vector<1024x256xbf16>, vector<8x256xf32> -> vector<8x256xf32>
    %c0_58 = arith.constant 0 : index
    %c0_59 = arith.constant 0 : index
    %111 = vector.load %arg16[%c0_58, %c0_59] : memref<1x256xf32, #tpu.memory_space<vmem>>, vector<1x256xf32>
    %112 = vector.broadcast %111 : vector<1x256xf32> to vector<8x256xf32>
    %113 = arith.addf %110, %112 : vector<8x256xf32>
    %114 = math.tanh %113 : vector<8x256xf32>
    %c0_60 = arith.constant 0 : index
    %c0_61 = arith.constant 0 : index
    %115 = vector.load %arg17[%c0_60, %c0_61] : memref<8x256xf32, #tpu.memory_space<vmem>>, vector<8x256xf32>
    tpu.vector_store %arg17[%c0_60, %c0_61], %114 {strides = array<i32>} : memref<8x256xf32, #tpu.memory_space<vmem>>, vector<8x256xf32>,
    return
  }
}

</mosaic_0001>

<bundles_post_ra>
// kernel: _lambda_.1
= control target key start
LH: loop header
LB: loop body
LE: loop exit
PB: predicated region body
PF: predicated region fallthrough
CT: control target
= control target key end

     0   :  { %s7802_s0 = inlined_call_operand.vmem [shape: f32[8,32], index: 0, kind: input, shape index: {}]   ;;  %s7803_s1 = inlined_call_operand.hbm [shape: bf16[32,128], index: 1, kind: input, shape index: {}]   ;;  %s7804_s2 = inlined_call_operand.hbm [shape: f32[1,128], index: 2, kind: input, shape index: {}]   ;;  %s7805_s3 = inlined_call_operand.hbm [shape: bf16[128,256], index: 3, kind: input, shape index: {}]   ;;  %s7806_s4 = inlined_call_operand.hbm [shape: f32[1,256], index: 4, kind: input, shape index: {}]   ;;  %s7807_s5 = inlined_call_operand.vmem [shape: f32[1,256], index: 5, kind: input, shape index: {}]   ;;  %s7808_s6 = inlined_call_operand.hbm [shape: f32[1,256], index: 6, kind: input, shape index: {}]   ;;  %s7809_s7 = inlined_call_operand.hbm [shape: bf16[256,512], index: 7, kind: input, shape index: {}]   ;;  %s7810_s8 = inlined_call_operand.hbm [shape: f32[1,512], index: 8, kind: input, shape index: {}]   ;;  %s7811_s9 = inlined_call_operand.vmem [shape: f32[1,512], index: 9, kind: input, shape index: {}]   ;;  %s7812_s10 = inlined_call_operand.hbm [shape: f32[1,512], index: 10, kind: input, shape index: {}]   ;;  %s7813_s11 = inlined_call_operand.hbm [shape: bf16[512,1024], index: 11, kind: input, shape index: {}]   ;;  %s7814_s12 = inlined_call_operand.hbm [shape: f32[1,1024], index: 12, kind: input, shape index: {}]   ;;  %s7815_s13 = inlined_call_operand.hbm [shape: f32[1,1024], index: 13, kind: input, shape index: {}]   ;;  %s7816_s14 = inlined_call_operand.hbm [shape: f32[1,1024], index: 14, kind: input, shape index: {}]   ;;  %s7817_s15 = inlined_call_operand.hbm [shape: bf16[1024,256], index: 15, kind: input, shape index: {}]   ;;  %s7818_s16 = inlined_call_operand.hbm [shape: f32[1,256], index: 16, kind: input, shape index: {}]   ;;  %s7819_s17 = inlined_call_operand.vmem [shape: f32[8,256], index: 17, kind: output, shape index: {}]  }
   0x1   :  { %7820 = sst [smem:[#allocation32_spill]] %s7802_s0 }
   0x2   :  { %7821 = sst [smem:[#allocation33_spill]] %s7803_s1 }
   0x3   :  { %22 = vsyncpa [#allocation3], 0 }
   0x4   :  { %23 = vsyncpa [#allocation5], 0 }
   0x5   :  { %24 = vsyncpa [#allocation8], 0 }
   0x6   :  { %25 = vsyncpa [#allocation11], 0 }
   0x7   :  { %26 = vsyncpa [#allocation14], 0 }
   0x8   :  { %27 = vsyncpa [#allocation17], 0 }
   0x9   :  { %28 = vsyncpa [#allocation20], 0  ;;  %s50_s26 = sshll.u32 %s7804_s2, 4  ;;  %s51_s26 = int_to_ptr.hbm [resolvable:$true] %s50_s26 }
   0xa   :  { %29 = vsyncpa [#allocation23], 0  ;;  %s7222_s27 = smov [#allocation4]   ;;  %s74_s30 = sshll.u32 %s7806_s4, 4  ;;  %s75_s30 = int_to_ptr.hbm [resolvable:$true] %s74_s30 }
   0xb   :  { %s52_s28 = sshll.u32 %s7222_s27, 4  ;;  %s7223_s18 = smov [#allocation7]   ;;  %s53_s28 = int_to_ptr.vmem [resolvable:$true] %s52_s28 }
   0xc   :  { %55 = dma.hbm_to_vmem [thread:$0]  %s51_s26, 16, %s53_s28, [#allocation5]  }
   0xd   :  { %s76_s19 = sshll.u32 %s7223_s18, 4  ;;  %s97_s21 = sshll.u32 %s7809_s7, 4  ;;  %s77_s19 = int_to_ptr.vmem [resolvable:$true] %s76_s19  ;;  %s98_s21 = int_to_ptr.hbm [resolvable:$true] %s97_s21 }
   0xe   :  { %79 = dma.hbm_to_vmem [thread:$0]  %s75_s30, 32, %s77_s19, [#allocation8]  }
   0xf   :  { %s7224_s2 = smov [#allocation10]   ;;  %s124_s25 = sshll.u32 %s7812_s10, 4  ;;  %s125_s25 = int_to_ptr.hbm [resolvable:$true] %s124_s25 }
  0x10   :  { %s99_s22 = sshll.u32 %s7224_s2, 4  ;;  %s7225_s27 = smov 256   ;;  %s100_s22 = int_to_ptr.vmem [resolvable:$true] %s99_s22 }
  0x11   :  { %s7226_s4 = smov 16   ;;  %s7227_s26 = smov [#allocation13]  }
  0x12   :  { %105 = dma.hbm_to_vmem [thread:$0]  %s98_s21, 8192, %s100_s22, [#allocation11], %s7225_s27, %s7225_s27, %s7226_s4  }
  0x13   :  { %s126_s28 = sshll.u32 %s7227_s26, 4  ;;  %s148_s7 = sshll.u32 %s7814_s12, 4  ;;  %s127_s28 = int_to_ptr.vmem [resolvable:$true] %s126_s28  ;;  %s149_s7 = int_to_ptr.hbm [resolvable:$true] %s148_s7 }
  0x14   :  { %129 = dma.hbm_to_vmem [thread:$0]  %s125_s25, 64, %s127_s28, [#allocation14]  }
  0x15   :  { %s170_s19 = sshll.u32 %s7816_s14, 4  ;;  %s7228_s1 = smov [#allocation16]   ;;  %s171_s19 = int_to_ptr.hbm [resolvable:$true] %s170_s19 }
  0x16   :  { %s150_s20 = sshll.u32 %s7228_s1, 4  ;;  %s7229_s10 = smov [#allocation19]   ;;  %s151_s20 = int_to_ptr.vmem [resolvable:$true] %s150_s20 }
  0x17   :  { %153 = dma.hbm_to_vmem [thread:$0]  %s149_s7, 128, %s151_s20, [#allocation17]  }
  0x18   :  { %s172_s21 = sshll.u32 %s7229_s10, 4  ;;  %s7822_s23 = sld [smem:[#allocation33_spill]]  ;;  %s173_s21 = int_to_ptr.vmem [resolvable:$true] %s172_s21 }
  0x19   :  { %175 = dma.hbm_to_vmem [thread:$0]  %s171_s19, 128, %s173_s21, [#allocation20]  }
  0x1a   :  { %s7230_s12 = smov [#allocation2]   ;;  %s60_s14 = sshll.u32 %s7805_s3, 4  ;;  %s61_s14 = int_to_ptr.hbm [resolvable:$true] %s60_s14 }
  0x1b   :  { %s38_s25 = sshll.u32 %s7230_s12, 4  ;;  %s7231_s26 = smov 64   ;;  %s39_s25 = int_to_ptr.vmem [resolvable:$true] %s38_s25 }
  0x1c   :  { %s7232_s28 = smov 4   ;;  %s7233_s29 = smov [#allocation6]  }
  0x1d   :  { %s62_s0 = sshll.u32 %s7233_s29, 4  ;;  %s7234_s7 = smov 128   ;;  %s63_s0 = int_to_ptr.vmem [resolvable:$true] %s62_s0 }
  0x1e   :  { %s36_s24 = sshll.u32 %s7822_s23, 4  ;;  %s7235_s30 = smov 8   ;;  %s37_s24 = int_to_ptr.hbm [resolvable:$true] %s36_s24 }
  0x1f   :  { %44 = dma.hbm_to_vmem [thread:$0]  %s37_s24, 256, %s39_s25, [#allocation3], %s7231_s26, %s7231_s26, %s7232_s28  }
  0x20   :  { %68 = dma.hbm_to_vmem [thread:$0]  %s61_s14, 2048, %s63_s0, [#allocation5], %s7234_s7, %s7234_s7, %s7235_s30  }
  0x21   :  { %s87_s1 = sshll.u32 %s7808_s6, 4  ;;  %s7236_s20 = smov [#allocation9]   ;;  %s88_s1 = int_to_ptr.hbm [resolvable:$true] %s87_s1 }
  0x22   :  { %s89_s3 = sshll.u32 %s7236_s20, 4  ;;  %s111_s2 = sshll.u32 %s7810_s8, 4  ;;  %s90_s3 = int_to_ptr.vmem [resolvable:$true] %s89_s3  ;;  %s112_s2 = int_to_ptr.hbm [resolvable:$true] %s111_s2 }
  0x23   :  { %92 = dma.hbm_to_vmem [thread:$0]  %s88_s1, 32, %s90_s3, [#allocation8]  }
  0x24   :  { %s7237_s22 = smov [#allocation12]   ;;  %s134_s25 = sshll.u32 %s7813_s11, 4  ;;  %s135_s25 = int_to_ptr.hbm [resolvable:$true] %s134_s25 }
  0x25   :  { %s113_s23 = sshll.u32 %s7237_s22, 4  ;;  %s7238_s6 = smov [#allocation15]   ;;  %s114_s23 = int_to_ptr.vmem [resolvable:$true] %s113_s23 }
  0x26   :  { %116 = dma.hbm_to_vmem [thread:$0]  %s112_s2, 64, %s114_s23, [#allocation11]  }
  0x27   :  { %s136_s27 = sshll.u32 %s7238_s6, 4  ;;  %s159_s26 = sshll.u32 %s7815_s13, 4  ;;  %s137_s27 = int_to_ptr.vmem [resolvable:$true] %s136_s27  ;;  %s160_s26 = int_to_ptr.hbm [resolvable:$true] %s159_s26 }
  0x28   :  { %s7239_s28 = smov 512   ;;  %s7240_s8 = smov 32  }
  0x29   :  { %142 = dma.hbm_to_vmem [thread:$0]  %s135_s25, 32768, %s137_s27, [#allocation14], %s7239_s28, %s7239_s28, %s7240_s8  }
  0x2a   :  { %s7241_s29 = smov [#allocation18]   ;;  %s180_s11 = sshll.u32 %s7817_s15, 4  ;;  %s181_s11 = int_to_ptr.hbm [resolvable:$true] %s180_s11 }
  0x2b   :  { %s161_s0 = sshll.u32 %s7241_s29, 4  ;;  %s194_s3 = sshll.u32 %s7818_s16, 4  ;;  %s162_s0 = int_to_ptr.vmem [resolvable:$true] %s161_s0  ;;  %s195_s3 = int_to_ptr.hbm [resolvable:$true] %s194_s3 }
  0x2c   :  { %164 = dma.hbm_to_vmem [thread:$0]  %s160_s26, 128, %s162_s0, [#allocation17]  }
  0x2d   :  { %s7242_s10 = smov [#allocation21]   ;;  %s7243_s13 = smov [#allocation22]  }
  0x2e   :  { %s182_s21 = sshll.u32 %s7242_s10, 4  ;;  %s196_s2 = sshll.u32 %s7243_s13, 4  ;;  %s183_s21 = int_to_ptr.vmem [resolvable:$true] %s182_s21  ;;  %s197_s2 = int_to_ptr.vmem [resolvable:$true] %s196_s2 }
  0x2f   :  { %188 = dma.hbm_to_vmem [thread:$0]  %s181_s11, 16384, %s183_s21, [#allocation20], %s7234_s7, %s7234_s7, %s7235_s30  }
  0x30   :  { %199 = dma.hbm_to_vmem [thread:$0]  %s195_s3, 32, %s197_s2, [#allocation23]  }
  0x31   :  { %7206 = dma.done.wait [#allocation3], 256  }
  0x32   :  { %7207 = vsyncadd [#allocation3], 4294967040 }
  0x33   :  { %7208 = dma.done.wait [#allocation5], 2064  }
  0x34   :  { %7209 = vsyncadd [#allocation5], 4294965232 }
  0x35   :  { %7210 = dma.done.wait [#allocation8], 64  }
  0x36   :  { %7211 = vsyncadd [#allocation8], 4294967232 }
  0x37   :  { %7212 = dma.done.wait [#allocation11], 8256  }
  0x38   :  { %7213 = vsyncadd [#allocation11], 4294959040 }
  0x39   :  { %7214 = dma.done.wait [#allocation14], 32832  }
  0x3a   :  { %7215 = vsyncadd [#allocation14], 4294934464 }
  0x3b   :  { %7216 = dma.done.wait [#allocation17], 256  }
  0x3c   :  { %7217 = vsyncadd [#allocation17], 4294967040 }
  0x3d   :  { %7218 = dma.done.wait [#allocation20], 16512  }
  0x3e   :  { %7219 = vsyncadd [#allocation20], 4294950784 }
  0x3f   :  { %7220 = dma.done.wait [#allocation23], 32  }
  0x40   :  { %7221 = vsyncadd [#allocation23], 4294967264  ;;  %v6346_v0 = vld [vmem:[#allocation2 + $0x8] sm:$0xff]  ;;  %v6345_v1 = vld [vmem:[#allocation2] sm:$0xff]  ;;  %s7823_s7 = sld [smem:[#allocation32_spill]]  ;;  %vm279_vm0 = vcmask 261120  }
  0x41   :  { %v4547_v3 = vld [vmem:[#allocation6 + $0x70] sm:$0xf]  ;;  %v6362_v4 = vld [vmem:[#allocation6 + $0x74] sm:$0xf0]  ;;  %v6361_v5 = vld [vmem:[#allocation6 + $0x74] sm:$0xf]  ;;  %289 = vmatpush.bf16.msra.mxu0 %v6346_v0 }
  0x42   :  { %v4548_v6 = vor.u32 %v6362_v4, %v4547_v3  ;;  %v4549_v7 = vld [vmem:[#allocation6 + $0x78] sm:$0xf0]  ;;  %v4539_v8 = vld [vmem:[#allocation6 + $0x60] sm:$0xf]  ;;  %v6360_v9 = vld [vmem:[#allocation6 + $0x64] sm:$0xf0] }
  0x43   :  { %v4552_v10 = vor.u32 %v6361_v5, %v4549_v7  ;;  %v6359_v11 = vld [vmem:[#allocation6 + $0x64] sm:$0xf]  ;;  %v4541_v12 = vld [vmem:[#allocation6 + $0x68] sm:$0xf0]  ;;  %v4540_v13 = vor.u32 %v6360_v9, %v4539_v8  ;;  %v4531_v16 = vld [vmem:[#allocation6 + $0x50] sm:$0xf] }
  0x44   :  { %402 = vmatpush.bf16.msra.mxu1 %v4548_v6  ;;  %v4544_v15 = vor.u32 %v6359_v11, %v4541_v12  ;;  %v6358_v17 = vld [vmem:[#allocation6 + $0x54] sm:$0xf0]  ;;  %v6357_v18 = vld [vmem:[#allocation6 + $0x54] sm:$0xf]  ;;  %v4533_v19 = vld [vmem:[#allocation6 + $0x58] sm:$0xf0] }
  0x45   :  { %415 = vmatpush.bf16.msra.mxu2 %v4552_v10  ;;  %290 = vmatpush.bf16.msra.mxu0 %v6345_v1  ;;  %v4532_v20 = vor.u32 %v6358_v17, %v4531_v16  ;;  %v4536_v21 = vor.u32 %v6357_v18, %v4533_v19  ;;  %v4523_v22 = vld [vmem:[#allocation6 + $0x40] sm:$0xf]  ;;  %v6356_v23 = vld [vmem:[#allocation6 + $0x44] sm:$0xf0]  ;;  %v6355_v24 = vld [vmem:[#allocation6 + $0x44] sm:$0xf] }
  0x46   :  { %v257_v2 = vld [vmem:[%s7823_s7] sm:$0xff]  ;;  %v4524_v26 = vor.u32 %v6356_v23, %v4523_v22  ;;  %v4515_v28 = vld [vmem:[#allocation6 + $0x30] sm:$0xf]  ;;  %v6354_v29 = vld [vmem:[#allocation6 + $0x34] sm:$0xf0]  ;;  %v7244_v59 = vmov 8.0  }
  0x47   :  { %v258_v14 = vpack.c.bf16 %v257_v2, %v257_v2  ;;  %v4525_v25 = vld [vmem:[#allocation6 + $0x48] sm:$0xf0]  ;;  %v6353_v30 = vld [vmem:[#allocation6 + $0x34] sm:$0xf]  ;;  %v4517_v31 = vld [vmem:[#allocation6 + $0x38] sm:$0xf0]  ;;  %v4516_v32 = vor.u32 %v6354_v29, %v4515_v28  ;;  %6835 = vrcp.f32 %v7244_v59 }
  0x48   :  { %403 = vmatpush.bf16.msra.mxu1 %v4540_v13  ;;  %v4528_v27 = vor.u32 %v6355_v24, %v4525_v25  ;;  %v4520_v33 = vor.u32 %v6353_v30, %v4517_v31  ;;  %v4507_v34 = vld [vmem:[#allocation6 + $0x20] sm:$0xf]  ;;  %v6352_v35 = vld [vmem:[#allocation6 + $0x24] sm:$0xf0]  ;;  %v6351_v36 = vld [vmem:[#allocation6 + $0x24] sm:$0xf] }
  0x49   :  { %4488 = vmatmul.msk.bf16.vlgmr.msra.gmra.mxu0 %vm279_vm0, %v258_v14  ;;  %416 = vmatpush.bf16.msra.mxu2 %v4544_v15  ;;  %v4509_v37 = vld [vmem:[#allocation6 + $0x28] sm:$0xf0]  ;;  %v4508_v38 = vor.u32 %v6352_v35, %v4507_v34  ;;  %v4499_v40 = vld [vmem:[#allocation6 + $0x10] sm:$0xf]  ;;  %v6350_v41 = vld [vmem:[#allocation6 + $0x14] sm:$0xf0] }
  0x4a   :  { %v4512_v39 = vor.u32 %v6351_v36, %v4509_v37  ;;  %v6349_v42 = vld [vmem:[#allocation6 + $0x14] sm:$0xf]  ;;  %v4500_v43 = vor.u32 %v6350_v41, %v4499_v40  ;;  %v4501_v44 = vld [vmem:[#allocation6 + $0x18] sm:$0xf0]  ;;  %v4491_v46 = vld [vmem:[#allocation6] sm:$0xf] }
  0x4b   :  { %v4504_v45 = vor.u32 %v6349_v42, %v4501_v44  ;;  %v6348_v47 = vld [vmem:[#allocation6 + $0x4] sm:$0xf0]  ;;  %v6347_v48 = vld [vmem:[#allocation6 + $0x4] sm:$0xf]  ;;  %v4493_v50 = vld [vmem:[#allocation6 + $0x8] sm:$0xf0] }
  0x4c   :  { %404 = vmatpush.bf16.msra.mxu1 %v4532_v20  ;;  %v4492_v49 = vor.u32 %v6348_v47, %v4491_v46  ;;  %v4496_v51 = vor.u32 %v6347_v48, %v4493_v50  ;;  %v6834_v52 = vld [vmem:[#allocation4] ss:$0 sm:$0xff]  ;;  %v316_v61 = vld [vmem:[#allocation7] sm:$0x3]  ;;  %v4667_v0 = vld [vmem:[#allocation10 + $0xe0] sm:$0xf] }
  0x4d   :  { %417 = vmatpush.bf16.msra.mxu2 %v4536_v21  ;;  %v7386_v60 = vpop.eup %6835  ;;  %v318_v63 = vperm.slane %v316_v61, 0  ;;  %v6393_v1 = vld [vmem:[#allocation10 + $0xec] sm:$0xf0]  ;;  %v4795_v2 = vld [vmem:[#allocation10 + $0x1e0] sm:$0xf]  ;;  %v319_v19 = vperm.slane %v316_v61, 1 }
  0x4e   :  { %v441_v62 = vmul.f32 8.0, %v7386_v60  ;;  %v4668_v3 = vor.u32 %v6393_v1, %v4667_v0  ;;  %v6425_v4 = vld [vmem:[#allocation10 + $0x1ec] sm:$0xf0]  ;;  %v6391_v5 = vld [vmem:[#allocation10 + $0xe4] sm:$0xf]  ;;  %vm445_vm2 = vweird.f32 %v7386_v60  ;;  %vm493_vm8 = vcmask 1040384  }
  0x4f   :  { %v4669_v6 = vld [vmem:[#allocation10 + $0xf0] sm:$0xf0]  ;;  %v4796_v9 = vor.u32 %v6425_v4, %v4795_v2  ;;  %v6423_v11 = vld [vmem:[#allocation10 + $0x1e4] sm:$0xf]  ;;  %v4651_v15 = vld [vmem:[#allocation10 + $0xc0] sm:$0xf] }
  0x50   :  { %405 = vmatpush.bf16.msra.mxu1 %v4524_v26  ;;  %v442_v8 = vsub.f32 1.0, %v441_v62  ;;  %v4672_v10 = vor.u32 %v6391_v5, %v4669_v6  ;;  %v4797_v12 = vld [vmem:[#allocation10 + $0x1f0] sm:$0xf0]  ;;  %914 = vmatpush.bf16.msra.mxu3 %v4668_v3  ;;  %v6389_v16 = vld [vmem:[#allocation10 + $0xcc] sm:$0xf0] }
  0x51   :  { %418 = vmatpush.bf16.msra.mxu2 %v4528_v27  ;;  %v4800_v14 = vor.u32 %v6423_v11, %v4797_v12  ;;  %927 = vmatpush.bf16.msrb.mxu0 %v4796_v9  ;;  %v4779_v17 = vld [vmem:[#allocation10 + $0x1c0] sm:$0xf]  ;;  %v4652_v20 = vor.u32 %v6389_v16, %v4651_v15  ;;  %v6421_v21 = vld [vmem:[#allocation10 + $0x1cc] sm:$0xf0]  ;;  %v6387_v22 = vld [vmem:[#allocation10 + $0xc4] sm:$0xf] }
  0x52   :  { %v443_v23 = vmul.f32 %v7386_v60, %v442_v8  ;;  %v4780_v24 = vor.u32 %v6421_v21, %v4779_v17  ;;  %v4653_v25 = vld [vmem:[#allocation10 + $0xd0] sm:$0xf0]  ;;  %v6419_v26 = vld [vmem:[#allocation10 + $0x1c4] sm:$0xf]  ;;  %v4763_v34 = vld [vmem:[#allocation10 + $0x1a0] sm:$0xf] }
  0x53   :  { %v4781_v27 = vld [vmem:[#allocation10 + $0x1d0] sm:$0xf0]  ;;  %v4656_v29 = vor.u32 %v6387_v22, %v4653_v25  ;;  %v6415_v44 = vld [vmem:[#allocation10 + $0x1a4] sm:$0xf]  ;;  %v4619_v50 = vld [vmem:[#allocation10 + $0x80] sm:$0xf] }
  0x54   :  { %406 = vmatpush.bf16.msra.mxu1 %v4516_v32  ;;  %915 = vmatpush.bf16.msra.mxu3 %v4652_v20  ;;  %v4784_v30 = vor.u32 %v6419_v26, %v4781_v27  ;;  %v4635_v32 = vld [vmem:[#allocation10 + $0xa0] sm:$0xf]  ;;  %v444_v40 = vadd.f32 %v7386_v60, %v443_v23  ;;  %v4621_v61 = vld [vmem:[#allocation10 + $0x90] sm:$0xf0]  ;;  %v6411_v62 = vld [vmem:[#allocation10 + $0x184] sm:$0xf] }
  0x55   :  { %419 = vmatpush.bf16.msra.mxu2 %v4520_v33  ;;  %928 = vmatpush.bf16.msrb.mxu0 %v4780_v24  ;;  %v6385_v33 = vld [vmem:[#allocation10 + $0xac] sm:$0xf0]  ;;  %v4749_v2 = vld [vmem:[#allocation10 + $0x190] sm:$0xf0]  ;;  %v4603_v5 = vld [vmem:[#allocation10 + $0x60] sm:$0xf] }
  0x56   :  { %v4636_v37 = vor.u32 %v6385_v33, %v4635_v32  ;;  %v4752_v4 = vor.u32 %v6411_v62, %v4749_v2  ;;  %v6377_v6 = vld [vmem:[#allocation10 + $0x6c] sm:$0xf0]  ;;  %v6375_v11 = vld [vmem:[#allocation10 + $0x64] sm:$0xf]  ;;  %v4605_v12 = vld [vmem:[#allocation10 + $0x70] sm:$0xf0] }
  0x57   :  { %v4608_v15 = vor.u32 %v6375_v11, %v4605_v12  ;;  %v6407_v16 = vld [vmem:[#allocation10 + $0x164] sm:$0xf]  ;;  %v4733_v17 = vld [vmem:[#allocation10 + $0x170] sm:$0xf0]  ;;  %v4587_v21 = vld [vmem:[#allocation10 + $0x40] sm:$0xf] }
  0x58   :  { %407 = vmatpush.bf16.msra.mxu1 %v4508_v38  ;;  %v6417_v38 = vld [vmem:[#allocation10 + $0x1ac] sm:$0xf0]  ;;  %916 = vmatpush.bf16.msra.mxu3 %v4636_v37  ;;  %v4736_v20 = vor.u32 %v6407_v16, %v4733_v17  ;;  %v4715_v23 = vld [vmem:[#allocation10 + $0x140] sm:$0xf]  ;;  %v4717_v32 = vld [vmem:[#allocation10 + $0x150] sm:$0xf0] }
  0x59   :  { %420 = vmatpush.bf16.msra.mxu2 %v4512_v39  ;;  %v6383_v39 = vld [vmem:[#allocation10 + $0xa4] sm:$0xf]  ;;  %v4764_v42 = vor.u32 %v6417_v38, %v4763_v34  ;;  %v6373_v22 = vld [vmem:[#allocation10 + $0x4c] sm:$0xf0]  ;;  %v4571_v37 = vld [vmem:[#allocation10 + $0x20] sm:$0xf] }
  0x5a   :  { %v4588_v26 = vor.u32 %v6373_v22, %v4587_v21  ;;  %v6405_v27 = vld [vmem:[#allocation10 + $0x14c] sm:$0xf0]  ;;  %v6424_v16 = vld [vmem:[#allocation10 + $0x1ec] sm:$0xf]  ;;  %v6390_v21 = vld [vmem:[#allocation10 + $0xd4] sm:$0xf0] }
  0x5b   :  { %929 = vmatpush.bf16.msrb.mxu0 %v4764_v42  ;;  %v6369_v38 = vld [vmem:[#allocation10 + $0x2c] sm:$0xf0] }
  0x5c   :  { %408 = vmatpush.bf16.msra.mxu1 %v4500_v43  ;;  %v4637_v43 = vld [vmem:[#allocation10 + $0xb0] sm:$0xf0]  ;;  %v4572_v42 = vor.u32 %v6369_v38, %v4571_v37  ;;  %v4643_v37 = vld [vmem:[#allocation10 + $0xa8] sm:$0xf]  ;;  %v6386_v38 = vld [vmem:[#allocation10 + $0xb4] sm:$0xf0] }
  0x5d   :  { %421 = vmatpush.bf16.msra.mxu2 %v4504_v45  ;;  %v4765_v45 = vld [vmem:[#allocation10 + $0x1b0] sm:$0xf0]  ;;  %v4640_v48 = vor.u32 %v6383_v39, %v4637_v43  ;;  %v4699_v39 = vld [vmem:[#allocation10 + $0x120] sm:$0xf]  ;;  %v6401_v43 = vld [vmem:[#allocation10 + $0x12c] sm:$0xf0] }
  0x60   :  { %409 = vmatpush.bf16.msra.mxu1 %v4492_v49  ;;  %v4768_v49 = vor.u32 %v6415_v44, %v4765_v45  ;;  %v6367_v44 = vld [vmem:[#allocation10 + $0x24] sm:$0xf]  ;;  %v4573_v45 = vld [vmem:[#allocation10 + $0x30] sm:$0xf0] }
  0x61   :  { %422 = vmatpush.bf16.msra.mxu2 %v4496_v51  ;;  %v6381_v51 = vld [vmem:[#allocation10 + $0x8c] sm:$0xf0] }
  0x64   :  { %940 = vmatpush.bf16.msrb.mxu1 %v4672_v10  ;;  %v6409_v10 = vld [vmem:[#allocation10 + $0x16c] sm:$0xf0] }
  0x65   :  { %953 = vmatpush.bf16.msrb.mxu2 %v4800_v14 }
  0x68   :  { %941 = vmatpush.bf16.msrb.mxu1 %v4656_v29  ;;  %v4589_v29 = vld [vmem:[#allocation10 + $0x50] sm:$0xf0] }
  0x69   :  { %954 = vmatpush.bf16.msrb.mxu2 %v4784_v30  ;;  %v4716_v30 = vor.u32 %v6405_v27, %v4715_v23  ;;  %v6422_v27 = vld [vmem:[#allocation10 + $0x1d4] sm:$0xf0] }
  0x6c   :  { %942 = vmatpush.bf16.msrb.mxu1 %v4640_v48  ;;  %v6399_v48 = vld [vmem:[#allocation10 + $0x124] sm:$0xf] }
  0x6d   :  { %955 = vmatpush.bf16.msrb.mxu2 %v4768_v49  ;;  %v4701_v49 = vld [vmem:[#allocation10 + $0x130] sm:$0xf0] }
  0x71   :  { %956 = vmatpush.bf16.msrb.mxu2 %v4752_v4 }
  0x75   :  { %957 = vmatpush.bf16.msrb.mxu2 %v4736_v20  ;;  %v4659_v20 = vld [vmem:[#allocation10 + $0xc8] sm:$0xf] }
  0xc6   :  { %v292_v53 = vpop.f32.mrf.mxu0 }
  0xc7   :  { %v293_v54 = vadd.f32 %v6834_v52, %v292_v53  ;;  %v4747_v52 = vld [vmem:[#allocation10 + $0x180] sm:$0xf] }
  0xc9   :  { %v297_v55 = vmul.f32 0.2, %v293_v54  ;;  %vm296_vm1 = vcmp.gt.f32.partialorder %v293_v54, 0.0 }
  0xcb   :  { %v298_v56 = vsel %vm296_vm1, %v293_v54, %v297_v55  ;;  %v4620_v55 = vor.u32 %v6381_v51, %v4619_v50 }
  0xcc   :  { %v299_v57 = vpack.c.bf16 %v298_v56, %v298_v56  ;;  %v6413_v56 = vld [vmem:[#allocation10 + $0x18c] sm:$0xf0] }
  0xcd   :  { %v4748_v59 = vor.u32 %v6413_v56, %v4747_v52  ;;  %917 = vmatpush.bf16.msra.mxu3 %v4620_v55  ;;  %v4704_v52 = vor.u32 %v6399_v48, %v4701_v49  ;;  %v4773_v48 = vld [vmem:[#allocation10 + $0x1b8] sm:$0xf0] }
  0xce   :  { %v294_v58 = vpop.f32.mrf.mxu0  ;;  %410 = vmatmul.bf16.vlgmr.msra.gmra.mxu1 %v299_v57  ;;  %423 = vmatmul.bf16.vlgmr.msra.gmra.mxu2 %v299_v57  ;;  %v6379_v57 = vld [vmem:[#allocation10 + $0x84] sm:$0xf] }
  0xcf   :  { %v7403_v58 = vsel %vm445_vm2, %v7386_v60, %v444_v40  ;;  %v4624_v1 = vor.u32 %v6379_v57, %v4621_v61  ;;  %930 = vmatpush.bf16.msrb.mxu0 %v4748_v59  ;;  %v4604_v60 = vor.u32 %v6377_v6, %v4603_v5  ;;  %v6397_v59 = vld [vmem:[#allocation10 + $0x10c] sm:$0xf0]  ;;  %v6363_v61 = vld [vmem:[#allocation10 + $0x4] sm:$0xf]  ;;  %v4675_v5 = vld [vmem:[#allocation10 + $0xe8] sm:$0xf] }
  0xd0   :  { %v6394_v6 = vld [vmem:[#allocation10 + $0xf4] sm:$0xf0] }
  0xd1   :  { %943 = vmatpush.bf16.msrb.mxu1 %v4624_v1  ;;  %918 = vmatpush.bf16.msra.mxu3 %v4604_v60  ;;  %v4685_v1 = vld [vmem:[#allocation10 + $0x110] sm:$0xf0]  ;;  %v6426_v60 = vld [vmem:[#allocation10 + $0x1f4] sm:$0xf0] }
  0xd5   :  { %944 = vmatpush.bf16.msrb.mxu1 %v4608_v15  ;;  %919 = vmatpush.bf16.msra.mxu3 %v4588_v26  ;;  %v4677_v15 = vld [vmem:[#allocation10 + $0xf8] sm:$0xf0]  ;;  %v4787_v26 = vld [vmem:[#allocation10 + $0x1c8] sm:$0xf] }
  0xd9   :  { %920 = vmatpush.bf16.msra.mxu3 %v4572_v42  ;;  %v4771_v42 = vld [vmem:[#allocation10 + $0x1a8] sm:$0xf] }
 0x14b   :  { %v411_v7 = vpop.f32.mrf.mxu1 }
 0x14c   :  { %v7389_v13 = vadd.f32 %v411_v7, %v318_v63  ;;  %v4731_v7 = vld [vmem:[#allocation10 + $0x160] sm:$0xf] }
 0x14d   :  { %v4732_v14 = vor.u32 %v6409_v10, %v4731_v7  ;;  %v6392_v10 = vld [vmem:[#allocation10 + $0xec] sm:$0xf] }
 0x14e   :  { %v428_v18 = vrot.slane %v7389_v13, 4  ;;  %v4680_v17 = vor.u32 %v6392_v10, %v4677_v15 }
 0x14f   :  { %931 = vmatpush.bf16.msrb.mxu0 %v4732_v14 }
 0x150   :  { %v429_v28 = vadd.f32 %v428_v18, %v7389_v13 }
 0x151   :  { %v424_v31 = vpop.f32.mrf.mxu2 }
 0x152   :  { %v430_v35 = vrot.slane %v429_v28, 2  ;;  %v7394_v36 = vadd.f32 %v424_v31, %v319_v19  ;;  %v6403_v31 = vld [vmem:[#allocation10 + $0x144] sm:$0xf] }
 0x153   :  { %v413_v41 = vpop.f32.mrf.mxu1  ;;  %932 = vmatpush.bf16.msrb.mxu0 %v4716_v30  ;;  %v4661_v30 = vld [vmem:[#allocation10 + $0xd8] sm:$0xf0] }
 0x154   :  { %v431_v46 = vadd.f32 %v430_v35, %v429_v28  ;;  %v434_v47 = vrot.slane %v7394_v36, 4  ;;  %v6371_v28 = vld [vmem:[#allocation10 + $0x44] sm:$0xf]  ;;  %v4720_v35 = vor.u32 %v6403_v31, %v4717_v32  ;;  %v4789_v31 = vld [vmem:[#allocation10 + $0x1d8] sm:$0xf0] }
 0x156   :  { %v432_v53 = vrot.slane %v431_v46, 1  ;;  %v435_v54 = vadd.f32 %v434_v47, %v7394_v36  ;;  %958 = vmatpush.bf16.msrb.mxu2 %v4720_v35  ;;  %v4576_v47 = vor.u32 %v6367_v44, %v4573_v45  ;;  %v6384_v44 = vld [vmem:[#allocation10 + $0xac] sm:$0xf] }
 0x158   :  { %v433_v63 = vadd.f32 %v432_v53, %v431_v46  ;;  %v436_v0 = vrot.slane %v435_v54, 2  ;;  %v4700_v46 = vor.u32 %v6401_v43, %v4699_v39  ;;  %v4555_v53 = vld [vmem:[#allocation10] sm:$0xf]  ;;  %v6418_v43 = vld [vmem:[#allocation10 + $0x1b4] sm:$0xf0] }
 0x159   :  { %v426_v3 = vpop.f32.mrf.mxu2  ;;  %v4772_v45 = vor.u32 %v6418_v43, %v4771_v42  ;;  %v4581_v42 = vld [vmem:[#allocation10 + $0x38] sm:$0xf0]  ;;  %v6400_v43 = vld [vmem:[#allocation10 + $0x12c] sm:$0xf] }
 0x15a   :  { %v447_v8 = vmul.f32 %v7403_v58, %v433_v63  ;;  %v437_v9 = vadd.f32 %v436_v0, %v435_v54  ;;  %933 = vmatpush.bf16.msrb.mxu0 %v4700_v46  ;;  %v4683_v54 = vld [vmem:[#allocation10 + $0x100] sm:$0xf]  ;;  %959 = vmatpush.bf16.msrb.mxu2 %v4704_v52  ;;  %v4557_v63 = vld [vmem:[#allocation10 + $0x10] sm:$0xf0]  ;;  %v6395_v0 = vld [vmem:[#allocation10 + $0x104] sm:$0xf] }
 0x15b   :  { %v4684_v62 = vor.u32 %v6397_v59, %v4683_v54  ;;  %v4560_v4 = vor.u32 %v6363_v61, %v4557_v63  ;;  %v4688_v7 = vor.u32 %v6395_v0, %v4685_v1  ;;  %v4645_v46 = vld [vmem:[#allocation10 + $0xb8] sm:$0xf0]  ;;  %v4627_v52 = vld [vmem:[#allocation10 + $0x88] sm:$0xf] }
 0x15c   :  { %v7407_v18 = vsub.f32 %v7389_v13, %v447_v8  ;;  %v438_v19 = vrot.slane %v437_v9, 1  ;;  %v4592_v13 = vor.u32 %v6371_v28, %v4589_v29  ;;  %v4676_v8 = vor.u32 %v6394_v6, %v4675_v5  ;;  %v6388_v28 = vld [vmem:[#allocation10 + $0xcc] sm:$0xf]  ;;  %v4757_v63 = vld [vmem:[#allocation10 + $0x198] sm:$0xf0] }
 0x15d   :  { %v4788_v29 = vor.u32 %v6422_v27, %v4787_v26  ;;  %v6378_v5 = vld [vmem:[#allocation10 + $0x74] sm:$0xf0]  ;;  %v4739_v6 = vld [vmem:[#allocation10 + $0x168] sm:$0xf]  ;;  %v4597_v26 = vld [vmem:[#allocation10 + $0x58] sm:$0xf0] }
 0x15e   :  { %v451_v24 = vmul.f32 %v7407_v18, %v7407_v18  ;;  %v439_v25 = vadd.f32 %v438_v19, %v437_v9  ;;  %945 = vmatpush.bf16.msrb.mxu1 %v4592_v13  ;;  %934 = vmatpush.bf16.msrb.mxu0 %v4684_v62  ;;  %v4803_v9 = vld [vmem:[#allocation10 + $0x1e8] sm:$0xf]  ;;  %v4805_v19 = vld [vmem:[#allocation10 + $0x1f8] sm:$0xf0]  ;;  %v6420_v13 = vld [vmem:[#allocation10 + $0x1cc] sm:$0xf] }
 0x15f   :  { %v4804_v14 = vor.u32 %v6426_v60, %v4803_v9  ;;  %960 = vmatpush.bf16.msrb.mxu2 %v4688_v7  ;;  %v4792_v35 = vor.u32 %v6420_v13, %v4789_v31  ;;  %v6412_v62 = vld [vmem:[#allocation10 + $0x18c] sm:$0xf]  ;;  %v4579_v31 = vld [vmem:[#allocation10 + $0x28] sm:$0xf] }
 0x160   :  { %v453_v33 = vrot.slane %v451_v24, 4  ;;  %v448_v34 = vmul.f32 %v7403_v58, %v439_v25  ;;  %v4660_v25 = vor.u32 %v6390_v21, %v4659_v20  ;;  %v6376_v9 = vld [vmem:[#allocation10 + $0x6c] sm:$0xf]  ;;  %v4723_v20 = vld [vmem:[#allocation10 + $0x148] sm:$0xf] }
 0x161   :  { %v6404_v27 = vld [vmem:[#allocation10 + $0x14c] sm:$0xf] }
 0x162   :  { %v454_v40 = vadd.f32 %v453_v33, %v451_v24  ;;  %v7413_v41 = vsub.f32 %v7394_v36, %v448_v34  ;;  %v6365_v36 = vld [vmem:[#allocation10 + $0xc] sm:$0xf0]  ;;  %946 = vmatpush.bf16.msrb.mxu1 %v4576_v47  ;;  %979 = vmatpush.bf16.msra.mxu0 %v4804_v14  ;;  %v4808_v24 = vor.u32 %v6424_v16, %v4805_v19  ;;  %v6416_v47 = vld [vmem:[#allocation10 + $0x1ac] sm:$0xf]  ;;  %v4741_v14 = vld [vmem:[#allocation10 + $0x178] sm:$0xf0] }
 0x163   :  { %v4556_v57 = vor.u32 %v6365_v36, %v4555_v53  ;;  %v4664_v34 = vor.u32 %v6388_v28, %v4661_v30  ;;  %v6382_v53 = vld [vmem:[#allocation10 + $0x94] sm:$0xf0]  ;;  %v4755_v36 = vld [vmem:[#allocation10 + $0x188] sm:$0xf]  ;;  %v4725_v28 = vld [vmem:[#allocation10 + $0x158] sm:$0xf0] }
 0x164   :  { %v455_v50 = vrot.slane %v454_v40, 2  ;;  %v452_v51 = vmul.f32 %v7413_v41, %v7413_v41  ;;  %1005 = vmatpush.bf16.msra.mxu2 %v4808_v24  ;;  %v4628_v54 = vor.u32 %v6382_v53, %v4627_v52  ;;  %v6374_v19 = vld [vmem:[#allocation10 + $0x54] sm:$0xf0] }
 0x165   :  { %921 = vmatpush.bf16.msra.mxu3 %v4556_v57  ;;  %v4629_v57 = vld [vmem:[#allocation10 + $0x98] sm:$0xf0]  ;;  %v6398_v52 = vld [vmem:[#allocation10 + $0x114] sm:$0xf0] }
 0x166   :  { %v456_v55 = vadd.f32 %v455_v50, %v454_v40  ;;  %v459_v56 = vrot.slane %v452_v51, 4  ;;  %947 = vmatpush.bf16.msrb.mxu1 %v4560_v4  ;;  %980 = vmatpush.bf16.msra.mxu0 %v4788_v29  ;;  %v4644_v40 = vor.u32 %v6386_v38, %v4643_v37  ;;  %v4648_v50 = vor.u32 %v6384_v44, %v4645_v46  ;;  %v4611_v4 = vld [vmem:[#allocation10 + $0x68] sm:$0xf]  ;;  %v6402_v37 = vld [vmem:[#allocation10 + $0x134] sm:$0xf0] }
 0x167   :  { %v4612_v7 = vor.u32 %v6378_v5, %v4611_v4  ;;  %v4563_v46 = vld [vmem:[#allocation10 + $0x8] sm:$0xf] }
 0x168   :  { %v457_v2 = vrot.slane %v456_v55, 1  ;;  %v460_v3 = vadd.f32 %v459_v56, %v452_v51  ;;  %1006 = vmatpush.bf16.msra.mxu2 %v4792_v35  ;;  %v4776_v51 = vor.u32 %v6416_v47, %v4773_v48  ;;  %v6380_v56 = vld [vmem:[#allocation10 + $0x8c] sm:$0xf]  ;;  %v4707_v35 = vld [vmem:[#allocation10 + $0x128] sm:$0xf] }
 0x169   :  { %966 = vmatpush.bf16.msrb.mxu3 %v4676_v8  ;;  %v4632_v0 = vor.u32 %v6380_v56, %v4629_v57  ;;  %v6410_v8 = vld [vmem:[#allocation10 + $0x174] sm:$0xf0]  ;;  %v4708_v44 = vor.u32 %v6402_v37, %v4707_v35  ;;  %v6396_v57 = vld [vmem:[#allocation10 + $0x10c] sm:$0xf] }
 0x16a   :  { %v458_v11 = vadd.f32 %v457_v2, %v456_v55  ;;  %v461_v12 = vrot.slane %v460_v3, 2  ;;  %992 = vmatpush.bf16.msra.mxu1 %v4680_v17  ;;  %v6414_v55 = vld [vmem:[#allocation10 + $0x194] sm:$0xf0]  ;;  %981 = vmatpush.bf16.msra.mxu0 %v4772_v45  ;;  %v4760_v2 = vor.u32 %v6412_v62, %v4757_v63  ;;  %v4740_v10 = vor.u32 %v6410_v8, %v4739_v6  ;;  %v4595_v17 = vld [vmem:[#allocation10 + $0x48] sm:$0xf] }
 0x16b   :  { %v4756_v61 = vor.u32 %v6414_v55, %v4755_v36  ;;  %v4596_v21 = vor.u32 %v6374_v19, %v4595_v17  ;;  %v4709_v45 = vld [vmem:[#allocation10 + $0x138] sm:$0xf0]  ;;  %v6366_v47 = vld [vmem:[#allocation10 + $0x14] sm:$0xf0]  ;;  %v6364_v36 = vld [vmem:[#allocation10 + $0xc] sm:$0xf] }
 0x16c   :  { %v465_v22 = vmul.f32 %v458_v11, %v7403_v58  ;;  %v462_v23 = vadd.f32 %v461_v12, %v460_v3  ;;  %1007 = vmatpush.bf16.msra.mxu2 %v4776_v51  ;;  %v4613_v11 = vld [vmem:[#allocation10 + $0x78] sm:$0xf0]  ;;  %v6408_v12 = vld [vmem:[#allocation10 + $0x16c] sm:$0xf]  ;;  %v4691_v51 = vld [vmem:[#allocation10 + $0x108] sm:$0xf]  ;;  %v4712_v53 = vor.u32 %v6400_v43, %v4709_v45  ;;  %v4564_v56 = vor.u32 %v6366_v47, %v4563_v46 }
 0x16d   :  { %967 = vmatpush.bf16.msrb.mxu3 %v4660_v25  ;;  %v4616_v15 = vor.u32 %v6376_v9, %v4613_v11  ;;  %v4744_v16 = vor.u32 %v6408_v12, %v4741_v14  ;;  %v4692_v62 = vor.u32 %v6398_v52, %v4691_v51  ;;  %v504_v8 = vld [vmem:[#allocation9] sm:$0x3] }
 0x16e   :  { %v7418_v32 = vadd.f32 0.8, %v465_v22  ;;  %v463_v33 = vrot.slane %v462_v23, 1  ;;  %993 = vmatpush.bf16.msra.mxu1 %v4664_v34  ;;  %982 = vmatpush.bf16.msra.mxu0 %v4756_v61  ;;  %v6406_v22 = vld [vmem:[#allocation10 + $0x154] sm:$0xf0]  ;;  %v4728_v34 = vor.u32 %v6404_v27, %v4725_v28  ;;  %v507_v11 = vperm.slane %v504_v8, 1 }
 0x16f   :  { %v4724_v25 = vor.u32 %v6406_v22, %v4723_v20  ;;  %v4693_v61 = vld [vmem:[#allocation10 + $0x118] sm:$0xf0]  ;;  %v6487_v27 = vld [vmem:[#allocation15 + $0x1dc] sm:$0xf0] }
 0x170   :  { %6837 = vrsqrt.f32 %v7418_v32  ;;  %v464_v39 = vadd.f32 %v463_v33, %v462_v23  ;;  %1008 = vmatpush.bf16.msra.mxu2 %v4760_v2  ;;  %v6372_v23 = vld [vmem:[#allocation10 + $0x4c] sm:$0xf]  ;;  %v6370_v33 = vld [vmem:[#allocation10 + $0x34] sm:$0xf0]  ;;  %vm476_vm7 = vweird.f32 %v7418_v32  ;;  %v5291_v28 = vld [vmem:[#allocation15 + $0x3c0] sm:$0xf] }
 0x171   :  { %968 = vmatpush.bf16.msrb.mxu3 %v4644_v40  ;;  %v4600_v13 = vor.u32 %v6372_v23, %v4597_v26  ;;  %v6368_v40 = vld [vmem:[#allocation10 + $0x2c] sm:$0xf]  ;;  %v5035_v26 = vld [vmem:[#allocation15 + $0x1c0] sm:$0xf] }
 0x172   :  { %v466_v49 = vmul.f32 %v464_v39, %v7403_v58  ;;  %994 = vmatpush.bf16.msra.mxu1 %v4648_v50  ;;  %983 = vmatpush.bf16.msra.mxu0 %v4740_v10  ;;  %v4580_v39 = vor.u32 %v6370_v33, %v4579_v31  ;;  %v4584_v50 = vor.u32 %v6368_v40, %v4581_v42  ;;  %v506_v10 = vperm.slane %v504_v8, 0  ;;  %v6551_v31 = vld [vmem:[#allocation15 + $0x3dc] sm:$0xf0] }
 0x173   :  { %v5547_v33 = vld [vmem:[#allocation15 + $0x5c0] sm:$0xf] }
 0x174   :  { %v7422_v59 = vadd.f32 0.8, %v466_v49  ;;  %1009 = vmatpush.bf16.msra.mxu2 %v4744_v16  ;;  %v5803_v40 = vld [vmem:[#allocation15 + $0x7c0] sm:$0xf] }
 0x175   :  { %969 = vmatpush.bf16.msrb.mxu3 %v4628_v54  ;;  %v4565_v54 = vld [vmem:[#allocation10 + $0x18] sm:$0xf0]  ;;  %v6679_v42 = vld [vmem:[#allocation15 + $0x7dc] sm:$0xf0] }
 0x176   :  { %v7424_v1 = vpop.eup %6837  ;;  %6839 = vrsqrt.f32 %v7422_v59  ;;  %995 = vmatpush.bf16.msra.mxu1 %v4632_v0  ;;  %984 = vmatpush.bf16.msra.mxu0 %v4724_v25  ;;  %vm486_vm4 = vweird.f32 %v7422_v59  ;;  %v4568_v2 = vor.u32 %v6364_v36, %v4565_v54  ;;  %v5804_v45 = vor.u32 %v6679_v42, %v5803_v40  ;;  %v5515_v36 = vld [vmem:[#allocation15 + $0x580] sm:$0xf] }
 0x177   :  { %v471_v3 = vmul.f32 %v7424_v1, %v7418_v32  ;;  %vm477_vm5 = vweird.f32 %v7424_v1  ;;  %v6535_v8 = vld [vmem:[#allocation15 + $0x35c] sm:$0xf0] }
 0x178   :  { %1010 = vmatpush.bf16.msra.mxu2 %v4728_v34  ;;  %vm478_vm9 = vmor %vm476_vm7, %vm477_vm5  ;;  %v6615_v34 = vld [vmem:[#allocation15 + $0x5dc] sm:$0xf0] }
 0x179   :  { %v472_v60 = vmul.f32 %v7424_v1, %v471_v3  ;;  %970 = vmatpush.bf16.msrb.mxu3 %v4612_v7  ;;  %v4696_v3 = vor.u32 %v6396_v57, %v4693_v61  ;;  %v5771_v57 = vld [vmem:[#allocation15 + $0x780] sm:$0xf] }
 0x17a   :  { %996 = vmatpush.bf16.msra.mxu1 %v4616_v15  ;;  %985 = vmatpush.bf16.msra.mxu0 %v4708_v44  ;;  %v6455_v40 = vld [vmem:[#allocation15 + $0xdc] sm:$0xf0] }
 0x17b   :  { %v473_v29 = vmul.f32 0.5, %v472_v60  ;;  %v5163_v42 = vld [vmem:[#allocation15 + $0x2c0] sm:$0xf] }
 0x17c   :  { %v6840_v24 = vpop.eup %6839  ;;  %1011 = vmatpush.bf16.msra.mxu2 %v4712_v53  ;;  %v6543_v53 = vld [vmem:[#allocation15 + $0x39c] sm:$0xf0] }
 0x17d   :  { %v481_v30 = vmul.f32 %v6840_v24, %v7422_v59  ;;  %971 = vmatpush.bf16.msrb.mxu3 %v4596_v21  ;;  %v474_v48 = vsub.f32 1.5, %v473_v29  ;;  %vm487_vm3 = vweird.f32 %v6840_v24  ;;  %v467_v59 = vld [vmem:[%s7807_s5] sm:$0x3] }
 0x17e   :  { %997 = vmatpush.bf16.msra.mxu1 %v4600_v13  ;;  %vm488_vm6 = vmor %vm486_vm4, %vm487_vm3  ;;  %986 = vmatpush.bf16.msra.mxu0 %v4692_v62  ;;  %v5036_v13 = vor.u32 %v6487_v27, %v5035_v26  ;;  %v6527_v26 = vld [vmem:[#allocation15 + $0x31c] sm:$0xf0] }
 0x17f   :  { %v482_v38 = vmul.f32 %v6840_v24, %v481_v30  ;;  %v475_v63 = vmul.f32 %v7424_v1, %v474_v48  ;;  %v5003_v48 = vld [vmem:[#allocation15 + $0x180] sm:$0xf] }
 0x180   :  { %1012 = vmatpush.bf16.msra.mxu2 %v4696_v3  ;;  %v4971_v3 = vld [vmem:[#allocation15 + $0x140] sm:$0xf] }
 0x181   :  { %v483_v49 = vmul.f32 0.5, %v482_v38  ;;  %972 = vmatpush.bf16.msrb.mxu3 %v4580_v39  ;;  %v479_v6 = vsel %vm478_vm9, %v7424_v1, %v475_v63  ;;  %v5292_v38 = vor.u32 %v6551_v31, %v5291_v28  ;;  %v5548_v39 = vor.u32 %v6615_v34, %v5547_v33  ;;  %v6671_v63 = vld [vmem:[#allocation15 + $0x79c] sm:$0xf0] }
 0x182   :  { %998 = vmatpush.bf16.msra.mxu1 %v4584_v50  ;;  %v5259_v50 = vld [vmem:[#allocation15 + $0x380] sm:$0xf]  ;;  %vm1135_vm9 = vcmask 1042434  }
 0x183   :  { %v484_v55 = vsub.f32 1.5, %v483_v49  ;;  %v6479_v49 = vld [vmem:[#allocation15 + $0x19c] sm:$0xf0] }
 0x184   :  { %v5004_v52 = vor.u32 %v6479_v49, %v5003_v48  ;;  %v5451_v27 = vld [vmem:[#allocation15 + $0x500] sm:$0xf] }
 0x185   :  { %v485_v0 = vmul.f32 %v6840_v24, %v484_v55  ;;  %973 = vmatpush.bf16.msrb.mxu3 %v4564_v56  ;;  %v5260_v55 = vor.u32 %v6543_v53, %v5259_v50  ;;  %v6607_v56 = vld [vmem:[#allocation15 + $0x59c] sm:$0xf0] }
 0x186   :  { %999 = vmatpush.bf16.msra.mxu1 %v4568_v2  ;;  %v5516_v62 = vor.u32 %v6607_v56, %v5515_v36  ;;  %v5772_v2 = vor.u32 %v6671_v63, %v5771_v57  ;;  %v5707_v31 = vld [vmem:[#allocation15 + $0x700] sm:$0xf] }
 0x187   :  { %v489_v4 = vsel %vm488_vm6, %v6840_v24, %v485_v0  ;;  %v6519_v48 = vld [vmem:[#allocation15 + $0x2dc] sm:$0xf0] }
 0x188   :  { %v492_v5 = vrot.slane %v489_v4, 7  ;;  %v6471_v4 = vld [vmem:[#allocation15 + $0x15c] sm:$0xf0]  ;;  %v5164_v36 = vor.u32 %v6519_v48, %v5163_v42 }
 0x189   :  { %v5419_v49 = vld [vmem:[#allocation15 + $0x4c0] sm:$0xf] }
 0x18a   :  { %v494_v7 = vsel %vm493_vm8, %v479_v6, %v492_v5  ;;  %v6583_v50 = vld [vmem:[#allocation15 + $0x4dc] sm:$0xf0] }
 0x18b   :  { %v496_v9 = vmul.f32 %v494_v7, %v467_v59  ;;  %v5227_v59 = vld [vmem:[#allocation15 + $0x340] sm:$0xf]  ;;  %v4972_v7 = vor.u32 %v6471_v4, %v4971_v3 }
 0x18c   :  { %v6647_v56 = vld [vmem:[#allocation15 + $0x6dc] sm:$0xf0] }
 0x18d   :  { %v498_v60 = vperm.slane %v496_v9, 0  ;;  %v499_v32 = vperm.slane %v496_v9, 1  ;;  %v5483_v9 = vld [vmem:[#allocation15 + $0x540] sm:$0xf] }
 0x18e   :  { %v4875_v4 = vld [vmem:[#allocation15 + $0x80] sm:$0xf] }
 0x18f   :  { %v503_v12 = vmul.f32 %v499_v32, %v7413_v41  ;;  %v502_v14 = vmul.f32 %v498_v60, %v7407_v18  ;;  %v7442_v41 = vld [vmem:[#allocation12] sm:$0xf] }
 0x190   :  { %v587_v24 = vperm.slane %v7442_v41, 1  ;;  %v586_v25 = vperm.slane %v7442_v41, 0 }
 0x191   :  { %v511_v15 = vadd.f32 %v507_v11, %v503_v12  ;;  %v510_v16 = vadd.f32 %v506_v10, %v502_v14  ;;  %v5228_v10 = vor.u32 %v6535_v8, %v5227_v59  ;;  %v6599_v11 = vld [vmem:[#allocation15 + $0x55c] sm:$0xf0] }
 0x192   :  { %v5739_v12 = vld [vmem:[#allocation15 + $0x740] sm:$0xf] }
 0x193   :  { %vm512_vm10 = vcmp.gt.f32.partialorder %v510_v16, 0.0  ;;  %v514_v17 = vmul.f32 0.2, %v510_v16  ;;  %vm513_vm11 = vcmp.gt.f32.partialorder %v511_v15, 0.0  ;;  %v515_v1 = vmul.f32 0.2, %v511_v15 }
 0x194   :  { %v6447_v59 = vld [vmem:[#allocation15 + $0x9c] sm:$0xf0] }
 0x195   :  { %v516_v19 = vsel %vm512_vm10, %v510_v16, %v514_v17  ;;  %v517_v20 = vsel %vm513_vm11, %v511_v15, %v515_v1  ;;  %v5484_v16 = vor.u32 %v6599_v11, %v5483_v9  ;;  %v6663_v17 = vld [vmem:[#allocation15 + $0x75c] sm:$0xf0]  ;;  %vm1137_vm10 = vcmask 1041408  }
 0x196   :  { %v518_v21 = vpack.c.bf16 %v516_v19, %v516_v19  ;;  %v519_v22 = vpack.c.bf16 %v517_v20, %v517_v20  ;;  %v5740_v20 = vor.u32 %v6663_v17, %v5739_v12  ;;  %v6511_v8 = vld [vmem:[#allocation15 + $0x29c] sm:$0xf0] }
 0x197   :  { %v5387_v9 = vld [vmem:[#allocation15 + $0x480] sm:$0xf] }
 0x198   :  { %922 = vmatmul.bf16.vlgmr.msra.gmra.mxu3 %v518_v21  ;;  %935 = vmatmul.bf16.vlgmr.msrb.gmra.mxu0 %v519_v22  ;;  %v5643_v11 = vld [vmem:[#allocation15 + $0x680] sm:$0xf] }
 0x199   :  { %948 = vmatmul.bf16.vlgmr.msrb.gmra.mxu1 %v518_v21  ;;  %961 = vmatmul.bf16.vlgmr.msrb.gmra.mxu2 %v519_v22 }
 0x19a   :  { %2738 = vmatpush.bf16.msra.mxu3 %v5036_v13  ;;  %2751 = vmatpush.bf16.msrb.mxu0 %v5292_v38  ;;  %v6591_v13 = vld [vmem:[#allocation15 + $0x51c] sm:$0xf0] }
 0x19b   :  { %2764 = vmatpush.bf16.msrb.mxu1 %v5548_v39  ;;  %2777 = vmatpush.bf16.msrb.mxu2 %v5804_v45  ;;  %v5452_v34 = vor.u32 %v6591_v13, %v5451_v27  ;;  %v4907_v39 = vld [vmem:[#allocation15 + $0xc0] sm:$0xf] }
 0x19c   :  { %v5355_v13 = vld [vmem:[#allocation15 + $0x440] sm:$0xf] }
 0x19e   :  { %2739 = vmatpush.bf16.msra.mxu3 %v5004_v52  ;;  %2752 = vmatpush.bf16.msrb.mxu0 %v5260_v55  ;;  %v5675_v55 = vld [vmem:[#allocation15 + $0x6c0] sm:$0xf] }
 0x19f   :  { %2765 = vmatpush.bf16.msrb.mxu1 %v5516_v62  ;;  %2778 = vmatpush.bf16.msrb.mxu2 %v5772_v2  ;;  %v5676_v63 = vor.u32 %v6647_v56, %v5675_v55 }
 0x1a2   :  { %2740 = vmatpush.bf16.msra.mxu3 %v4972_v7  ;;  %2753 = vmatpush.bf16.msrb.mxu0 %v5228_v10  ;;  %v4876_v7 = vor.u32 %v6447_v59, %v4875_v4  ;;  %v6575_v10 = vld [vmem:[#allocation15 + $0x49c] sm:$0xf0] }
 0x1a3   :  { %2766 = vmatpush.bf16.msrb.mxu1 %v5484_v16  ;;  %2779 = vmatpush.bf16.msrb.mxu2 %v5740_v20  ;;  %v6639_v16 = vld [vmem:[#allocation15 + $0x69c] sm:$0xf0] }
 0x1a4   :  { %v4843_v20 = vld [vmem:[#allocation15 + $0x40] sm:$0xf] }
 0x1a7   :  { %2767 = vmatpush.bf16.msrb.mxu1 %v5452_v34 }
 0x1a8   :  { %974 = vmatmul.bf16.vlgmr.msrb.gmra.mxu3 %v518_v21  ;;  %987 = vmatmul.bf16.vlgmr.msra.gmra.mxu0 %v519_v22 }
 0x1a9   :  { %1000 = vmatmul.bf16.vlgmr.msra.gmra.mxu1 %v518_v21  ;;  %1013 = vmatmul.bf16.vlgmr.msra.gmra.mxu2 %v519_v22  ;;  %v4939_v21 = vld [vmem:[#allocation15 + $0x100] sm:$0xf] }
 0x1aa   :  { %v6463_v22 = vld [vmem:[#allocation15 + $0x11c] sm:$0xf0] }
 0x215   :  { %v936_v18 = vpop.f32.mrf.mxu0 }
 0x216   :  { %v949_v23 = vpop.f32.mrf.mxu1 }
 0x217   :  { %v950_v29 = vadd.f32 %v949_v23, %v587_v24  ;;  %v589_v24 = vperm.slane %v7442_v41, 3 }
 0x21b   :  { %v923_v30 = vpop.f32.mrf.mxu3 }
 0x21c   :  { %v924_v35 = vadd.f32 %v923_v30, %v586_v25  ;;  %v962_v37 = vpop.f32.mrf.mxu2  ;;  %v4940_v25 = vor.u32 %v6463_v22, %v4939_v21  ;;  %v6439_v21 = vld [vmem:[#allocation15 + $0x5c] sm:$0xf0] }
 0x21d   :  { %v7446_v43 = vadd.f32 %v962_v37, %v950_v29  ;;  %v938_v44 = vpop.f32.mrf.mxu0  ;;  %v588_v29 = vperm.slane %v7442_v41, 2  ;;  %v4908_v41 = vor.u32 %v6455_v40, %v4907_v39 }
 0x21e   :  { %v7448_v46 = vadd.f32 %v936_v18, %v924_v35  ;;  %v951_v47 = vpop.f32.mrf.mxu1  ;;  %v5195_v18 = vld [vmem:[#allocation15 + $0x300] sm:$0xf]  ;;  %2741 = vmatpush.bf16.msra.mxu3 %v4940_v25 }
 0x21f   :  { %v1024_v51 = vrot.slane %v7446_v43, 4  ;;  %v5196_v30 = vor.u32 %v6527_v26, %v5195_v18  ;;  %v6655_v35 = vld [vmem:[#allocation15 + $0x71c] sm:$0xf0] }
 0x220   :  { %v1018_v54 = vrot.slane %v7448_v46, 4  ;;  %v5708_v38 = vor.u32 %v6655_v35, %v5707_v31  ;;  %v5099_v25 = vld [vmem:[#allocation15 + $0x240] sm:$0xf] }
 0x221   :  { %v1025_v61 = vadd.f32 %v1024_v51, %v7446_v43  ;;  %2754 = vmatpush.bf16.msrb.mxu0 %v5196_v30  ;;  %v6503_v26 = vld [vmem:[#allocation15 + $0x25c] sm:$0xf0] }
 0x222   :  { %v1019_v0 = vadd.f32 %v1018_v54, %v7448_v46  ;;  %2780 = vmatpush.bf16.msrb.mxu2 %v5708_v38  ;;  %v5420_v54 = vor.u32 %v6583_v50, %v5419_v49  ;;  %2742 = vmatpush.bf16.msra.mxu3 %v4908_v41  ;;  %v5100_v30 = vor.u32 %v6503_v26, %v5099_v25  ;;  %v6567_v31 = vld [vmem:[#allocation15 + $0x45c] sm:$0xf0]  ;;  %v5261_v26 = vld [vmem:[#allocation15 + $0x3a0] sm:$0xf0] }
 0x223   :  { %v1026_v5 = vrot.slane %v1025_v61, 2  ;;  %v925_v6 = vpop.f32.mrf.mxu3  ;;  %v5356_v35 = vor.u32 %v6567_v31, %v5355_v13  ;;  %v6631_v38 = vld [vmem:[#allocation15 + $0x65c] sm:$0xf0]  ;;  %v6667_v31 = vld [vmem:[#allocation15 + $0x784] sm:$0xf] }
 0x224   :  { %v1020_v60 = vrot.slane %v1019_v0, 2  ;;  %v964_v32 = vpop.f32.mrf.mxu2  ;;  %2768 = vmatpush.bf16.msrb.mxu1 %v5420_v54  ;;  %v5067_v49 = vld [vmem:[#allocation15 + $0x200] sm:$0xf] }
 0x225   :  { %v1027_v14 = vadd.f32 %v1026_v5, %v1025_v61  ;;  %v988_v15 = vpop.f32.mrf.mxu0  ;;  %2755 = vmatpush.bf16.msrb.mxu0 %v5164_v36  ;;  %v5131_v5 = vld [vmem:[#allocation15 + $0x280] sm:$0xf] }
 0x226   :  { %v1021_v1 = vadd.f32 %v1020_v60, %v1019_v0  ;;  %v1001_v19 = vpop.f32.mrf.mxu1  ;;  %2781 = vmatpush.bf16.msrb.mxu2 %v5676_v63  ;;  %v5132_v32 = vor.u32 %v6511_v8, %v5131_v5  ;;  %2743 = vmatpush.bf16.msra.mxu3 %v4876_v7  ;;  %v6495_v50 = vld [vmem:[#allocation15 + $0x21c] sm:$0xf0] }
 0x227   :  { %v1028_v23 = vrot.slane %v1027_v14, 1  ;;  %v1002_v45 = vadd.f32 %v1001_v19, %v589_v24  ;;  %v5644_v19 = vor.u32 %v6639_v16, %v5643_v11  ;;  %v4844_v24 = vor.u32 %v6439_v21, %v4843_v20  ;;  %v5323_v36 = vld [vmem:[#allocation15 + $0x400] sm:$0xf]  ;;  %v5805_v16 = vld [vmem:[#allocation15 + $0x7e0] sm:$0xf0] }
 0x228   :  { %v1022_v28 = vrot.slane %v1021_v1, 1  ;;  %v6559_v54 = vld [vmem:[#allocation15 + $0x41c] sm:$0xf0]  ;;  %v6475_v21 = vld [vmem:[#allocation15 + $0x184] sm:$0xf] }
 0x229   :  { %v1029_v33 = vadd.f32 %v1028_v23, %v1027_v14  ;;  %2756 = vmatpush.bf16.msrb.mxu0 %v5132_v32  ;;  %v5579_v63 = vld [vmem:[#allocation15 + $0x600] sm:$0xf]  ;;  %v6611_v32 = vld [vmem:[#allocation15 + $0x5c4] sm:$0xf] }
 0x22a   :  { %v1023_v37 = vadd.f32 %v1022_v28, %v1021_v1  ;;  %2782 = vmatpush.bf16.msrb.mxu2 %v5644_v19  ;;  %2744 = vmatpush.bf16.msra.mxu3 %v4844_v24 }
 0x22b   :  { %v1043_v44 = vmul.f32 %v1029_v33, %v7403_v58  ;;  %v975_v47 = vpop.f32.mrf.mxu3 }
 0x22c   :  { %v1042_v51 = vmul.f32 %v1023_v37, %v7403_v58  ;;  %v976_v52 = vadd.f32 %v975_v47, %v588_v29  ;;  %v1014_v53 = vpop.f32.mrf.mxu2  ;;  %v5611_v37 = vld [vmem:[#allocation15 + $0x640] sm:$0xf] }
 0x22d   :  { %v7459_v57 = vsub.f32 %v7446_v43, %v1043_v44  ;;  %v7461_v61 = vadd.f32 %v1014_v53, %v1002_v45  ;;  %v990_v62 = vpop.f32.mrf.mxu0  ;;  %2757 = vmatpush.bf16.msrb.mxu0 %v5100_v30  ;;  %v5612_v42 = vor.u32 %v6631_v38, %v5611_v37  ;;  %v4811_v44 = vld [vmem:[#allocation15] sm:$0xf]  ;;  %v5068_v53 = vor.u32 %v6495_v50, %v5067_v49  ;;  %v4973_v37 = vld [vmem:[#allocation15 + $0x160] sm:$0xf0] }
 0x22e   :  { %v7464_v0 = vsub.f32 %v7448_v46, %v1042_v51  ;;  %v7466_v2 = vadd.f32 %v988_v15, %v976_v52  ;;  %v1003_v3 = vpop.f32.mrf.mxu1  ;;  %v5388_v15 = vor.u32 %v6575_v10, %v5387_v9  ;;  %v6431_v45 = vld [vmem:[#allocation15 + $0x1c] sm:$0xf0]  ;;  %v5324_v62 = vor.u32 %v6559_v54, %v5323_v36  ;;  %v5485_v49 = vld [vmem:[#allocation15 + $0x560] sm:$0xf0] }
 0x22f   :  { %v1051_v6 = vmul.f32 %v7459_v57, %v7459_v57  ;;  %v1036_v43 = vrot.slane %v7461_v61, 4  ;;  %v4812_v48 = vor.u32 %v6431_v45, %v4811_v44  ;;  %2783 = vmatpush.bf16.msrb.mxu2 %v5612_v42  ;;  %v6623_v3 = vld [vmem:[#allocation15 + $0x61c] sm:$0xf0]  ;;  %v6531_v42 = vld [vmem:[#allocation15 + $0x344] sm:$0xf] }
 0x230   :  { %v1050_v46 = vmul.f32 %v7464_v0, %v7464_v0  ;;  %v1030_v60 = vrot.slane %v7466_v2, 4  ;;  %2769 = vmatpush.bf16.msrb.mxu1 %v5388_v15  ;;  %v5580_v5 = vor.u32 %v6623_v3, %v5579_v63  ;;  %v6675_v15 = vld [vmem:[#allocation15 + $0x7c4] sm:$0xf] }
 0x231   :  { %v1060_v12 = vrot.slane %v1051_v6, 4  ;;  %v1037_v14 = vadd.f32 %v1036_v43, %v7461_v61  ;;  %2745 = vmatpush.bf16.msra.mxu3 %v4812_v48  ;;  %2758 = vmatpush.bf16.msrb.mxu0 %v5068_v53  ;;  %v5037_v43 = vld [vmem:[#allocation15 + $0x1e0] sm:$0xf0]  ;;  %v5808_v20 = vor.u32 %v6675_v15, %v5805_v16 }
 0x232   :  { %v1054_v17 = vrot.slane %v1050_v46, 4  ;;  %v1031_v1 = vadd.f32 %v1030_v60, %v7466_v2  ;;  %v5293_v60 = vld [vmem:[#allocation15 + $0x3e0] sm:$0xf0] }
 0x233   :  { %v1061_v22 = vadd.f32 %v1060_v12, %v1051_v6  ;;  %v1038_v18 = vrot.slane %v1037_v14, 2  ;;  %v977_v23 = vpop.f32.mrf.mxu3  ;;  %v6483_v6 = vld [vmem:[#allocation15 + $0x1c4] sm:$0xf]  ;;  %2784 = vmatpush.bf16.msrb.mxu2 %v5580_v5 }
 0x234   :  { %v1055_v27 = vadd.f32 %v1054_v17, %v1050_v46  ;;  %v1032_v28 = vrot.slane %v1031_v1, 2  ;;  %v1016_v29 = vpop.f32.mrf.mxu2  ;;  %2770 = vmatpush.bf16.msrb.mxu1 %v5356_v35  ;;  %v5040_v9 = vor.u32 %v6483_v6, %v5037_v43  ;;  %v6547_v46 = vld [vmem:[#allocation15 + $0x3c4] sm:$0xf] }
 0x235   :  { %v1062_v33 = vrot.slane %v1061_v22, 2  ;;  %v1039_v34 = vadd.f32 %v1038_v18, %v1037_v14  ;;  %v5296_v12 = vor.u32 %v6547_v46, %v5293_v60  ;;  %v5549_v14 = vld [vmem:[#allocation15 + $0x5e0] sm:$0xf0] }
 0x236   :  { %v1056_v39 = vrot.slane %v1055_v27, 2  ;;  %v1033_v40 = vadd.f32 %v1032_v28, %v1031_v1  ;;  %2790 = vmatpush.bf16.msrb.mxu3 %v5040_v9  ;;  %v5552_v19 = vor.u32 %v6611_v32, %v5549_v14  ;;  %v6539_v18 = vld [vmem:[#allocation15 + $0x384] sm:$0xf] }
 0x237   :  { %v1063_v47 = vadd.f32 %v1062_v33, %v1061_v22  ;;  %v1040_v41 = vrot.slane %v1039_v34, 1  ;;  %v5005_v22 = vld [vmem:[#allocation15 + $0x1a0] sm:$0xf0]  ;;  %2803 = vmatpush.bf16.msra.mxu0 %v5296_v12  ;;  %2829 = vmatpush.bf16.msra.mxu2 %v5808_v20  ;;  %v5264_v30 = vor.u32 %v6539_v18, %v5261_v26 }
 0x238   :  { %v1057_v51 = vadd.f32 %v1056_v39, %v1055_v27  ;;  %v1034_v52 = vrot.slane %v1033_v40, 1  ;;  %2771 = vmatpush.bf16.msrb.mxu1 %v5324_v62  ;;  %v5008_v25 = vor.u32 %v6475_v21, %v5005_v22  ;;  %v6603_v27 = vld [vmem:[#allocation15 + $0x584] sm:$0xf] }
 0x239   :  { %v1064_v55 = vrot.slane %v1063_v47, 1  ;;  %v1041_v56 = vadd.f32 %v1040_v41, %v1039_v34  ;;  %v5517_v28 = vld [vmem:[#allocation15 + $0x5a0] sm:$0xf0] }
 0x23a   :  { %v1058_v4 = vrot.slane %v1057_v51, 1  ;;  %v1035_v59 = vadd.f32 %v1034_v52, %v1033_v40  ;;  %v5520_v13 = vor.u32 %v6603_v27, %v5517_v28  ;;  %v5773_v33 = vld [vmem:[#allocation15 + $0x7a0] sm:$0xf0]  ;;  %2791 = vmatpush.bf16.msrb.mxu3 %v5008_v25 }
 0x23b   :  { %v1065_v7 = vadd.f32 %v1064_v55, %v1063_v47  ;;  %v1045_v8 = vmul.f32 %v1041_v56, %v7403_v58  ;;  %v5776_v34 = vor.u32 %v6667_v31, %v5773_v33  ;;  %v6467_v35 = vld [vmem:[#allocation15 + $0x144] sm:$0xf]  ;;  %2804 = vmatpush.bf16.msra.mxu0 %v5264_v30 }
 0x23c   :  { %v1059_v10 = vadd.f32 %v1058_v4, %v1057_v51  ;;  %v1044_v11 = vmul.f32 %v1035_v59, %v7403_v58  ;;  %2816 = vmatpush.bf16.msra.mxu1 %v5552_v19  ;;  %v4976_v40 = vor.u32 %v6467_v35, %v4973_v37  ;;  %v5229_v45 = vld [vmem:[#allocation15 + $0x360] sm:$0xf0] }
 0x23d   :  { %v1079_v17 = vmul.f32 %v1065_v7, %v7403_v58  ;;  %v7480_v1 = vsub.f32 %v7461_v61, %v1045_v8  ;;  %v6595_v47 = vld [vmem:[#allocation15 + $0x544] sm:$0xf]  ;;  %2830 = vmatpush.bf16.msra.mxu2 %v5776_v34  ;;  %v5232_v48 = vor.u32 %v6531_v42, %v5229_v45 }
 0x23e   :  { %v1078_v23 = vmul.f32 %v1059_v10, %v7403_v58  ;;  %v7484_v24 = vsub.f32 %v7466_v2, %v1044_v11  ;;  %v6659_v50 = vld [vmem:[#allocation15 + $0x744] sm:$0xf]  ;;  %v5488_v53 = vor.u32 %v6595_v47, %v5485_v49  ;;  %2792 = vmatpush.bf16.msrb.mxu3 %v4976_v40 }
 0x23f   :  { %v7486_v29 = vadd.f32 0.8, %v1079_v17  ;;  %v1053_v61 = vmul.f32 %v7480_v1, %v7480_v1  ;;  %v5741_v51 = vld [vmem:[#allocation15 + $0x760] sm:$0xf0]  ;;  %2805 = vmatpush.bf16.msra.mxu0 %v5232_v48 }
 0x240   :  { %v1052_v2 = vmul.f32 %v7484_v24, %v7484_v24  ;;  %v7492_v38 = vadd.f32 0.8, %v1078_v23  ;;  %2817 = vmatpush.bf16.msra.mxu1 %v5520_v13  ;;  %v5744_v36 = vor.u32 %v6659_v50, %v5741_v51  ;;  %v6459_v54 = vld [vmem:[#allocation15 + $0x104] sm:$0xf] }
 0x241   :  { %6841 = vrsqrt.f32 %v7486_v29  ;;  %v1072_v39 = vrot.slane %v1053_v61, 4  ;;  %v4941_v55 = vld [vmem:[#allocation15 + $0x120] sm:$0xf0]  ;;  %vm1103_vm14 = vweird.f32 %v7486_v29 }
 0x242   :  { %v1066_v44 = vrot.slane %v1052_v2, 4  ;;  %6843 = vrsqrt.f32 %v7492_v38  ;;  %v4944_v62 = vor.u32 %v6459_v54, %v4941_v55  ;;  %v6523_v63 = vld [vmem:[#allocation15 + $0x304] sm:$0xf]  ;;  %2831 = vmatpush.bf16.msra.mxu2 %v5744_v36  ;;  %vm1093_vm15 = vweird.f32 %v7492_v38 }
 0x243   :  { %v1073_v41 = vadd.f32 %v1072_v39, %v1053_v61  ;;  %v5197_v3 = vld [vmem:[#allocation15 + $0x320] sm:$0xf0] }
 0x244   :  { %v1067_v52 = vadd.f32 %v1066_v44, %v1052_v2  ;;  %v5200_v59 = vor.u32 %v6523_v63, %v5197_v3  ;;  %v6587_v5 = vld [vmem:[#allocation15 + $0x504] sm:$0xf]  ;;  %2818 = vmatpush.bf16.msra.mxu1 %v5488_v53  ;;  %2793 = vmatpush.bf16.msrb.mxu3 %v4944_v62 }
 0x245   :  { %v1074_v56 = vrot.slane %v1073_v41, 2  ;;  %v5453_v6 = vld [vmem:[#allocation15 + $0x520] sm:$0xf0] }
 0x246   :  { %v1068_v4 = vrot.slane %v1067_v52, 2  ;;  %v5456_v8 = vor.u32 %v6587_v5, %v5453_v6  ;;  %v6651_v9 = vld [vmem:[#allocation15 + $0x704] sm:$0xf]  ;;  %2806 = vmatpush.bf16.msra.mxu0 %v5200_v59 }
 0x247   :  { %v7496_v43 = vpop.eup %6841  ;;  %v1075_v7 = vadd.f32 %v1074_v56, %v1073_v41  ;;  %v5709_v46 = vld [vmem:[#allocation15 + $0x720] sm:$0xf0] }
 0x248   :  { %v6451_v60 = vld [vmem:[#allocation15 + $0xc4] sm:$0xf]  ;;  %v1069_v32 = vadd.f32 %v1068_v4, %v1067_v52  ;;  %v5712_v10 = vor.u32 %v6651_v9, %v5709_v46  ;;  %v1098_v20 = vmul.f32 %v7496_v43, %v7486_v29  ;;  %v7500_v25 = vpop.eup %6843  ;;  %2819 = vmatpush.bf16.msra.mxu1 %v5456_v8  ;;  %vm1104_vm12 = vweird.f32 %v7496_v43 }
 0x249   :  { %v4909_v11 = vld [vmem:[#allocation15 + $0xe0] sm:$0xf0]  ;;  %v1076_v15 = vrot.slane %v1075_v7, 1  ;;  %v1088_v37 = vmul.f32 %v7500_v25, %v7492_v38  ;;  %vm1094_vm13 = vweird.f32 %v7500_v25  ;;  %vm1105_vm0 = vmor %vm1103_vm14, %vm1104_vm12 }
 0x24a   :  { %v6515_v12 = vld [vmem:[#allocation15 + $0x2c4] sm:$0xf]  ;;  %v4912_v16 = vor.u32 %v6451_v60, %v4909_v11  ;;  %v1070_v21 = vrot.slane %v1069_v32, 1  ;;  %2832 = vmatpush.bf16.msra.mxu2 %v5712_v10  ;;  %v1099_v42 = vmul.f32 %v7496_v43, %v1098_v20  ;;  %vm7523_vm3 = vmor %vm1093_vm15, %vm1094_vm13 }
 0x24b   :  { %v5165_v14 = vld [vmem:[#allocation15 + $0x2e0] sm:$0xf0]  ;;  %v1077_v26 = vadd.f32 %v1076_v15, %v1075_v7  ;;  %v1089_v63 = vmul.f32 %v7500_v25, %v1088_v37 }
 0x24c   :  { %v6579_v17 = vld [vmem:[#allocation15 + $0x4c4] sm:$0xf]  ;;  %v5168_v22 = vor.u32 %v6515_v12, %v5165_v14  ;;  %v1071_v13 = vadd.f32 %v1070_v21, %v1069_v32  ;;  %2794 = vmatpush.bf16.msrb.mxu3 %v4912_v16  ;;  %v1100_v3 = vmul.f32 0.5, %v1099_v42 }
 0x24d   :  { %v5421_v19 = vld [vmem:[#allocation15 + $0x4e0] sm:$0xf0]  ;;  %v1081_v2 = vmul.f32 %v1077_v26, %v7403_v58  ;;  %v1090_v16 = vmul.f32 0.5, %v1089_v63 }
 0x24e   :  { %v6643_v18 = vld [vmem:[#allocation15 + $0x6c4] sm:$0xf]  ;;  %v5424_v27 = vor.u32 %v6579_v17, %v5421_v19  ;;  %v1080_v39 = vmul.f32 %v1071_v13, %v7403_v58  ;;  %2807 = vmatpush.bf16.msra.mxu0 %v5168_v22  ;;  %v1101_v17 = vsub.f32 1.5, %v1100_v3 }
 0x24f   :  { %v5677_v23 = vld [vmem:[#allocation15 + $0x6e0] sm:$0xf0]  ;;  %v7507_v44 = vadd.f32 0.8, %v1081_v2  ;;  %v1091_v26 = vsub.f32 1.5, %v1090_v16 }
 0x250   :  { %v5680_v28 = vor.u32 %v6643_v18, %v5677_v23  ;;  %v6443_v61 = vld [vmem:[#allocation15 + $0x84] sm:$0xf]  ;;  %2820 = vmatpush.bf16.msra.mxu1 %v5424_v27  ;;  %v7509_v48 = vadd.f32 0.8, %v1080_v39  ;;  %v1102_v27 = vmul.f32 %v7496_v43, %v1101_v17 }
 0x251   :  { %v4877_v30 = vld [vmem:[#allocation15 + $0xa0] sm:$0xf0]  ;;  %6845 = vrsqrt.f32 %v7507_v44  ;;  %v1092_v2 = vmul.f32 %v7500_v25, %v1091_v26  ;;  %vm1123_vm4 = vweird.f32 %v7507_v44 }
 0x252   :  { %v6507_v31 = vld [vmem:[#allocation15 + $0x284] sm:$0xf]  ;;  %v4880_v34 = vor.u32 %v6443_v61, %v4877_v30  ;;  %2833 = vmatpush.bf16.msra.mxu2 %v5680_v28  ;;  %6847 = vrsqrt.f32 %v7509_v48  ;;  %vm1113_vm5 = vweird.f32 %v7509_v48 }
 0x253   :  { %v5133_v33 = vld [vmem:[#allocation15 + $0x2a0] sm:$0xf0] }
 0x254   :  { %v6571_v35 = vld [vmem:[#allocation15 + $0x484] sm:$0xf]  ;;  %v5136_v45 = vor.u32 %v6507_v31, %v5133_v33  ;;  %2795 = vmatpush.bf16.msrb.mxu3 %v4880_v34  ;;  %v1106_v31 = vsel %vm1105_vm0, %v7496_v43, %v1102_v27  ;;  %v1096_v43 = vsel %vm7523_vm3, %v7500_v25, %v1092_v2  ;;  %v6672_v2 = vld [vmem:[#allocation15 + $0x7a4] sm:$0xf0] }
 0x255   :  { %v5389_v40 = vld [vmem:[#allocation15 + $0x4a0] sm:$0xf0]  ;;  %v1131_v38 = vrot.slane %v1106_v31, 7  ;;  %v6608_v31 = vld [vmem:[#allocation15 + $0x5a4] sm:$0xf0] }
 0x256   :  { %v5392_v47 = vor.u32 %v6571_v35, %v5389_v40  ;;  %v6635_v41 = vld [vmem:[#allocation15 + $0x684] sm:$0xf]  ;;  %2808 = vmatpush.bf16.msra.mxu0 %v5136_v45 }
 0x257   :  { %v5645_v49 = vld [vmem:[#allocation15 + $0x6a0] sm:$0xf0]  ;;  %v6846_v15 = vpop.eup %6845  ;;  %v1134_v45 = vsel %vm493_vm8, %v1096_v43, %v1131_v38  ;;  %v6472_v38 = vld [vmem:[#allocation15 + $0x164] sm:$0xf0] }
 0x258   :  { %v6435_v50 = vld [vmem:[#allocation15 + $0x44] sm:$0xf]  ;;  %v5648_v51 = vor.u32 %v6635_v41, %v5645_v49  ;;  %2821 = vmatpush.bf16.msra.mxu1 %v5392_v47  ;;  %v6848_v21 = vpop.eup %6847  ;;  %v1118_v22 = vmul.f32 %v6846_v15, %v7507_v44  ;;  %vm1124_vm1 = vweird.f32 %v6846_v15  ;;  %v1082_v44 = vld [vmem:[%s7811_s9] sm:$0xf] }
 0x259   :  { %v4845_v52 = vld [vmem:[#allocation15 + $0x60] sm:$0xf0]  ;;  %v1108_v18 = vmul.f32 %v6848_v21, %v7509_v48  ;;  %vm1114_vm2 = vweird.f32 %v6848_v21  ;;  %vm1125_vm6 = vmor %vm1123_vm4, %vm1124_vm1  ;;  %v1154_v41 = vld [vmem:[#allocation13] sm:$0xf] }
 0x25a   :  { %v6499_v53 = vld [vmem:[#allocation15 + $0x244] sm:$0xf]  ;;  %v4848_v54 = vor.u32 %v6435_v50, %v4845_v52  ;;  %2834 = vmatpush.bf16.msra.mxu2 %v5648_v51  ;;  %v1119_v23 = vmul.f32 %v6846_v15, %v1118_v22  ;;  %vm1115_vm7 = vmor %vm1113_vm5, %vm1114_vm2  ;;  %v1156_v50 = vperm.slane %v1154_v41, 0  ;;  %v1157_v51 = vperm.slane %v1154_v41, 1 }
 0x25b   :  { %v5101_v36 = vld [vmem:[#allocation15 + $0x260] sm:$0xf0]  ;;  %v1109_v28 = vmul.f32 %v6848_v21, %v1108_v18  ;;  %v1158_v25 = vperm.slane %v1154_v41, 2  ;;  %v1159_v52 = vperm.slane %v1154_v41, 3  ;;  %v5011_v18 = vld [vmem:[#allocation15 + $0x188] sm:$0xf] }
 0x25c   :  { %v6563_v55 = vld [vmem:[#allocation15 + $0x444] sm:$0xf]  ;;  %v5104_v4 = vor.u32 %v6499_v53, %v5101_v36  ;;  %2796 = vmatpush.bf16.msrb.mxu3 %v4848_v54  ;;  %v1120_v61 = vmul.f32 0.5, %v1119_v23  ;;  %v6480_v23 = vld [vmem:[#allocation15 + $0x1a4] sm:$0xf0] }
 0x25d   :  { %v5357_v56 = vld [vmem:[#allocation15 + $0x460] sm:$0xf0]  ;;  %v1110_v30 = vmul.f32 0.5, %v1109_v28  ;;  %v5012_v34 = vor.u32 %v6480_v23, %v5011_v18  ;;  %v4851_v23 = vld [vmem:[#allocation15 + $0x48] sm:$0xf] }
 0x25e   :  { %v6627_v62 = vld [vmem:[#allocation15 + $0x644] sm:$0xf]  ;;  %v5360_v59 = vor.u32 %v6563_v55, %v5357_v56  ;;  %2809 = vmatpush.bf16.msra.mxu0 %v5104_v4  ;;  %v1121_v13 = vsub.f32 1.5, %v1120_v61  ;;  %v5267_v61 = vld [vmem:[#allocation15 + $0x388] sm:$0xf] }
 0x25f   :  { %v5613_v5 = vld [vmem:[#allocation15 + $0x660] sm:$0xf0]  ;;  %v1111_v33 = vsub.f32 1.5, %v1110_v30  ;;  %v6544_v30 = vld [vmem:[#allocation15 + $0x3a4] sm:$0xf0] }
 0x260   :  { %v6427_v6 = vld [vmem:[#allocation15 + $0x4] sm:$0xf]  ;;  %v5616_v7 = vor.u32 %v6627_v62, %v5613_v5  ;;  %2822 = vmatpush.bf16.msra.mxu1 %v5360_v59  ;;  %v1122_v35 = vmul.f32 %v6846_v15, %v1121_v13  ;;  %v5523_v13 = vld [vmem:[#allocation15 + $0x588] sm:$0xf] }
 0x261   :  { %v4813_v8 = vld [vmem:[#allocation15 + $0x20] sm:$0xf0]  ;;  %v1112_v29 = vmul.f32 %v6848_v21, %v1111_v33  ;;  %v5779_v33 = vld [vmem:[#allocation15 + $0x788] sm:$0xf] }
 0x262   :  { %v6491_v9 = vld [vmem:[#allocation15 + $0x204] sm:$0xf]  ;;  %v4816_v60 = vor.u32 %v6427_v6, %v4813_v8  ;;  %2835 = vmatpush.bf16.msra.mxu2 %v5616_v7  ;;  %v1126_v37 = vsel %vm1125_vm6, %v6846_v15, %v1122_v35  ;;  %v5043_v7 = vld [vmem:[#allocation15 + $0x1c8] sm:$0xf]  ;;  %v5268_v35 = vor.u32 %v6544_v30, %v5267_v61  ;;  %v5780_v43 = vor.u32 %v6672_v2, %v5779_v33 }
 0x263   :  { %v5069_v46 = vld [vmem:[#allocation15 + $0x220] sm:$0xf0]  ;;  %v1116_v39 = vsel %vm1115_vm7, %v6848_v21, %v1112_v29  ;;  %v1133_v42 = vrot.slane %v1126_v37, 5  ;;  %v6488_v8 = vld [vmem:[#allocation15 + $0x1e4] sm:$0xf0]  ;;  %v5524_v37 = vor.u32 %v6608_v31, %v5523_v13 }
 0x264   :  { %v6555_v32 = vld [vmem:[#allocation15 + $0x404] sm:$0xf]  ;;  %v5072_v12 = vor.u32 %v6491_v9, %v5069_v46  ;;  %2797 = vmatpush.bf16.msrb.mxu3 %v4816_v60  ;;  %v1132_v40 = vrot.slane %v1116_v39, 6  ;;  %v5299_v9 = vld [vmem:[#allocation15 + $0x3c8] sm:$0xf] }
 0x265   :  { %v5325_v10 = vld [vmem:[#allocation15 + $0x420] sm:$0xf0]  ;;  %v6552_v46 = vld [vmem:[#allocation15 + $0x3e4] sm:$0xf0] }
 0x266   :  { %v6619_v11 = vld [vmem:[#allocation15 + $0x604] sm:$0xf]  ;;  %v5328_v19 = vor.u32 %v6555_v32, %v5325_v10  ;;  %2810 = vmatpush.bf16.msra.mxu0 %v5072_v12  ;;  %v1136_v47 = vsel %vm1135_vm9, %v1132_v40, %v1133_v42  ;;  %v5555_v60 = vld [vmem:[#allocation15 + $0x5c8] sm:$0xf]  ;;  %v5300_v17 = vor.u32 %v6552_v46, %v5299_v9 }
 0x267   :  { %v5581_v14 = vld [vmem:[#allocation15 + $0x620] sm:$0xf0]  ;;  %v1138_v48 = vsel %vm1137_vm10, %v1134_v45, %v1136_v47  ;;  %v6680_v12 = vld [vmem:[#allocation15 + $0x7e4] sm:$0xf0] }
 0x268   :  { %v5584_v20 = vor.u32 %v6619_v11, %v5581_v14  ;;  %2823 = vmatpush.bf16.msra.mxu1 %v5328_v19  ;;  %v1140_v49 = vmul.f32 %v1138_v48, %v1082_v44  ;;  %v5044_v11 = vor.u32 %v6488_v8, %v5043_v7  ;;  %v4979_v29 = vld [vmem:[#allocation15 + $0x148] sm:$0xf] }
 0x269   :  { %v5235_v39 = vld [vmem:[#allocation15 + $0x348] sm:$0xf]  ;;  %v4980_v41 = vor.u32 %v6472_v38, %v4979_v29 }
 0x26a   :  { %2836 = vmatpush.bf16.msra.mxu2 %v5584_v20  ;;  %v1142_v53 = vperm.slane %v1140_v49, 0  ;;  %v1143_v36 = vperm.slane %v1140_v49, 1  ;;  %v1144_v54 = vperm.slane %v1140_v49, 2  ;;  %v1145_v55 = vperm.slane %v1140_v49, 3  ;;  %v6536_v40 = vld [vmem:[#allocation15 + $0x364] sm:$0xf0] }
 0x26b   :  { %v5491_v42 = vld [vmem:[#allocation15 + $0x548] sm:$0xf]  ;;  %v5236_v48 = vor.u32 %v6536_v40, %v5235_v39 }
 0x26c   :  { %v1150_v56 = vmul.f32 %v1142_v53, %v7464_v0  ;;  %v1151_v62 = vmul.f32 %v1143_v36, %v7459_v57  ;;  %v1152_v63 = vmul.f32 %v1144_v54, %v7484_v24  ;;  %v1153_v3 = vmul.f32 %v1145_v55, %v7480_v1  ;;  %v6616_v0 = vld [vmem:[#allocation15 + $0x5e4] sm:$0xf0] }
 0x26d   :  { %v5811_v1 = vld [vmem:[#allocation15 + $0x7c8] sm:$0xf]  ;;  %v5556_v27 = vor.u32 %v6616_v0, %v5555_v60 }
 0x26e   :  { %v1164_v4 = vadd.f32 %v1156_v50, %v1150_v56  ;;  %v1165_v59 = vadd.f32 %v1157_v51, %v1151_v62  ;;  %v1166_v5 = vadd.f32 %v1158_v25, %v1152_v63  ;;  %v1167_v6 = vadd.f32 %v1159_v52, %v1153_v3  ;;  %v6600_v44 = vld [vmem:[#allocation15 + $0x564] sm:$0xf0] }
 0x26f   :  { %v5812_v28 = vor.u32 %v6680_v12, %v5811_v1  ;;  %v5747_v45 = vld [vmem:[#allocation15 + $0x748] sm:$0xf]  ;;  %v5492_v51 = vor.u32 %v6600_v44, %v5491_v42 }
 0x270   :  { %vm1168_vm11 = vcmp.gt.f32.partialorder %v1164_v4, 0.0  ;;  %vm1169_vm12 = vcmp.gt.f32.partialorder %v1165_v59, 0.0  ;;  %vm1170_vm13 = vcmp.gt.f32.partialorder %v1166_v5, 0.0  ;;  %vm1171_vm14 = vcmp.gt.f32.partialorder %v1167_v6, 0.0  ;;  %v6664_v47 = vld [vmem:[#allocation15 + $0x764] sm:$0xf0] }
 0x271   :  { %v1172_v32 = vmul.f32 0.2, %v1164_v4  ;;  %v1173_v57 = vmul.f32 0.2, %v1165_v59  ;;  %v1174_v10 = vmul.f32 0.2, %v1166_v5  ;;  %v5748_v25 = vor.u32 %v6664_v47, %v5747_v45 }
 0x272   :  { %v1175_v24 = vmul.f32 0.2, %v1167_v6  ;;  %v4947_v49 = vld [vmem:[#allocation15 + $0x108] sm:$0xf] }
 0x273   :  { %v1176_v14 = vsel %vm1168_vm11, %v1164_v4, %v1172_v32  ;;  %v1177_v15 = vsel %vm1169_vm12, %v1165_v59, %v1173_v57  ;;  %v1178_v16 = vsel %vm1170_vm13, %v1166_v5, %v1174_v10  ;;  %v6464_v50 = vld [vmem:[#allocation15 + $0x124] sm:$0xf0] }
 0x274   :  { %v1179_v19 = vsel %vm1171_vm14, %v1167_v6, %v1175_v24  ;;  %v7542_v20 = vpack.c.bf16 %v1176_v14, %v1176_v14  ;;  %v7544_v21 = vpack.c.bf16 %v1177_v15, %v1177_v15  ;;  %v7546_v22 = vpack.c.bf16 %v1178_v16, %v1178_v16  ;;  %v5203_v52 = vld [vmem:[#allocation15 + $0x308] sm:$0xf] }
 0x275   :  { %v7548_v26 = vpack.c.bf16 %v1179_v19, %v1179_v19  ;;  %v6528_v53 = vld [vmem:[#allocation15 + $0x324] sm:$0xf0]  ;;  %v4948_v62 = vor.u32 %v6464_v50, %v4947_v49  ;;  %v5045_v49 = vld [vmem:[#allocation15 + $0x1e8] sm:$0xf0] }
 0x276   :  { %2746 = vmatmul.bf16.vlgmr.msra.gmra.mxu3 %v7542_v20  ;;  %2759 = vmatmul.bf16.vlgmr.msrb.gmra.mxu0 %v7544_v21  ;;  %v5459_v36 = vld [vmem:[#allocation15 + $0x508] sm:$0xf]  ;;  %v5204_v63 = vor.u32 %v6528_v53, %v5203_v52  ;;  %v6548_v50 = vld [vmem:[#allocation15 + $0x3cc] sm:$0xf] }
 0x277   :  { %2772 = vmatmul.bf16.vlgmr.msrb.gmra.mxu1 %v7546_v22  ;;  %2785 = vmatmul.bf16.vlgmr.msrb.gmra.mxu2 %v7548_v26  ;;  %v6592_v54 = vld [vmem:[#allocation15 + $0x524] sm:$0xf0] }
 0x278   :  { %2842 = vmatpush.bf16.msra.mxu3 %v5044_v11  ;;  %2855 = vmatpush.bf16.msrb.mxu0 %v5300_v17  ;;  %v5715_v55 = vld [vmem:[#allocation15 + $0x708] sm:$0xf]  ;;  %v5460_v59 = vor.u32 %v6592_v54, %v5459_v36  ;;  %v5557_v36 = vld [vmem:[#allocation15 + $0x5e8] sm:$0xf0] }
 0x279   :  { %2868 = vmatpush.bf16.msrb.mxu1 %v5556_v27  ;;  %2881 = vmatpush.bf16.msrb.mxu2 %v5812_v28  ;;  %v6656_v56 = vld [vmem:[#allocation15 + $0x724] sm:$0xf0]  ;;  %v6676_v54 = vld [vmem:[#allocation15 + $0x7cc] sm:$0xf] }
 0x27a   :  { %v4915_v3 = vld [vmem:[#allocation15 + $0xc8] sm:$0xf]  ;;  %v5716_v5 = vor.u32 %v6656_v56, %v5715_v55  ;;  %v5813_v55 = vld [vmem:[#allocation15 + $0x7e8] sm:$0xf0] }
 0x27b   :  { %v6456_v4 = vld [vmem:[#allocation15 + $0xe4] sm:$0xf0] }
 0x27c   :  { %2843 = vmatpush.bf16.msra.mxu3 %v5012_v34  ;;  %2856 = vmatpush.bf16.msrb.mxu0 %v5268_v35  ;;  %v5171_v6 = vld [vmem:[#allocation15 + $0x2c8] sm:$0xf]  ;;  %v4916_v0 = vor.u32 %v6456_v4, %v4915_v3  ;;  %v6476_v4 = vld [vmem:[#allocation15 + $0x18c] sm:$0xf] }
 0x27d   :  { %2869 = vmatpush.bf16.msrb.mxu1 %v5524_v37  ;;  %2882 = vmatpush.bf16.msrb.mxu2 %v5780_v43  ;;  %v6520_v7 = vld [vmem:[#allocation15 + $0x2e4] sm:$0xf0] }
 0x27e   :  { %v5427_v8 = vld [vmem:[#allocation15 + $0x4c8] sm:$0xf]  ;;  %v5172_v32 = vor.u32 %v6520_v7, %v5171_v6  ;;  %v5816_v6 = vor.u32 %v6676_v54, %v5813_v55  ;;  %v6540_v7 = vld [vmem:[#allocation15 + $0x38c] sm:$0xf] }
 0x27f   :  { %v6584_v9 = vld [vmem:[#allocation15 + $0x4e4] sm:$0xf0]  ;;  %v5141_v54 = vld [vmem:[#allocation15 + $0x2a8] sm:$0xf0] }
 0x280   :  { %2844 = vmatpush.bf16.msra.mxu3 %v4980_v41  ;;  %2857 = vmatpush.bf16.msrb.mxu0 %v5236_v48  ;;  %v5683_v46 = vld [vmem:[#allocation15 + $0x6c8] sm:$0xf]  ;;  %v5428_v24 = vor.u32 %v6584_v9, %v5427_v8  ;;  %v6484_v48 = vld [vmem:[#allocation15 + $0x1cc] sm:$0xf] }
 0x281   :  { %2870 = vmatpush.bf16.msrb.mxu1 %v5492_v51  ;;  %2883 = vmatpush.bf16.msrb.mxu2 %v5748_v25  ;;  %v6648_v60 = vld [vmem:[#allocation15 + $0x6e4] sm:$0xf0]  ;;  %v5301_v51 = vld [vmem:[#allocation15 + $0x3e8] sm:$0xf0] }
 0x282   :  { %v4883_v57 = vld [vmem:[#allocation15 + $0x88] sm:$0xf]  ;;  %v5684_v11 = vor.u32 %v6648_v60, %v5683_v46  ;;  %v6612_v25 = vld [vmem:[#allocation15 + $0x5cc] sm:$0xf]  ;;  %v5304_v3 = vor.u32 %v6548_v50, %v5301_v51 }
 0x283   :  { %v6448_v10 = vld [vmem:[#allocation15 + $0xa4] sm:$0xf0]  ;;  %v5269_v8 = vld [vmem:[#allocation15 + $0x3a8] sm:$0xf0] }
 0x284   :  { %2845 = vmatpush.bf16.msra.mxu3 %v4948_v62  ;;  %2858 = vmatpush.bf16.msrb.mxu0 %v5204_v63  ;;  %v5139_v1 = vld [vmem:[#allocation15 + $0x288] sm:$0xf]  ;;  %v4884_v19 = vor.u32 %v6448_v10, %v4883_v57  ;;  %v5048_v63 = vor.u32 %v6484_v48, %v5045_v49  ;;  %v6604_v9 = vld [vmem:[#allocation15 + $0x58c] sm:$0xf]  ;;  %v5272_v57 = vor.u32 %v6540_v7, %v5269_v8 }
 0x285   :  { %2871 = vmatpush.bf16.msrb.mxu1 %v5460_v59  ;;  %2884 = vmatpush.bf16.msrb.mxu2 %v5716_v5  ;;  %v6512_v12 = vld [vmem:[#allocation15 + $0x2a4] sm:$0xf0]  ;;  %v5013_v59 = vld [vmem:[#allocation15 + $0x1a8] sm:$0xf0]  ;;  %v5560_v5 = vor.u32 %v6612_v25, %v5557_v36 }
 0x286   :  { %v5395_v14 = vld [vmem:[#allocation15 + $0x488] sm:$0xf]  ;;  %2798 = vmatmul.bf16.vlgmr.msrb.gmra.mxu3 %v7542_v20  ;;  %2811 = vmatmul.bf16.vlgmr.msra.gmra.mxu0 %v7544_v21  ;;  %v5140_v18 = vor.u32 %v6512_v12, %v5139_v1  ;;  %v5525_v46 = vld [vmem:[#allocation15 + $0x5a8] sm:$0xf0] }
 0x287   :  { %v6576_v15 = vld [vmem:[#allocation15 + $0x4a4] sm:$0xf0]  ;;  %2824 = vmatmul.bf16.vlgmr.msra.gmra.mxu1 %v7546_v22  ;;  %2837 = vmatmul.bf16.vlgmr.msra.gmra.mxu2 %v7548_v26  ;;  %v6668_v60 = vld [vmem:[#allocation15 + $0x78c] sm:$0xf] }
 0x288   :  { %v5651_v16 = vld [vmem:[#allocation15 + $0x688] sm:$0xf]  ;;  %2846 = vmatpush.bf16.msra.mxu3 %v4916_v0  ;;  %2859 = vmatpush.bf16.msrb.mxu0 %v5172_v32  ;;  %v5396_v28 = vor.u32 %v6576_v15, %v5395_v14  ;;  %v5781_v0 = vld [vmem:[#allocation15 + $0x7a8] sm:$0xf0]  ;;  %v5016_v32 = vor.u32 %v6476_v4, %v5013_v59 }
 0x289   :  { %v6640_v17 = vld [vmem:[#allocation15 + $0x6a4] sm:$0xf0]  ;;  %2872 = vmatpush.bf16.msrb.mxu1 %v5428_v24  ;;  %2885 = vmatpush.bf16.msrb.mxu2 %v5684_v11  ;;  %v6468_v10 = vld [vmem:[#allocation15 + $0x14c] sm:$0xf]  ;;  %v5528_v11 = vor.u32 %v6604_v9, %v5525_v46  ;;  %v5784_v1 = vor.u32 %v6668_v60, %v5781_v0 }
 0x28a   :  { %v6440_v27 = vld [vmem:[#allocation15 + $0x64] sm:$0xf0]  ;;  %v5652_v61 = vor.u32 %v6640_v17, %v5651_v16  ;;  %v4981_v24 = vld [vmem:[#allocation15 + $0x168] sm:$0xf0] }
 0x28b   :  { %v5107_v30 = vld [vmem:[#allocation15 + $0x248] sm:$0xf]  ;;  %v4852_v29 = vor.u32 %v6440_v27, %v4851_v23  ;;  %v6532_v12 = vld [vmem:[#allocation15 + $0x34c] sm:$0xf] }
 0x28c   :  { %v6504_v13 = vld [vmem:[#allocation15 + $0x264] sm:$0xf0]  ;;  %2847 = vmatpush.bf16.msra.mxu3 %v4884_v19  ;;  %2860 = vmatpush.bf16.msrb.mxu0 %v5140_v18  ;;  %v5237_v14 = vld [vmem:[#allocation15 + $0x368] sm:$0xf0]  ;;  %v4984_v18 = vor.u32 %v6468_v10, %v4981_v24 }
 0x28d   :  { %v5363_v31 = vld [vmem:[#allocation15 + $0x448] sm:$0xf]  ;;  %v5108_v38 = vor.u32 %v6504_v13, %v5107_v30  ;;  %2873 = vmatpush.bf16.msrb.mxu1 %v5396_v28  ;;  %2886 = vmatpush.bf16.msrb.mxu2 %v5652_v61  ;;  %v6596_v15 = vld [vmem:[#allocation15 + $0x54c] sm:$0xf]  ;;  %v5240_v23 = vor.u32 %v6532_v12, %v5237_v14 }
 0x28e   :  { %v6568_v33 = vld [vmem:[#allocation15 + $0x464] sm:$0xf0]  ;;  %v5493_v16 = vld [vmem:[#allocation15 + $0x568] sm:$0xf0] }
 0x28f   :  { %v5619_v2 = vld [vmem:[#allocation15 + $0x648] sm:$0xf]  ;;  %v5364_v40 = vor.u32 %v6568_v33, %v5363_v31  ;;  %v6660_v17 = vld [vmem:[#allocation15 + $0x74c] sm:$0xf]  ;;  %v5496_v61 = vor.u32 %v6596_v15, %v5493_v16 }
 0x290   :  { %v6632_v34 = vld [vmem:[#allocation15 + $0x664] sm:$0xf0]  ;;  %2848 = vmatpush.bf16.msra.mxu3 %v4852_v29  ;;  %2861 = vmatpush.bf16.msrb.mxu0 %v5108_v38  ;;  %v5749_v19 = vld [vmem:[#allocation15 + $0x768] sm:$0xf0] }
 0x291   :  { %v4819_v35 = vld [vmem:[#allocation15 + $0x8] sm:$0xf]  ;;  %v5620_v42 = vor.u32 %v6632_v34, %v5619_v2  ;;  %2874 = vmatpush.bf16.msrb.mxu1 %v5364_v40  ;;  %v6460_v27 = vld [vmem:[#allocation15 + $0x10c] sm:$0xf]  ;;  %v5752_v30 = vor.u32 %v6660_v17, %v5749_v19 }
 0x292   :  { %v6432_v37 = vld [vmem:[#allocation15 + $0x24] sm:$0xf0]  ;;  %v4949_v28 = vld [vmem:[#allocation15 + $0x128] sm:$0xf0] }
 0x293   :  { %v5075_v43 = vld [vmem:[#allocation15 + $0x208] sm:$0xf]  ;;  %v4820_v52 = vor.u32 %v6432_v37, %v4819_v35  ;;  %2887 = vmatpush.bf16.msrb.mxu2 %v5620_v42  ;;  %v6524_v13 = vld [vmem:[#allocation15 + $0x30c] sm:$0xf]  ;;  %v4952_v29 = vor.u32 %v6460_v27, %v4949_v28  ;;  %v6489_v27 = vld [vmem:[#allocation15 + $0x1ec] sm:$0xf0] }
 0x294   :  { %v6496_v39 = vld [vmem:[#allocation15 + $0x224] sm:$0xf0]  ;;  %v5205_v31 = vld [vmem:[#allocation15 + $0x328] sm:$0xf0]  ;;  %v5307_v28 = vld [vmem:[#allocation15 + $0x3d0] sm:$0xf] }
 0x295   :  { %v5331_v44 = vld [vmem:[#allocation15 + $0x408] sm:$0xf]  ;;  %v5076_v53 = vor.u32 %v6496_v39, %v5075_v43  ;;  %2849 = vmatpush.bf16.msra.mxu3 %v4820_v52  ;;  %v6588_v33 = vld [vmem:[#allocation15 + $0x50c] sm:$0xf]  ;;  %v5208_v38 = vor.u32 %v6524_v13, %v5205_v31 }
 0x296   :  { %v6560_v45 = vld [vmem:[#allocation15 + $0x424] sm:$0xf0]  ;;  %v5461_v2 = vld [vmem:[#allocation15 + $0x528] sm:$0xf0] }
 0x297   :  { %v5587_v47 = vld [vmem:[#allocation15 + $0x608] sm:$0xf]  ;;  %v5332_v56 = vor.u32 %v6560_v45, %v5331_v44  ;;  %2862 = vmatpush.bf16.msrb.mxu0 %v5076_v53  ;;  %v6652_v34 = vld [vmem:[#allocation15 + $0x70c] sm:$0xf]  ;;  %v5464_v39 = vor.u32 %v6588_v33, %v5461_v2  ;;  %v6617_v33 = vld [vmem:[#allocation15 + $0x5ec] sm:$0xf0] }
 0x298   :  { %v6624_v41 = vld [vmem:[#allocation15 + $0x624] sm:$0xf0]  ;;  %2850 = vmatmul.bf16.vlgmr.msra.gmra.mxu3 %v7542_v20  ;;  %v5717_v35 = vld [vmem:[#allocation15 + $0x728] sm:$0xf0]  ;;  %v5819_v2 = vld [vmem:[#allocation15 + $0x7d0] sm:$0xf] }
 0x299   :  { %v5588_v62 = vor.u32 %v6624_v41, %v5587_v47  ;;  %2875 = vmatpush.bf16.msrb.mxu1 %v5332_v56  ;;  %2894 = vmatpush.bf16.msrb.mxu3 %v5048_v63  ;;  %v6452_v37 = vld [vmem:[#allocation15 + $0xcc] sm:$0xf]  ;;  %v5720_v40 = vor.u32 %v6652_v34, %v5717_v35  ;;  %v6681_v34 = vld [vmem:[#allocation15 + $0x7ec] sm:$0xf0] }
 0x29a   :  { %2863 = vmatmul.bf16.vlgmr.msrb.gmra.mxu0 %v7544_v21  ;;  %v4917_v43 = vld [vmem:[#allocation15 + $0xe8] sm:$0xf0] }
 0x29b   :  { %2888 = vmatpush.bf16.msrb.mxu2 %v5588_v62  ;;  %2907 = vmatpush.bf16.msra.mxu0 %v5304_v3  ;;  %v6516_v42 = vld [vmem:[#allocation15 + $0x2cc] sm:$0xf]  ;;  %v4920_v49 = vor.u32 %v6452_v37, %v4917_v43  ;;  %v5019_v43 = vld [vmem:[#allocation15 + $0x190] sm:$0xf] }
 0x29c   :  { %2876 = vmatmul.bf16.vlgmr.msrb.gmra.mxu1 %v7546_v22  ;;  %v5173_v44 = vld [vmem:[#allocation15 + $0x2e8] sm:$0xf0] }
 0x29d   :  { %2920 = vmatpush.bf16.msra.mxu1 %v5560_v5  ;;  %2895 = vmatpush.bf16.msrb.mxu3 %v5016_v32  ;;  %v6580_v45 = vld [vmem:[#allocation15 + $0x4cc] sm:$0xf]  ;;  %v5176_v50 = vor.u32 %v6516_v42, %v5173_v44  ;;  %v5820_v42 = vor.u32 %v6681_v34, %v5819_v2  ;;  %v5275_v44 = vld [vmem:[#allocation15 + $0x390] sm:$0xf] }
 0x29e   :  { %2889 = vmatmul.bf16.vlgmr.msrb.gmra.mxu2 %v7548_v26  ;;  %v5429_v47 = vld [vmem:[#allocation15 + $0x4e8] sm:$0xf0]  ;;  %v6513_v2 = vld [vmem:[#allocation15 + $0x2ac] sm:$0xf0] }
 0x29f   :  { %2933 = vmatpush.bf16.msra.mxu2 %v5816_v6  ;;  %2908 = vmatpush.bf16.msra.mxu0 %v5272_v57  ;;  %v6644_v41 = vld [vmem:[#allocation15 + $0x6cc] sm:$0xf]  ;;  %v5432_v52 = vor.u32 %v6580_v45, %v5429_v47  ;;  %v6545_v45 = vld [vmem:[#allocation15 + $0x3ac] sm:$0xf0] }
 0x2a0   :  { %v5685_v48 = vld [vmem:[#allocation15 + $0x6e8] sm:$0xf0]  ;;  %v5531_v47 = vld [vmem:[#allocation15 + $0x590] sm:$0xf] }
 0x2a1   :  { %2921 = vmatpush.bf16.msra.mxu1 %v5528_v11  ;;  %2896 = vmatpush.bf16.msrb.mxu3 %v4984_v18  ;;  %v6444_v51 = vld [vmem:[#allocation15 + $0x8c] sm:$0xf]  ;;  %v5688_v53 = vor.u32 %v6644_v41, %v5685_v48  ;;  %v6609_v41 = vld [vmem:[#allocation15 + $0x5ac] sm:$0xf0] }
 0x2a2   :  { %v4885_v25 = vld [vmem:[#allocation15 + $0xa8] sm:$0xf0]  ;;  %v5787_v48 = vld [vmem:[#allocation15 + $0x790] sm:$0xf] }
 0x2a3   :  { %2934 = vmatpush.bf16.msra.mxu2 %v5784_v1  ;;  %2909 = vmatpush.bf16.msra.mxu0 %v5240_v23  ;;  %v6508_v36 = vld [vmem:[#allocation15 + $0x28c] sm:$0xf]  ;;  %v4888_v3 = vor.u32 %v6444_v51, %v4885_v25  ;;  %v5051_v23 = vld [vmem:[#allocation15 + $0x1d0] sm:$0xf]  ;;  %v5276_v51 = vor.u32 %v6545_v45, %v5275_v44 }
 0x2a4   :  { %v6572_v55 = vld [vmem:[#allocation15 + $0x48c] sm:$0xf]  ;;  %v5144_v4 = vor.u32 %v6508_v36, %v5141_v54  ;;  %v4987_v25 = vld [vmem:[#allocation15 + $0x150] sm:$0xf] }
 0x2a5   :  { %2922 = vmatpush.bf16.msra.mxu1 %v5496_v61  ;;  %2897 = vmatpush.bf16.msrb.mxu3 %v4952_v29  ;;  %v5397_v56 = vld [vmem:[#allocation15 + $0x4a8] sm:$0xf0]  ;;  %v6553_v61 = vld [vmem:[#allocation15 + $0x3ec] sm:$0xf0] }
 0x2a6   :  { %v6636_v62 = vld [vmem:[#allocation15 + $0x68c] sm:$0xf]  ;;  %v5400_v6 = vor.u32 %v6572_v55, %v5397_v56  ;;  %v5308_v37 = vor.u32 %v6553_v61, %v5307_v28  ;;  %v5243_v54 = vld [vmem:[#allocation15 + $0x350] sm:$0xf] }
 0x2a7   :  { %2935 = vmatpush.bf16.msra.mxu2 %v5752_v30  ;;  %2910 = vmatpush.bf16.msra.mxu0 %v5208_v38  ;;  %v5653_v63 = vld [vmem:[#allocation15 + $0x6a8] sm:$0xf0]  ;;  %v5563_v30 = vld [vmem:[#allocation15 + $0x5d0] sm:$0xf]  ;;  %v5052_v38 = vor.u32 %v6489_v27, %v5051_v23 }
 0x2a8   :  { %v6436_v59 = vld [vmem:[#allocation15 + $0x4c] sm:$0xf]  ;;  %v5656_v7 = vor.u32 %v6636_v62, %v5653_v63  ;;  %v6537_v55 = vld [vmem:[#allocation15 + $0x36c] sm:$0xf0] }
 0x2a9   :  { %2923 = vmatpush.bf16.msra.mxu1 %v5464_v39  ;;  %2898 = vmatpush.bf16.msrb.mxu3 %v4920_v49  ;;  %v4853_v5 = vld [vmem:[#allocation15 + $0x68] sm:$0xf0]  ;;  %v6481_v39 = vld [vmem:[#allocation15 + $0x1ac] sm:$0xf0] }
 0x2aa   :  { %v6500_v8 = vld [vmem:[#allocation15 + $0x24c] sm:$0xf]  ;;  %v4856_v10 = vor.u32 %v6436_v59, %v4853_v5  ;;  %v6673_v49 = vld [vmem:[#allocation15 + $0x7ac] sm:$0xf0]  ;;  %v5244_v59 = vor.u32 %v6537_v55, %v5243_v54 }
 0x2ab   :  { %2936 = vmatpush.bf16.msra.mxu2 %v5720_v40  ;;  %2911 = vmatpush.bf16.msra.mxu0 %v5176_v50  ;;  %v5109_v9 = vld [vmem:[#allocation15 + $0x268] sm:$0xf0]  ;;  %v5564_v40 = vor.u32 %v6617_v33, %v5563_v30  ;;  %v5020_v50 = vor.u32 %v6481_v39, %v5019_v43  ;;  %v5788_v36 = vor.u32 %v6673_v49, %v5787_v48  ;;  %v5499_v56 = vld [vmem:[#allocation15 + $0x550] sm:$0xf] }
 0x2ac   :  { %v6564_v46 = vld [vmem:[#allocation15 + $0x44c] sm:$0xf]  ;;  %v5112_v24 = vor.u32 %v6500_v8, %v5109_v9  ;;  %v6601_v62 = vld [vmem:[#allocation15 + $0x56c] sm:$0xf0] }
 0x2ad   :  { %2924 = vmatpush.bf16.msra.mxu1 %v5432_v52  ;;  %v5365_v60 = vld [vmem:[#allocation15 + $0x468] sm:$0xf0]  ;;  %2899 = vmatpush.bf16.msrb.mxu3 %v4888_v3  ;;  %v6473_v52 = vld [vmem:[#allocation15 + $0x16c] sm:$0xf0] }
 0x2ae   :  { %v6628_v0 = vld [vmem:[#allocation15 + $0x64c] sm:$0xf]  ;;  %v5368_v14 = vor.u32 %v6564_v46, %v5365_v60  ;;  %v5755_v63 = vld [vmem:[#allocation15 + $0x750] sm:$0xf] }
 0x2af   :  { %2937 = vmatpush.bf16.msra.mxu2 %v5688_v53  ;;  %v5621_v32 = vld [vmem:[#allocation15 + $0x668] sm:$0xf0]  ;;  %2912 = vmatpush.bf16.msra.mxu0 %v5144_v4  ;;  %v5532_v53 = vor.u32 %v6609_v41, %v5531_v47  ;;  %v6665_v3 = vld [vmem:[#allocation15 + $0x76c] sm:$0xf0]  ;;  %v4988_v4 = vor.u32 %v6473_v52, %v4987_v25 }
 0x2b0   :  { %v6428_v57 = vld [vmem:[#allocation15 + $0xc] sm:$0xf]  ;;  %v5624_v15 = vor.u32 %v6628_v0, %v5621_v32  ;;  %v4955_v5 = vld [vmem:[#allocation15 + $0x110] sm:$0xf]  ;;  %v5756_v8 = vor.u32 %v6665_v3, %v5755_v63 }
 0x2b1   :  { %v4821_v11 = vld [vmem:[#allocation15 + $0x28] sm:$0xf0]  ;;  %2925 = vmatpush.bf16.msra.mxu1 %v5400_v6  ;;  %2900 = vmatpush.bf16.msrb.mxu3 %v4856_v10  ;;  %v6465_v6 = vld [vmem:[#allocation15 + $0x12c] sm:$0xf0] }
 0x2b2   :  { %v6492_v1 = vld [vmem:[#allocation15 + $0x20c] sm:$0xf]  ;;  %v4824_v13 = vor.u32 %v6428_v57, %v4821_v11  ;;  %v5211_v9 = vld [vmem:[#allocation15 + $0x310] sm:$0xf]  ;;  %v4956_v10 = vor.u32 %v6465_v6, %v4955_v5  ;;  %v5053_v5 = vld [vmem:[#allocation15 + $0x1f0] sm:$0xf0] }
 0x2b3   :  { %v5077_v12 = vld [vmem:[#allocation15 + $0x228] sm:$0xf0]  ;;  %2938 = vmatpush.bf16.msra.mxu2 %v5656_v7  ;;  %2913 = vmatpush.bf16.msra.mxu0 %v5112_v24  ;;  %v5500_v7 = vor.u32 %v6601_v62, %v5499_v56  ;;  %v6529_v46 = vld [vmem:[#allocation15 + $0x32c] sm:$0xf0]  ;;  %v6549_v6 = vld [vmem:[#allocation15 + $0x3d4] sm:$0xf] }
 0x2b4   :  { %v6556_v16 = vld [vmem:[#allocation15 + $0x40c] sm:$0xf]  ;;  %v5080_v31 = vor.u32 %v6492_v1, %v5077_v12  ;;  %v5467_v60 = vld [vmem:[#allocation15 + $0x510] sm:$0xf]  ;;  %v5212_v24 = vor.u32 %v6529_v46, %v5211_v9 }
 0x2b5   :  { %v5333_v17 = vld [vmem:[#allocation15 + $0x428] sm:$0xf0]  ;;  %2926 = vmatpush.bf16.msra.mxu1 %v5368_v14  ;;  %2901 = vmatpush.bf16.msrb.mxu3 %v4824_v13  ;;  %v6593_v0 = vld [vmem:[#allocation15 + $0x52c] sm:$0xf0] }
 0x2b6   :  { %v6620_v19 = vld [vmem:[#allocation15 + $0x60c] sm:$0xf]  ;;  %v5336_v35 = vor.u32 %v6556_v16, %v5333_v17  ;;  %v5723_v32 = vld [vmem:[#allocation15 + $0x710] sm:$0xf]  ;;  %v5468_v12 = vor.u32 %v6593_v0, %v5467_v60  ;;  %v5565_v60 = vld [vmem:[#allocation15 + $0x5f0] sm:$0xf0] }
 0x2b7   :  { %v5589_v18 = vld [vmem:[#allocation15 + $0x628] sm:$0xf0]  ;;  %2939 = vmatpush.bf16.msra.mxu2 %v5624_v15  ;;  %2914 = vmatpush.bf16.msra.mxu0 %v5080_v31  ;;  %v6657_v57 = vld [vmem:[#allocation15 + $0x72c] sm:$0xf0]  ;;  %v6677_v0 = vld [vmem:[#allocation15 + $0x7d4] sm:$0xf] }
 0x2b8   :  { %v5592_v29 = vor.u32 %v6620_v19, %v5589_v18  ;;  %2902 = vmatmul.bf16.vlgmr.msrb.gmra.mxu3 %v7542_v20  ;;  %v4923_v11 = vld [vmem:[#allocation15 + $0xd0] sm:$0xf]  ;;  %v5724_v14 = vor.u32 %v6657_v57, %v5723_v32  ;;  %v5821_v32 = vld [vmem:[#allocation15 + $0x7f0] sm:$0xf0] }
 0x2b9   :  { %2927 = vmatpush.bf16.msra.mxu1 %v5336_v35  ;;  %2946 = vmatpush.bf16.msra.mxu3 %v5052_v38  ;;  %v6457_v1 = vld [vmem:[#allocation15 + $0xec] sm:$0xf0] }
 0x2ba   :  { %2915 = vmatmul.bf16.vlgmr.msra.gmra.mxu0 %v7544_v21  ;;  %v5179_v15 = vld [vmem:[#allocation15 + $0x2d0] sm:$0xf]  ;;  %v4924_v27 = vor.u32 %v6457_v1, %v4923_v11  ;;  %v6477_v1 = vld [vmem:[#allocation15 + $0x194] sm:$0xf] }
 0x2bb   :  { %2940 = vmatpush.bf16.msra.mxu2 %v5592_v29  ;;  %2959 = vmatpush.bf16.msrb.mxu0 %v5308_v37  ;;  %v6521_v16 = vld [vmem:[#allocation15 + $0x2ec] sm:$0xf0] }
 0x2bc   :  { %2928 = vmatmul.bf16.vlgmr.msra.gmra.mxu1 %v7546_v22  ;;  %v5435_v17 = vld [vmem:[#allocation15 + $0x4d0] sm:$0xf]  ;;  %v5180_v28 = vor.u32 %v6521_v16, %v5179_v15  ;;  %v5824_v15 = vor.u32 %v6677_v0, %v5821_v32  ;;  %v6541_v16 = vld [vmem:[#allocation15 + $0x394] sm:$0xf] }
 0x2bd   :  { %2972 = vmatpush.bf16.msrb.mxu1 %v5564_v40  ;;  %2947 = vmatpush.bf16.msra.mxu3 %v5020_v50  ;;  %v6585_v19 = vld [vmem:[#allocation15 + $0x4ec] sm:$0xf0]  ;;  %v5149_v0 = vld [vmem:[#allocation15 + $0x2b0] sm:$0xf0] }
 0x2be   :  { %2941 = vmatmul.bf16.vlgmr.msra.gmra.mxu2 %v7548_v26  ;;  %v5691_v18 = vld [vmem:[#allocation15 + $0x6d0] sm:$0xf]  ;;  %v5436_v13 = vor.u32 %v6585_v19, %v5435_v17  ;;  %v5277_v17 = vld [vmem:[#allocation15 + $0x3b0] sm:$0xf0] }
 0x2bf   :  { %2985 = vmatpush.bf16.msrb.mxu2 %v5820_v42  ;;  %2960 = vmatpush.bf16.msrb.mxu0 %v5276_v51  ;;  %v6649_v23 = vld [vmem:[#allocation15 + $0x6ec] sm:$0xf0]  ;;  %v6605_v19 = vld [vmem:[#allocation15 + $0x594] sm:$0xf] }
 0x2c0   :  { %v4891_v61 = vld [vmem:[#allocation15 + $0x90] sm:$0xf]  ;;  %v5692_v31 = vor.u32 %v6649_v23, %v5691_v18  ;;  %v5533_v18 = vld [vmem:[#allocation15 + $0x5b0] sm:$0xf0] }
 0x2c1   :  { %2973 = vmatpush.bf16.msrb.mxu1 %v5532_v53  ;;  %2948 = vmatpush.bf16.msra.mxu3 %v4988_v4  ;;  %v6449_v30 = vld [vmem:[#allocation15 + $0xac] sm:$0xf0]  ;;  %v6669_v23 = vld [vmem:[#allocation15 + $0x794] sm:$0xf] }
 0x2c2   :  { %v5147_v33 = vld [vmem:[#allocation15 + $0x290] sm:$0xf]  ;;  %v4892_v37 = vor.u32 %v6449_v30, %v4891_v61  ;;  %v5280_v61 = vor.u32 %v6541_v16, %v5277_v17  ;;  %v6469_v30 = vld [vmem:[#allocation15 + $0x154] sm:$0xf] }
 0x2c3   :  { %2986 = vmatpush.bf16.msrb.mxu2 %v5788_v36  ;;  %2961 = vmatpush.bf16.msrb.mxu0 %v5244_v59  ;;  %v5403_v34 = vld [vmem:[#allocation15 + $0x490] sm:$0xf]  ;;  %v5148_v43 = vor.u32 %v6513_v2, %v5147_v33  ;;  %v6485_v59 = vld [vmem:[#allocation15 + $0x1d4] sm:$0xf] }
 0x2c4   :  { %v6577_v35 = vld [vmem:[#allocation15 + $0x4ac] sm:$0xf0]  ;;  %v6533_v2 = vld [vmem:[#allocation15 + $0x354] sm:$0xf] }
 0x2c5   :  { %2974 = vmatpush.bf16.msrb.mxu1 %v5500_v7  ;;  %2949 = vmatpush.bf16.msra.mxu3 %v4956_v10  ;;  %v5659_v29 = vld [vmem:[#allocation15 + $0x690] sm:$0xf]  ;;  %v5404_v42 = vor.u32 %v6577_v35, %v5403_v34  ;;  %v5309_v7 = vld [vmem:[#allocation15 + $0x3f0] sm:$0xf0] }
 0x2c6   :  { %v6641_v38 = vld [vmem:[#allocation15 + $0x6ac] sm:$0xf0]  ;;  %v5312_v11 = vor.u32 %v6549_v6, %v5309_v7  ;;  %v5245_v34 = vld [vmem:[#allocation15 + $0x370] sm:$0xf0] }
 0x2c7   :  { %2987 = vmatpush.bf16.msrb.mxu2 %v5756_v8  ;;  %2962 = vmatpush.bf16.msrb.mxu0 %v5212_v24  ;;  %v4859_v39 = vld [vmem:[#allocation15 + $0x50] sm:$0xf]  ;;  %v5660_v44 = vor.u32 %v6641_v38, %v5659_v29  ;;  %v6613_v8 = vld [vmem:[#allocation15 + $0x5d4] sm:$0xf]  ;;  %v5056_v24 = vor.u32 %v6485_v59, %v5053_v5 }
 0x2c8   :  { %v6441_v40 = vld [vmem:[#allocation15 + $0x6c] sm:$0xf0]  ;;  %v6597_v35 = vld [vmem:[#allocation15 + $0x554] sm:$0xf] }
 0x2c9   :  { %2975 = vmatpush.bf16.msrb.mxu1 %v5468_v12  ;;  %2950 = vmatpush.bf16.msra.mxu3 %v4924_v27  ;;  %v5115_v45 = vld [vmem:[#allocation15 + $0x250] sm:$0xf]  ;;  %v4860_v25 = vor.u32 %v6441_v40, %v4859_v39  ;;  %v5021_v12 = vld [vmem:[#allocation15 + $0x1b0] sm:$0xf0]  ;;  %v5248_v39 = vor.u32 %v6533_v2, %v5245_v34 }
 0x2ca   :  { %v6505_v47 = vld [vmem:[#allocation15 + $0x26c] sm:$0xf0]  ;;  %v5789_v27 = vld [vmem:[#allocation15 + $0x7b0] sm:$0xf0] }
 0x2cb   :  { %2988 = vmatpush.bf16.msrb.mxu2 %v5724_v14  ;;  %2963 = vmatpush.bf16.msrb.mxu0 %v5180_v28  ;;  %v5371_v41 = vld [vmem:[#allocation15 + $0x450] sm:$0xf]  ;;  %v5116_v52 = vor.u32 %v6505_v47, %v5115_v45  ;;  %v5568_v14 = vor.u32 %v6613_v8, %v5565_v60  ;;  %v5024_v28 = vor.u32 %v6477_v1, %v5021_v12  ;;  %v5501_v29 = vld [vmem:[#allocation15 + $0x570] sm:$0xf0] }
 0x2cc   :  { %v6569_v48 = vld [vmem:[#allocation15 + $0x46c] sm:$0xf0]  ;;  %v5792_v33 = vor.u32 %v6669_v23, %v5789_v27  ;;  %v6661_v38 = vld [vmem:[#allocation15 + $0x754] sm:$0xf] }
 0x2cd   :  { %2976 = vmatpush.bf16.msrb.mxu1 %v5436_v13  ;;  %v5627_v49 = vld [vmem:[#allocation15 + $0x650] sm:$0xf]  ;;  %2951 = vmatpush.bf16.msra.mxu3 %v4892_v37  ;;  %v5372_v55 = vor.u32 %v6569_v48, %v5371_v41  ;;  %v4989_v13 = vld [vmem:[#allocation15 + $0x170] sm:$0xf0] }
 0x2ce   :  { %v6633_v50 = vld [vmem:[#allocation15 + $0x66c] sm:$0xf0]  ;;  %v5757_v37 = vld [vmem:[#allocation15 + $0x770] sm:$0xf0] }
 0x2cf   :  { %2989 = vmatpush.bf16.msrb.mxu2 %v5692_v31  ;;  %v4827_v51 = vld [vmem:[#allocation15 + $0x10] sm:$0xf]  ;;  %2964 = vmatpush.bf16.msrb.mxu0 %v5148_v43  ;;  %v5628_v56 = vor.u32 %v6633_v50, %v5627_v49  ;;  %v5536_v31 = vor.u32 %v6605_v19, %v5533_v18  ;;  %v4992_v43 = vor.u32 %v6469_v30, %v4989_v13  ;;  %v6461_v40 = vld [vmem:[#allocation15 + $0x114] sm:$0xf] }
 0x2d0   :  { %v6433_v53 = vld [vmem:[#allocation15 + $0x2c] sm:$0xf0]  ;;  %v5760_v45 = vor.u32 %v6661_v38, %v5757_v37  ;;  %v6525_v47 = vld [vmem:[#allocation15 + $0x314] sm:$0xf] }
 0x2d1   :  { %v5083_v36 = vld [vmem:[#allocation15 + $0x210] sm:$0xf]  ;;  %2977 = vmatpush.bf16.msrb.mxu1 %v5404_v42  ;;  %2952 = vmatpush.bf16.msra.mxu3 %v4860_v25  ;;  %v4828_v9 = vor.u32 %v6433_v53, %v4827_v51  ;;  %v4957_v42 = vld [vmem:[#allocation15 + $0x130] sm:$0xf0] }
 0x2d2   :  { %v6497_v54 = vld [vmem:[#allocation15 + $0x22c] sm:$0xf0]  ;;  %v5213_v41 = vld [vmem:[#allocation15 + $0x330] sm:$0xf0]  ;;  %v4960_v25 = vor.u32 %v6461_v40, %v4957_v42  ;;  %v6490_v40 = vld [vmem:[#allocation15 + $0x1f4] sm:$0xf0] }
 0x2d3   :  { %2990 = vmatpush.bf16.msrb.mxu2 %v5660_v44  ;;  %v5339_v62 = vld [vmem:[#allocation15 + $0x410] sm:$0xf]  ;;  %2965 = vmatpush.bf16.msrb.mxu0 %v5116_v52  ;;  %v5084_v46 = vor.u32 %v6497_v54, %v5083_v36  ;;  %v5504_v44 = vor.u32 %v6597_v35, %v5501_v29  ;;  %v6589_v48 = vld [vmem:[#allocation15 + $0x514] sm:$0xf]  ;;  %v5216_v52 = vor.u32 %v6525_v47, %v5213_v41  ;;  %v5315_v42 = vld [vmem:[#allocation15 + $0x3d8] sm:$0xf] }
 0x2d4   :  { %v6561_v63 = vld [vmem:[#allocation15 + $0x42c] sm:$0xf0]  ;;  %v5469_v49 = vld [vmem:[#allocation15 + $0x530] sm:$0xf0] }
 0x2d5   :  { %v5595_v3 = vld [vmem:[#allocation15 + $0x610] sm:$0xf]  ;;  %2978 = vmatpush.bf16.msrb.mxu1 %v5372_v55  ;;  %v5340_v57 = vor.u32 %v6561_v63, %v5339_v62  ;;  %2953 = vmatpush.bf16.msra.mxu3 %v4828_v9  ;;  %v6653_v50 = vld [vmem:[#allocation15 + $0x714] sm:$0xf]  ;;  %v5472_v54 = vor.u32 %v6589_v48, %v5469_v49  ;;  %v6618_v48 = vld [vmem:[#allocation15 + $0x5f4] sm:$0xf0] }
 0x2d6   :  { %v6625_v4 = vld [vmem:[#allocation15 + $0x62c] sm:$0xf0]  ;;  %v5725_v51 = vld [vmem:[#allocation15 + $0x730] sm:$0xf0]  ;;  %v5827_v49 = vld [vmem:[#allocation15 + $0x7d8] sm:$0xf] }
 0x2d7   :  { %2991 = vmatpush.bf16.msrb.mxu2 %v5628_v56  ;;  %v5596_v10 = vor.u32 %v6625_v4, %v5595_v3  ;;  %2966 = vmatpush.bf16.msrb.mxu0 %v5084_v46  ;;  %v6453_v53 = vld [vmem:[#allocation15 + $0xd4] sm:$0xf]  ;;  %v5728_v55 = vor.u32 %v6653_v50, %v5725_v51  ;;  %v6682_v50 = vld [vmem:[#allocation15 + $0x7f4] sm:$0xf0] }
 0x2d8   :  { %2954 = vmatmul.bf16.vlgmr.msra.gmra.mxu3 %v7542_v20  ;;  %v4925_v36 = vld [vmem:[#allocation15 + $0xf0] sm:$0xf0] }
 0x2d9   :  { %2979 = vmatpush.bf16.msrb.mxu1 %v5340_v57  ;;  %2998 = vmatpush.bf16.msrb.mxu3 %v5056_v24  ;;  %v6517_v56 = vld [vmem:[#allocation15 + $0x2d4] sm:$0xf]  ;;  %v4928_v5 = vor.u32 %v6453_v53, %v4925_v36  ;;  %v5027_v36 = vld [vmem:[#allocation15 + $0x198] sm:$0xf] }
 0x2da   :  { %2967 = vmatmul.bf16.vlgmr.msrb.gmra.mxu0 %v7544_v21  ;;  %v5181_v62 = vld [vmem:[#allocation15 + $0x2f0] sm:$0xf0] }
 0x2db   :  { %2992 = vmatpush.bf16.msrb.mxu2 %v5596_v10  ;;  %3011 = vmatpush.bf16.msra.mxu0 %v5312_v11  ;;  %v6581_v63 = vld [vmem:[#allocation15 + $0x4d4] sm:$0xf]  ;;  %v5184_v6 = vor.u32 %v6517_v56, %v5181_v62  ;;  %v5828_v56 = vor.u32 %v6682_v50, %v5827_v49  ;;  %v5283_v62 = vld [vmem:[#allocation15 + $0x398] sm:$0xf] }
 0x2dc   :  { %2980 = vmatmul.bf16.vlgmr.msrb.gmra.mxu1 %v7546_v22  ;;  %v5437_v3 = vld [vmem:[#allocation15 + $0x4f0] sm:$0xf0] }
 0x2dd   :  { %3024 = vmatpush.bf16.msra.mxu1 %v5568_v14  ;;  %2999 = vmatpush.bf16.msrb.mxu3 %v5024_v28  ;;  %v6645_v4 = vld [vmem:[#allocation15 + $0x6d4] sm:$0xf]  ;;  %v5440_v9 = vor.u32 %v6581_v63, %v5437_v3  ;;  %v6546_v63 = vld [vmem:[#allocation15 + $0x3b4] sm:$0xf0] }
 0x2de   :  { %2993 = vmatmul.bf16.vlgmr.msrb.gmra.mxu2 %v7548_v26  ;;  %v5693_v59 = vld [vmem:[#allocation15 + $0x6f0] sm:$0xf0]  ;;  %v5539_v3 = vld [vmem:[#allocation15 + $0x598] sm:$0xf] }
 0x2df   :  { %3037 = vmatpush.bf16.msra.mxu2 %v5824_v15  ;;  %3012 = vmatpush.bf16.msra.mxu0 %v5280_v61  ;;  %v6445_v7 = vld [vmem:[#allocation15 + $0x94] sm:$0xf]  ;;  %v5696_v46 = vor.u32 %v6645_v4, %v5693_v59  ;;  %v6610_v4 = vld [vmem:[#allocation15 + $0x5b4] sm:$0xf0] }
 0x2e0   :  { %v4893_v8 = vld [vmem:[#allocation15 + $0xb0] sm:$0xf0]  ;;  %v5795_v59 = vld [vmem:[#allocation15 + $0x798] sm:$0xf] }
 0x2e1   :  { %3025 = vmatpush.bf16.msra.mxu1 %v5536_v31  ;;  %3000 = vmatpush.bf16.msrb.mxu3 %v4992_v43  ;;  %v6509_v60 = vld [vmem:[#allocation15 + $0x294] sm:$0xf]  ;;  %v4896_v11 = vor.u32 %v6445_v7, %v4893_v8  ;;  %v5284_v7 = vor.u32 %v6546_v63, %v5283_v62  ;;  %v4995_v8 = vld [vmem:[#allocation15 + $0x158] sm:$0xf] }
 0x2e2   :  { %v6573_v32 = vld [vmem:[#allocation15 + $0x494] sm:$0xf]  ;;  %v5152_v1 = vor.u32 %v6509_v60, %v5149_v0  ;;  %v5251_v0 = vld [vmem:[#allocation15 + $0x358] sm:$0xf] }
 0x2e3   :  { %3038 = vmatpush.bf16.msra.mxu2 %v5792_v33  ;;  %3013 = vmatpush.bf16.msra.mxu0 %v5248_v39  ;;  %v5405_v57 = vld [vmem:[#allocation15 + $0x4b0] sm:$0xf0]  ;;  %v5059_v39 = vld [vmem:[#allocation15 + $0x1d8] sm:$0xf] }
 0x2e4   :  { %v6637_v10 = vld [vmem:[#allocation15 + $0x694] sm:$0xf]  ;;  %v5408_v15 = vor.u32 %v6573_v32, %v5405_v57  ;;  %v6538_v32 = vld [vmem:[#allocation15 + $0x374] sm:$0xf0] }
 0x2e5   :  { %3026 = vmatpush.bf16.msra.mxu1 %v5504_v44  ;;  %3001 = vmatpush.bf16.msrb.mxu3 %v4960_v25  ;;  %v5661_v24 = vld [vmem:[#allocation15 + $0x6b0] sm:$0xf0]  ;;  %v6554_v44 = vld [vmem:[#allocation15 + $0x3f4] sm:$0xf0] }
 0x2e6   :  { %v6437_v12 = vld [vmem:[#allocation15 + $0x54] sm:$0xf]  ;;  %v5664_v16 = vor.u32 %v6637_v10, %v5661_v24  ;;  %v5316_v53 = vor.u32 %v6554_v44, %v5315_v42  ;;  %v5507_v57 = vld [vmem:[#allocation15 + $0x558] sm:$0xf] }
 0x2e7   :  { %3039 = vmatpush.bf16.msra.mxu2 %v5760_v45  ;;  %3014 = vmatpush.bf16.msra.mxu0 %v5216_v52  ;;  %v4861_v14 = vld [vmem:[#allocation15 + $0x70] sm:$0xf0]  ;;  %v5571_v45 = vld [vmem:[#allocation15 + $0x5d8] sm:$0xf]  ;;  %v5060_v52 = vor.u32 %v6490_v40, %v5059_v39 }
 0x2e8   :  { %v6501_v17 = vld [vmem:[#allocation15 + $0x254] sm:$0xf]  ;;  %v4864_v30 = vor.u32 %v6437_v12, %v4861_v14  ;;  %v6602_v10 = vld [vmem:[#allocation15 + $0x574] sm:$0xf0]  ;;  %v7574_v12 = vld [vmem:[#allocation16] sm:$0xff] }
 0x2e9   :  { %3027 = vmatpush.bf16.msra.mxu1 %v5472_v54  ;;  %3002 = vmatpush.bf16.msrb.mxu3 %v4928_v5  ;;  %v5117_v19 = vld [vmem:[#allocation15 + $0x270] sm:$0xf0]  ;;  %v6482_v54 = vld [vmem:[#allocation15 + $0x1b4] sm:$0xf0] }
 0x2ea   :  { %v6565_v18 = vld [vmem:[#allocation15 + $0x454] sm:$0xf]  ;;  %v5120_v13 = vor.u32 %v6501_v17, %v5117_v19  ;;  %v6674_v5 = vld [vmem:[#allocation15 + $0x7b4] sm:$0xf0] }
 0x2eb   :  { %3040 = vmatpush.bf16.msra.mxu2 %v5728_v55  ;;  %3015 = vmatpush.bf16.msra.mxu0 %v5184_v6  ;;  %v5373_v23 = vld [vmem:[#allocation15 + $0x470] sm:$0xf0]  ;;  %v5572_v55 = vor.u32 %v6618_v48, %v5571_v45  ;;  %v5028_v6 = vor.u32 %v6482_v54, %v5027_v36  ;;  %v5796_v60 = vor.u32 %v6674_v5, %v5795_v59  ;;  %v5763_v24 = vld [vmem:[#allocation15 + $0x758] sm:$0xf] }
 0x2ec   :  { %v6629_v27 = vld [vmem:[#allocation15 + $0x654] sm:$0xf]  ;;  %v5376_v34 = vor.u32 %v6565_v18, %v5373_v23  ;;  %v4963_v17 = vld [vmem:[#allocation15 + $0x118] sm:$0xf]  ;;  %v5508_v23 = vor.u32 %v6602_v10, %v5507_v57 }
 0x2ed   :  { %3028 = vmatpush.bf16.msra.mxu1 %v5440_v9  ;;  %v5629_v28 = vld [vmem:[#allocation15 + $0x670] sm:$0xf0]  ;;  %3003 = vmatpush.bf16.msrb.mxu3 %v4896_v11  ;;  %v6474_v9 = vld [vmem:[#allocation15 + $0x174] sm:$0xf0] }
 0x2ee   :  { %v6429_v61 = vld [vmem:[#allocation15 + $0x14] sm:$0xf]  ;;  %v5632_v35 = vor.u32 %v6629_v27, %v5629_v28  ;;  %v6666_v11 = vld [vmem:[#allocation15 + $0x774] sm:$0xf0]  ;;  %v4996_v14 = vor.u32 %v6474_v9, %v4995_v8 }
 0x2ef   :  { %3041 = vmatpush.bf16.msra.mxu2 %v5696_v46  ;;  %3016 = vmatpush.bf16.msra.mxu0 %v5152_v1  ;;  %v4829_v31 = vld [vmem:[#allocation15 + $0x30] sm:$0xf0]  ;;  %v5540_v46 = vor.u32 %v6610_v4, %v5539_v3  ;;  %v6466_v19 = vld [vmem:[#allocation15 + $0x134] sm:$0xf0]  ;;  %v5764_v27 = vor.u32 %v6666_v11, %v5763_v24 }
 0x2f0   :  { %v6493_v33 = vld [vmem:[#allocation15 + $0x214] sm:$0xf]  ;;  %v4832_v47 = vor.u32 %v6429_v61, %v4829_v31  ;;  %v5219_v18 = vld [vmem:[#allocation15 + $0x318] sm:$0xf] }
 0x2f1   :  { %v5085_v2 = vld [vmem:[#allocation15 + $0x230] sm:$0xf0]  ;;  %3029 = vmatpush.bf16.msra.mxu1 %v5408_v15  ;;  %3004 = vmatpush.bf16.msrb.mxu3 %v4864_v30  ;;  %v5252_v15 = vor.u32 %v6538_v32, %v5251_v0  ;;  %v6530_v28 = vld [vmem:[#allocation15 + $0x334] sm:$0xf0] }
 0x2f2   :  { %v6557_v29 = vld [vmem:[#allocation15 + $0x414] sm:$0xf]  ;;  %v5088_v41 = vor.u32 %v6493_v33, %v5085_v2  ;;  %v5475_v61 = vld [vmem:[#allocation15 + $0x518] sm:$0xf]  ;;  %v1442_v33 = vperm.slane %v7574_v12, 0  ;;  %v4964_v2 = vor.u32 %v6466_v19, %v4963_v17 }
 0x2f3   :  { %3042 = vmatpush.bf16.msra.mxu2 %v5664_v16  ;;  %v5341_v38 = vld [vmem:[#allocation15 + $0x430] sm:$0xf0]  ;;  %3017 = vmatpush.bf16.msra.mxu0 %v5120_v13  ;;  %v2760_v1 = vpop.f32.mrf.mxu0  ;;  %v6594_v30 = vld [vmem:[#allocation15 + $0x534] sm:$0xf0] }
 0x2f4   :  { %v6621_v37 = vld [vmem:[#allocation15 + $0x614] sm:$0xf]  ;;  %v5344_v51 = vor.u32 %v6557_v29, %v5341_v38  ;;  %v2773_v16 = vpop.f32.mrf.mxu1  ;;  %v5731_v13 = vld [vmem:[#allocation15 + $0x718] sm:$0xf]  ;;  %v5476_v38 = vor.u32 %v6594_v30, %v5475_v61 }
 0x2f5   :  { %v5597_v43 = vld [vmem:[#allocation15 + $0x630] sm:$0xf0]  ;;  %3030 = vmatpush.bf16.msra.mxu1 %v5376_v34  ;;  %3005 = vmatpush.bf16.msrb.mxu3 %v4832_v47  ;;  %v6658_v31 = vld [vmem:[#allocation15 + $0x734] sm:$0xf0]  ;;  %v5220_v34 = vor.u32 %v6530_v28, %v5219_v18 }
 0x2f6   :  { %v5600_v25 = vor.u32 %v6621_v37, %v5597_v43  ;;  %v6458_v29 = vld [vmem:[#allocation15 + $0xf4] sm:$0xf0]  ;;  %v5732_v37 = vor.u32 %v6658_v31, %v5731_v13 }
 0x2f7   :  { %3043 = vmatpush.bf16.msra.mxu2 %v5632_v35  ;;  %3018 = vmatpush.bf16.msra.mxu0 %v5088_v41  ;;  %v4931_v35 = vld [vmem:[#allocation15 + $0xd8] sm:$0xf] }
 0x2f8   :  { %3006 = vmatmul.bf16.vlgmr.msrb.gmra.mxu3 %v7542_v20  ;;  %v5187_v39 = vld [vmem:[#allocation15 + $0x2d8] sm:$0xf] }
 0x2f9   :  { %3031 = vmatpush.bf16.msra.mxu1 %v5344_v51  ;;  %3050 = vmatpush.bf16.msra.mxu3 %v5060_v52  ;;  %v2747_v43 = vpop.f32.mrf.mxu3  ;;  %v6522_v40 = vld [vmem:[#allocation15 + $0x2f4] sm:$0xf0]  ;;  %v4932_v51 = vor.u32 %v6458_v29, %v4931_v35 }
 0x2fa   :  { %3019 = vmatmul.bf16.vlgmr.msra.gmra.mxu0 %v7544_v21  ;;  %v5443_v42 = vld [vmem:[#allocation15 + $0x4d8] sm:$0xf]  ;;  %v2748_v44 = vadd.f32 %v2747_v43, %v1442_v33  ;;  %v2786_v45 = vpop.f32.mrf.mxu2  ;;  %v5061_v43 = vld [vmem:[#allocation15 + $0x1f8] sm:$0xf0] }
 0x2fb   :  { %3044 = vmatpush.bf16.msra.mxu2 %v5600_v25  ;;  %3063 = vmatpush.bf16.msrb.mxu0 %v5316_v53  ;;  %v6586_v47 = vld [vmem:[#allocation15 + $0x4f4] sm:$0xf0]  ;;  %v2762_v49 = vpop.f32.mrf.mxu0  ;;  %v5188_v25 = vor.u32 %v6522_v40, %v5187_v39  ;;  %v1443_v39 = vperm.slane %v7574_v12, 1  ;;  %v6550_v40 = vld [vmem:[#allocation15 + $0x3dc] sm:$0xf] }
 0x2fc   :  { %3032 = vmatmul.bf16.vlgmr.msra.gmra.mxu1 %v7546_v22  ;;  %v5699_v41 = vld [vmem:[#allocation15 + $0x6d8] sm:$0xf]  ;;  %v2761_v50 = vadd.f32 %v2760_v1, %v2748_v44  ;;  %v2775_v52 = vpop.f32.mrf.mxu1  ;;  %v5444_v54 = vor.u32 %v6586_v47, %v5443_v42  ;;  %v5317_v42 = vld [vmem:[#allocation15 + $0x3f8] sm:$0xf0] }
 0x2fd   :  { %3076 = vmatpush.bf16.msrb.mxu1 %v5572_v55  ;;  %3051 = vmatpush.bf16.msra.mxu3 %v5028_v6  ;;  %v6650_v48 = vld [vmem:[#allocation15 + $0x6f4] sm:$0xf0]  ;;  %v6614_v44 = vld [vmem:[#allocation15 + $0x5dc] sm:$0xf] }
 0x2fe   :  { %3045 = vmatmul.bf16.vlgmr.msra.gmra.mxu2 %v7548_v26  ;;  %v4899_v53 = vld [vmem:[#allocation15 + $0x98] sm:$0xf]  ;;  %v5700_v55 = vor.u32 %v6650_v48, %v5699_v41  ;;  %v2774_v3 = vadd.f32 %v2773_v16, %v2761_v50  ;;  %v5573_v48 = vld [vmem:[#allocation15 + $0x5f8] sm:$0xf0] }
 0x2ff   :  { %3089 = vmatpush.bf16.msrb.mxu2 %v5828_v56  ;;  %3064 = vmatpush.bf16.msrb.mxu0 %v5284_v7  ;;  %v6450_v36 = vld [vmem:[#allocation15 + $0xb4] sm:$0xf0]  ;;  %v6678_v49 = vld [vmem:[#allocation15 + $0x7dc] sm:$0xf] }
 0x300   :  { %v5155_v56 = vld [vmem:[#allocation15 + $0x298] sm:$0xf]  ;;  %v7577_v6 = vadd.f32 %v2786_v45, %v2774_v3  ;;  %v4900_v7 = vor.u32 %v6450_v36, %v4899_v53  ;;  %v5829_v50 = vld [vmem:[#allocation15 + $0x7f8] sm:$0xf0]  ;;  %v5576_v3 = vor.u32 %v6614_v44, %v5573_v48 }
 0x301   :  { %3077 = vmatpush.bf16.msrb.mxu1 %v5540_v46  ;;  %3052 = vmatpush.bf16.msra.mxu3 %v4996_v14  ;;  %v6514_v62 = vld [vmem:[#allocation15 + $0x2b4] sm:$0xf0]  ;;  %v2749_v57 = vpop.f32.mrf.mxu3  ;;  %v5477_v44 = vld [vmem:[#allocation15 + $0x538] sm:$0xf0] }
 0x302   :  { %v5411_v63 = vld [vmem:[#allocation15 + $0x498] sm:$0xf]  ;;  %v5156_v8 = vor.u32 %v6514_v62, %v5155_v56  ;;  %v3154_v1 = vrot.slane %v7577_v6, 4  ;;  %v2788_v14 = vpop.f32.mrf.mxu2  ;;  %v6478_v62 = vld [vmem:[#allocation15 + $0x19c] sm:$0xf] }
 0x303   :  { %3090 = vmatpush.bf16.msrb.mxu2 %v5796_v60  ;;  %3065 = vmatpush.bf16.msrb.mxu0 %v5252_v15  ;;  %v6578_v4 = vld [vmem:[#allocation15 + $0x4b4] sm:$0xf0]  ;;  %v2812_v17 = vpop.f32.mrf.mxu0  ;;  %v5797_v57 = vld [vmem:[#allocation15 + $0x7b8] sm:$0xf0] }
 0x304   :  { %v5667_v59 = vld [vmem:[#allocation15 + $0x698] sm:$0xf]  ;;  %v5412_v0 = vor.u32 %v6578_v4, %v5411_v63  ;;  %v2825_v61 = vpop.f32.mrf.mxu1  ;;  %v5029_v63 = vld [vmem:[#allocation15 + $0x1b8] sm:$0xf0]  ;;  %v5832_v4 = vor.u32 %v6678_v49, %v5829_v50 }
 0x305   :  { %3078 = vmatpush.bf16.msrb.mxu1 %v5508_v23  ;;  %3053 = vmatpush.bf16.msra.mxu3 %v4964_v2  ;;  %v6642_v5 = vld [vmem:[#allocation15 + $0x6b4] sm:$0xf0]  ;;  %v3155_v23 = vadd.f32 %v3154_v1, %v7577_v6  ;;  %v6470_v14 = vld [vmem:[#allocation15 + $0x15c] sm:$0xf] }
 0x306   :  { %v4867_v9 = vld [vmem:[#allocation15 + $0x58] sm:$0xf]  ;;  %v5668_v32 = vor.u32 %v6642_v5, %v5667_v59  ;;  %v6542_v5 = vld [vmem:[#allocation15 + $0x39c] sm:$0xf] }
 0x307   :  { %3091 = vmatpush.bf16.msrb.mxu2 %v5764_v27  ;;  %3066 = vmatpush.bf16.msrb.mxu0 %v5220_v34  ;;  %v6442_v46 = vld [vmem:[#allocation15 + $0x74] sm:$0xf0]  ;;  %v5733_v48 = vld [vmem:[#allocation15 + $0x738] sm:$0xf0] }
 0x308   :  { %v5123_v60 = vld [vmem:[#allocation15 + $0x258] sm:$0xf]  ;;  %v4868_v27 = vor.u32 %v6442_v46, %v4867_v9  ;;  %v6454_v50 = vld [vmem:[#allocation15 + $0xdc] sm:$0xf] }
 0x309   :  { %3079 = vmatpush.bf16.msrb.mxu1 %v5476_v38  ;;  %3054 = vmatpush.bf16.msra.mxu3 %v4932_v51  ;;  %v6506_v10 = vld [vmem:[#allocation15 + $0x274] sm:$0xf0]  ;;  %v3156_v38 = vrot.slane %v3155_v23, 2  ;;  %v2799_v52 = vpop.f32.mrf.mxu3 }
 0x30a   :  { %v5379_v24 = vld [vmem:[#allocation15 + $0x458] sm:$0xf]  ;;  %v5124_v28 = vor.u32 %v6506_v10, %v5123_v60  ;;  %v2838_v56 = vpop.f32.mrf.mxu2  ;;  %v5032_v10 = vor.u32 %v6478_v62, %v5029_v63  ;;  %v5189_v63 = vld [vmem:[#allocation15 + $0x2f8] sm:$0xf0] }
 0x30b   :  { %3092 = vmatpush.bf16.msrb.mxu2 %v5732_v37  ;;  %3067 = vmatpush.bf16.msrb.mxu0 %v5188_v25  ;;  %v6570_v11 = vld [vmem:[#allocation15 + $0x474] sm:$0xf0]  ;;  %v6486_v37 = vld [vmem:[#allocation15 + $0x1dc] sm:$0xf]  ;;  %v3157_v45 = vadd.f32 %v3156_v38, %v3155_v23  ;;  %v2814_v59 = vpop.f32.mrf.mxu0 }
 0x30c   :  { %v5635_v15 = vld [vmem:[#allocation15 + $0x658] sm:$0xf]  ;;  %v5380_v33 = vor.u32 %v6570_v11, %v5379_v24  ;;  %v5064_v36 = vor.u32 %v6486_v37, %v5061_v43  ;;  %v2827_v60 = vpop.f32.mrf.mxu1  ;;  %v6598_v23 = vld [vmem:[#allocation15 + $0x55c] sm:$0xf] }
 0x30d   :  { %3080 = vmatpush.bf16.msrb.mxu1 %v5444_v54  ;;  %v6634_v16 = vld [vmem:[#allocation15 + $0x674] sm:$0xf0]  ;;  %3055 = vmatpush.bf16.msra.mxu3 %v4900_v7  ;;  %v3158_v53 = vrot.slane %v3157_v45, 1  ;;  %v5320_v54 = vor.u32 %v6550_v40, %v5317_v42  ;;  %v5285_v7 = vld [vmem:[#allocation15 + $0x3b8] sm:$0xf0] }
 0x30e   :  { %v4835_v19 = vld [vmem:[#allocation15 + $0x18] sm:$0xf]  ;;  %v5636_v2 = vor.u32 %v6634_v16, %v5635_v15  ;;  %v5288_v1 = vor.u32 %v6542_v5, %v5285_v7  ;;  %v4997_v15 = vld [vmem:[#allocation15 + $0x178] sm:$0xf0] }
 0x30f   :  { %3093 = vmatpush.bf16.msrb.mxu2 %v5700_v55  ;;  %v6434_v18 = vld [vmem:[#allocation15 + $0x34] sm:$0xf0]  ;;  %3068 = vmatpush.bf16.msrb.mxu0 %v5156_v8  ;;  %v2800_v55 = vadd.f32 %v2799_v52, %v1443_v39  ;;  %v6606_v8 = vld [vmem:[#allocation15 + $0x59c] sm:$0xf]  ;;  %v3159_v9 = vadd.f32 %v3158_v53, %v3157_v45 }
 0x310   :  { %v5091_v30 = vld [vmem:[#allocation15 + $0x218] sm:$0xf]  ;;  %v4836_v47 = vor.u32 %v6434_v18, %v4835_v19  ;;  %v5253_v18 = vld [vmem:[#allocation15 + $0x378] sm:$0xf0] }
 0x311   :  { %v6498_v13 = vld [vmem:[#allocation15 + $0x234] sm:$0xf0]  ;;  %3081 = vmatpush.bf16.msrb.mxu1 %v5412_v0  ;;  %3056 = vmatpush.bf16.msra.mxu3 %v4868_v27  ;;  %v2813_v46 = vadd.f32 %v2812_v17, %v2800_v55  ;;  %v5541_v0 = vld [vmem:[#allocation15 + $0x5b8] sm:$0xf0]  ;;  %v3202_v24 = vmul.f32 %v3159_v9, %v7403_v58  ;;  %v1444_v9 = vperm.slane %v7574_v12, 2 }
 0x312   :  { %v5347_v31 = vld [vmem:[#allocation15 + $0x418] sm:$0xf]  ;;  %v5092_v41 = vor.u32 %v6498_v13, %v5091_v30  ;;  %v5544_v16 = vor.u32 %v6606_v8, %v5541_v0  ;;  %v6534_v17 = vld [vmem:[#allocation15 + $0x35c] sm:$0xf] }
 0x313   :  { %3094 = vmatpush.bf16.msrb.mxu2 %v5668_v32  ;;  %v6562_v34 = vld [vmem:[#allocation15 + $0x434] sm:$0xf0]  ;;  %3069 = vmatpush.bf16.msrb.mxu0 %v5124_v28  ;;  %v6670_v32 = vld [vmem:[#allocation15 + $0x79c] sm:$0xf]  ;;  %v2826_v11 = vadd.f32 %v2825_v61, %v2813_v46  ;;  %v7584_v27 = vsub.f32 %v7577_v6, %v3202_v24 }
 0x314   :  { %v5603_v35 = vld [vmem:[#allocation15 + $0x618] sm:$0xf]  ;;  %v5348_v51 = vor.u32 %v6562_v34, %v5347_v31  ;;  %v5800_v19 = vor.u32 %v6670_v32, %v5797_v57  ;;  %v5509_v61 = vld [vmem:[#allocation15 + $0x578] sm:$0xf0]  ;;  %v2801_v31 = vpop.f32.mrf.mxu3  ;;  %v5000_v34 = vor.u32 %v6470_v14, %v4997_v15 }
 0x315   :  { %v6626_v29 = vld [vmem:[#allocation15 + $0x634] sm:$0xf0]  ;;  %3082 = vmatpush.bf16.msrb.mxu1 %v5380_v33  ;;  %3057 = vmatpush.bf16.msra.mxu3 %v4836_v47  ;;  %v7586_v28 = vadd.f32 %v2838_v56, %v2826_v11  ;;  %v6662_v30 = vld [vmem:[#allocation15 + $0x75c] sm:$0xf]  ;;  %v5512_v43 = vor.u32 %v6598_v23, %v5509_v61 }
 0x316   :  { %v5604_v25 = vor.u32 %v6626_v29, %v5603_v35  ;;  %v5765_v13 = vld [vmem:[#allocation15 + $0x778] sm:$0xf0]  ;;  %v5256_v35 = vor.u32 %v6534_v17, %v5253_v18  ;;  %v2840_v29 = vpop.f32.mrf.mxu2 }
 0x317   :  { %3095 = vmatpush.bf16.msrb.mxu2 %v5636_v2  ;;  %3070 = vmatpush.bf16.msrb.mxu0 %v5092_v41  ;;  %v6462_v33 = vld [vmem:[#allocation15 + $0x11c] sm:$0xf]  ;;  %v3218_v2 = vmul.f32 %v7584_v27, %v7584_v27  ;;  %v3160_v6 = vrot.slane %v7586_v28, 4  ;;  %v5768_v39 = vor.u32 %v6662_v30, %v5765_v13  ;;  %v2864_v49 = vpop.f32.mrf.mxu0 }
 0x318   :  { %3058 = vmatmul.bf16.vlgmr.msra.gmra.mxu3 %v7542_v20  ;;  %v4965_v38 = vld [vmem:[#allocation15 + $0x138] sm:$0xf0] }
 0x319   :  { %3083 = vmatpush.bf16.msrb.mxu1 %v5348_v51  ;;  %3102 = vmatpush.bf16.msrb.mxu3 %v5064_v36  ;;  %v6526_v37 = vld [vmem:[#allocation15 + $0x31c] sm:$0xf]  ;;  %v3226_v45 = vrot.slane %v3218_v2, 4  ;;  %v3161_v47 = vadd.f32 %v3160_v6, %v7586_v28  ;;  %v2877_v52 = vpop.f32.mrf.mxu1  ;;  %v4968_v53 = vor.u32 %v6462_v33, %v4965_v38 }
 0x31a   :  { %3071 = vmatmul.bf16.vlgmr.msrb.gmra.mxu0 %v7544_v21  ;;  %v5221_v40 = vld [vmem:[#allocation15 + $0x338] sm:$0xf0] }
 0x31b   :  { %3096 = vmatpush.bf16.msrb.mxu2 %v5604_v25  ;;  %3115 = vmatpush.bf16.msra.mxu0 %v5320_v54  ;;  %v6590_v42 = vld [vmem:[#allocation15 + $0x51c] sm:$0xf]  ;;  %v3227_v51 = vadd.f32 %v3226_v45, %v3218_v2  ;;  %v3162_v25 = vrot.slane %v3161_v47, 2  ;;  %v5224_v36 = vor.u32 %v6526_v37, %v5221_v40 }
 0x31c   :  { %3084 = vmatmul.bf16.vlgmr.msrb.gmra.mxu1 %v7546_v22  ;;  %v6654_v41 = vld [vmem:[#allocation15 + $0x71c] sm:$0xf]  ;;  %v5480_v56 = vor.u32 %v6590_v42, %v5477_v44  ;;  %v2851_v15 = vpop.f32.mrf.mxu3 }
 0x31d   :  { %3128 = vmatpush.bf16.msra.mxu1 %v5576_v3  ;;  %3103 = vmatpush.bf16.msrb.mxu3 %v5032_v10  ;;  %v4933_v54 = vld [vmem:[#allocation15 + $0xf8] sm:$0xf0]  ;;  %v5736_v62 = vor.u32 %v6654_v41, %v5733_v48  ;;  %v3228_v59 = vrot.slane %v3227_v51, 2  ;;  %v3163_v5 = vadd.f32 %v3162_v25, %v3161_v47  ;;  %v2852_v23 = vadd.f32 %v2851_v15, %v1444_v9 }
 0x31e   :  { %3097 = vmatmul.bf16.vlgmr.msrb.gmra.mxu2 %v7548_v26  ;;  %v6518_v55 = vld [vmem:[#allocation15 + $0x2dc] sm:$0xf]  ;;  %v4936_v57 = vor.u32 %v6454_v50, %v4933_v54 }
 0x31f   :  { %3141 = vmatpush.bf16.msra.mxu2 %v5832_v4  ;;  %3116 = vmatpush.bf16.msra.mxu0 %v5288_v1  ;;  %v6582_v3 = vld [vmem:[#allocation15 + $0x4dc] sm:$0xf]  ;;  %v3229_v0 = vadd.f32 %v3228_v59, %v3227_v51  ;;  %v3164_v32 = vrot.slane %v3163_v5, 1  ;;  %v5192_v10 = vor.u32 %v6518_v55, %v5189_v63  ;;  %v2866_v31 = vpop.f32.mrf.mxu0  ;;  %v2865_v29 = vadd.f32 %v2864_v49, %v2852_v23 }
 0x320   :  { %v5445_v4 = vld [vmem:[#allocation15 + $0x4f8] sm:$0xf0] }
 0x321   :  { %3129 = vmatpush.bf16.msra.mxu1 %v5544_v16  ;;  %3104 = vmatpush.bf16.msrb.mxu3 %v5000_v34  ;;  %v6646_v7 = vld [vmem:[#allocation15 + $0x6dc] sm:$0xf]  ;;  %v5448_v1 = vor.u32 %v6582_v3, %v5445_v4  ;;  %v3230_v17 = vrot.slane %v3229_v0, 1  ;;  %v3165_v18 = vadd.f32 %v3164_v32, %v3163_v5  ;;  %v2890_v61 = vpop.f32.mrf.mxu2  ;;  %v2879_v38 = vpop.f32.mrf.mxu1  ;;  %v2878_v47 = vadd.f32 %v2877_v52, %v2865_v29 }
 0x322   :  { %v5701_v8 = vld [vmem:[#allocation15 + $0x6f8] sm:$0xf0] }
 0x323   :  { %3142 = vmatpush.bf16.msra.mxu2 %v5800_v19  ;;  %3117 = vmatpush.bf16.msra.mxu0 %v5256_v35  ;;  %v6446_v46 = vld [vmem:[#allocation15 + $0x9c] sm:$0xf]  ;;  %v5704_v14 = vor.u32 %v6646_v7, %v5701_v8  ;;  %v3231_v34 = vadd.f32 %v3230_v17, %v3229_v0  ;;  %v3203_v35 = vmul.f32 %v3165_v18, %v7403_v58 }
 0x324   :  { %v4901_v60 = vld [vmem:[#allocation15 + $0xb8] sm:$0xf0] }
 0x325   :  { %3130 = vmatpush.bf16.msra.mxu1 %v5512_v43  ;;  %3105 = vmatpush.bf16.msrb.mxu3 %v4968_v53  ;;  %v6510_v24 = vld [vmem:[#allocation15 + $0x29c] sm:$0xf]  ;;  %v4904_v33 = vor.u32 %v6446_v46, %v4901_v60  ;;  %v7599_v45 = vsub.f32 %v7586_v28, %v3203_v35  ;;  %v3274_v49 = vmul.f32 %v3231_v34, %v7403_v58 }
 0x326   :  { %v5157_v11 = vld [vmem:[#allocation15 + $0x2b8] sm:$0xf0] }
 0x327   :  { %3143 = vmatpush.bf16.msra.mxu2 %v5768_v39  ;;  %3118 = vmatpush.bf16.msra.mxu0 %v5224_v36  ;;  %v6574_v16 = vld [vmem:[#allocation15 + $0x49c] sm:$0xf]  ;;  %v5160_v2 = vor.u32 %v6510_v24, %v5157_v11  ;;  %v3219_v53 = vmul.f32 %v7599_v45, %v7599_v45  ;;  %v2891_v36 = vadd.f32 %v2890_v61, %v2878_v47  ;;  %v7604_v60 = vadd.f32 0.8, %v3274_v49 }
 0x328   :  { %v5413_v19 = vld [vmem:[#allocation15 + $0x4b8] sm:$0xf0] }
 0x329   :  { %3131 = vmatpush.bf16.msra.mxu1 %v5480_v56  ;;  %v6638_v30 = vld [vmem:[#allocation15 + $0x69c] sm:$0xf]  ;;  %3106 = vmatpush.bf16.msrb.mxu3 %v4936_v57  ;;  %v5416_v40 = vor.u32 %v6574_v16, %v5413_v19  ;;  %v3232_v59 = vrot.slane %v3219_v53, 4  ;;  %v3166_v5 = vrot.slane %v2891_v36, 4  ;;  %v2892_v7 = vpop.f32.mrf.mxu2  ;;  %6849 = vrsqrt.f32 %v7604_v60 }
 0x32a   :  { %v5669_v13 = vld [vmem:[#allocation15 + $0x6b8] sm:$0xf0]  ;;  %vm3297_vm3 = vweird.f32 %v7604_v60 }
 0x32b   :  { %3144 = vmatpush.bf16.msra.mxu2 %v5736_v62  ;;  %v6438_v6 = vld [vmem:[#allocation15 + $0x5c] sm:$0xf]  ;;  %3119 = vmatpush.bf16.msra.mxu0 %v5192_v10  ;;  %v5672_v42 = vor.u32 %v6638_v30, %v5669_v13  ;;  %v2853_v62 = vpop.f32.mrf.mxu3  ;;  %v3233_v0 = vadd.f32 %v3232_v59, %v3219_v53  ;;  %v3167_v32 = vadd.f32 %v3166_v5, %v2891_v36 }
 0x32c   :  { %v4869_v37 = vld [vmem:[#allocation15 + $0x78] sm:$0xf0] }
 0x32d   :  { %v6502_v43 = vld [vmem:[#allocation15 + $0x25c] sm:$0xf]  ;;  %3132 = vmatpush.bf16.msra.mxu1 %v5448_v1  ;;  %v4872_v51 = vor.u32 %v6438_v6, %v4869_v37  ;;  %3107 = vmatpush.bf16.msrb.mxu3 %v4904_v33  ;;  %v3234_v11 = vrot.slane %v3233_v0, 2  ;;  %v3168_v1 = vrot.slane %v3167_v32, 2 }
 0x32e   :  { %v5125_v39 = vld [vmem:[#allocation15 + $0x278] sm:$0xf0] }
 0x32f   :  { %3145 = vmatpush.bf16.msra.mxu2 %v5704_v14  ;;  %v6566_v44 = vld [vmem:[#allocation15 + $0x45c] sm:$0xf]  ;;  %v5128_v25 = vor.u32 %v6502_v43, %v5125_v39  ;;  %3120 = vmatpush.bf16.msra.mxu0 %v5160_v2  ;;  %v3235_v14 = vadd.f32 %v3234_v11, %v3233_v0  ;;  %v3169_v15 = vadd.f32 %v3168_v1, %v3167_v32  ;;  %v6850_v23 = vpop.eup %6849 }
 0x330   :  { %v5381_v41 = vld [vmem:[#allocation15 + $0x478] sm:$0xf0]  ;;  %v3292_v33 = vmul.f32 %v6850_v23, %v7604_v60  ;;  %vm3298_vm0 = vweird.f32 %v6850_v23 }
 0x331   :  { %v6630_v48 = vld [vmem:[#allocation15 + $0x65c] sm:$0xf]  ;;  %3133 = vmatpush.bf16.msra.mxu1 %v5416_v40  ;;  %v5384_v28 = vor.u32 %v6566_v44, %v5381_v41  ;;  %3108 = vmatpush.bf16.msrb.mxu3 %v4872_v51  ;;  %v3236_v16 = vrot.slane %v3235_v14, 1  ;;  %v3170_v19 = vrot.slane %v3169_v15, 1  ;;  %vm3299_vm4 = vmor %vm3297_vm3, %vm3298_vm0 }
 0x332   :  { %v5637_v50 = vld [vmem:[#allocation15 + $0x678] sm:$0xf0] }
 0x333   :  { %v6430_v54 = vld [vmem:[#allocation15 + $0x1c] sm:$0xf]  ;;  %3146 = vmatpush.bf16.msra.mxu2 %v5672_v42  ;;  %v5640_v52 = vor.u32 %v6630_v48, %v5637_v50  ;;  %3121 = vmatpush.bf16.msra.mxu0 %v5128_v25  ;;  %v3237_v17 = vadd.f32 %v3236_v16, %v3235_v14  ;;  %v3171_v18 = vadd.f32 %v3170_v19, %v3169_v15  ;;  %v1446_v14 = vperm.slane %v7574_v12, 4 }
 0x334   :  { %v4837_v55 = vld [vmem:[#allocation15 + $0x38] sm:$0xf0] }
 0x335   :  { %v6494_v56 = vld [vmem:[#allocation15 + $0x21c] sm:$0xf]  ;;  %v4840_v46 = vor.u32 %v6430_v54, %v4837_v55  ;;  %3134 = vmatpush.bf16.msra.mxu1 %v5384_v28  ;;  %v3275_v61 = vmul.f32 %v3237_v17, %v7403_v58  ;;  %v3204_v30 = vmul.f32 %v3171_v18, %v7403_v58 }
 0x336   :  { %v5093_v63 = vld [vmem:[#allocation15 + $0x238] sm:$0xf0] }
 0x337   :  { %v6558_v3 = vld [vmem:[#allocation15 + $0x41c] sm:$0xf]  ;;  %v5096_v57 = vor.u32 %v6494_v56, %v5093_v63  ;;  %3147 = vmatpush.bf16.msra.mxu2 %v5640_v52  ;;  %3109 = vmatpush.bf16.msrb.mxu3 %v4840_v46  ;;  %v3284_v13 = vadd.f32 0.8, %v3275_v61  ;;  %v7613_v31 = vsub.f32 %v2891_v36, %v3204_v30  ;;  %v2916_v2 = vpop.f32.mrf.mxu0 }
 0x338   :  { %v5349_v4 = vld [vmem:[#allocation15 + $0x438] sm:$0xf0] }
 0x339   :  { %v6622_v8 = vld [vmem:[#allocation15 + $0x61c] sm:$0xf]  ;;  %v5352_v10 = vor.u32 %v6558_v3, %v5349_v4  ;;  %3122 = vmatpush.bf16.msra.mxu0 %v5096_v57  ;;  %6851 = vrsqrt.f32 %v3284_v13  ;;  %vm3307_vm1 = vweird.f32 %v3284_v13 }
 0x33a   :  { %v5605_v9 = vld [vmem:[#allocation15 + $0x638] sm:$0xf0]  ;;  %3110 = vmatmul.bf16.vlgmr.msrb.gmra.mxu3 %v7542_v20  ;;  %v3220_v20 = vmul.f32 %v7613_v31, %v7613_v31 }
 0x33b   :  { %v5608_v24 = vor.u32 %v6622_v8, %v5605_v9  ;;  %3135 = vmatpush.bf16.msra.mxu1 %v5352_v10  ;;  %v2903_v34 = vpop.f32.mrf.mxu3 }
 0x33c   :  { %3123 = vmatmul.bf16.vlgmr.msra.gmra.mxu0 %v7544_v21  ;;  %v2929_v21 = vpop.f32.mrf.mxu1  ;;  %v3238_v6 = vrot.slane %v3220_v20, 4 }
 0x33d   :  { %3148 = vmatpush.bf16.msra.mxu2 %v5608_v24 }
 0x33e   :  { %3136 = vmatmul.bf16.vlgmr.msra.gmra.mxu1 %v7546_v22  ;;  %v1445_v22 = vperm.slane %v7574_v12, 3  ;;  %v3239_v29 = vadd.f32 %v3238_v6, %v3220_v20 }
 0x33f   :  { %v6852_v35 = vpop.eup %6851  ;;  %v2918_v40 = vpop.f32.mrf.mxu0 }
 0x340   :  { %3149 = vmatmul.bf16.vlgmr.msra.gmra.mxu2 %v7548_v26  ;;  %v3293_v26 = vmul.f32 %v6850_v23, %v3292_v33  ;;  %v2904_v38 = vadd.f32 %v2903_v34, %v1445_v22  ;;  %v3302_v39 = vmul.f32 %v6852_v35, %v3284_v13  ;;  %v3240_v41 = vrot.slane %v3239_v29, 2 }
 0x341   :  { %v2942_v37 = vpop.f32.mrf.mxu2  ;;  %vm3308_vm15 = vweird.f32 %v6852_v35 }
 0x342   :  { %v3294_v43 = vmul.f32 0.5, %v3293_v26  ;;  %v2917_v42 = vadd.f32 %v2916_v2, %v2904_v38  ;;  %v3303_v47 = vmul.f32 %v6852_v35, %v3302_v39  ;;  %v3241_v36 = vadd.f32 %v3240_v41, %v3239_v29  ;;  %vm3309_vm2 = vmor %vm3307_vm1, %vm3308_vm15 }
 0x343   :  { %v2905_v53 = vpop.f32.mrf.mxu3  ;;  %vm3389_vm1 = vcmask 1044484  }
 0x344   :  { %v2931_v44 = vpop.f32.mrf.mxu1  ;;  %v2930_v48 = vadd.f32 %v2929_v21, %v2917_v42  ;;  %v3295_v50 = vsub.f32 1.5, %v3294_v43  ;;  %v3304_v51 = vmul.f32 0.5, %v3303_v47  ;;  %v3242_v3 = vrot.slane %v3241_v36, 1 }
 0x346   :  { %v2943_v25 = vadd.f32 %v2942_v37, %v2930_v48  ;;  %v3305_v49 = vsub.f32 1.5, %v3304_v51  ;;  %v3296_v56 = vmul.f32 %v6850_v23, %v3295_v50  ;;  %v3243_v8 = vadd.f32 %v3242_v3, %v3241_v36 }
 0x348   :  { %v3172_v54 = vrot.slane %v2943_v25, 4  ;;  %v3306_v28 = vmul.f32 %v6852_v35, %v3305_v49  ;;  %v3300_v59 = vsel %vm3299_vm4, %v6850_v23, %v3296_v56  ;;  %v3276_v0 = vmul.f32 %v3243_v8, %v7403_v58 }
 0x349   :  { %v2944_v55 = vpop.f32.mrf.mxu2 }
 0x34a   :  { %v3173_v52 = vadd.f32 %v3172_v54, %v2943_v25  ;;  %v3310_v62 = vsel %vm3309_vm2, %v6852_v35, %v3306_v28  ;;  %v3285_v10 = vadd.f32 0.8, %v3276_v0 }
 0x34b   :  { %v3379_v63 = vrot.slane %v3310_v62, 7  ;;  %v1447_v62 = vperm.slane %v7574_v12, 5 }
 0x34c   :  { %v3174_v4 = vrot.slane %v3173_v52, 2  ;;  %6853 = vrsqrt.f32 %v3285_v10  ;;  %vm3317_vm5 = vweird.f32 %v3285_v10 }
 0x34d   :  { %v7621_v5 = vsel %vm493_vm8, %v3300_v59, %v3379_v63 }
 0x34e   :  { %v3175_v7 = vadd.f32 %v3174_v4, %v3173_v52 }
 0x350   :  { %v3176_v9 = vrot.slane %v3175_v7, 1 }
 0x352   :  { %v3177_v46 = vadd.f32 %v3176_v9, %v3175_v7  ;;  %v6854_v33 = vpop.eup %6853 }
 0x353   :  { %v3312_v22 = vmul.f32 %v6854_v33, %v3285_v10  ;;  %vm3318_vm8 = vweird.f32 %v6854_v33 }
 0x354   :  { %v3205_v32 = vmul.f32 %v3177_v46, %v7403_v58  ;;  %vm3319_vm7 = vmor %vm3317_vm5, %vm3318_vm8 }
 0x355   :  { %v3313_v43 = vmul.f32 %v6854_v33, %v3312_v22 }
 0x356   :  { %v7625_v57 = vsub.f32 %v2943_v25, %v3205_v32 }
 0x357   :  { %v2968_v60 = vpop.f32.mrf.mxu0  ;;  %v3314_v42 = vmul.f32 0.5, %v3313_v43 }
 0x358   :  { %v3221_v24 = vmul.f32 %v7625_v57, %v7625_v57 }
 0x359   :  { %v2981_v11 = vpop.f32.mrf.mxu1  ;;  %v3315_v48 = vsub.f32 1.5, %v3314_v42 }
 0x35a   :  { %v3244_v1 = vrot.slane %v3221_v24, 4 }
 0x35b   :  { %v2955_v16 = vpop.f32.mrf.mxu3  ;;  %v3316_v53 = vmul.f32 %v6854_v33, %v3315_v48 }
 0x35c   :  { %v3245_v15 = vadd.f32 %v3244_v1, %v3221_v24  ;;  %v2956_v17 = vadd.f32 %v2955_v16, %v1446_v14 }
 0x35d   :  { %v3320_v63 = vsel %vm3319_vm7, %v6854_v33, %v3316_v53  ;;  %vm3391_vm7 = vcmask 1046534  }
 0x35e   :  { %v3246_v19 = vrot.slane %v3245_v15, 2  ;;  %v2969_v30 = vadd.f32 %v2968_v60, %v2956_v17  ;;  %v3380_v8 = vrot.slane %v3320_v63, 6 }
 0x35f   :  { %v2970_v23 = vpop.f32.mrf.mxu0 }
 0x360   :  { %v3247_v61 = vadd.f32 %v3246_v19, %v3245_v15  ;;  %v2982_v20 = vadd.f32 %v2981_v11, %v2969_v30 }
 0x361   :  { %v2994_v18 = vpop.f32.mrf.mxu2  ;;  %v2983_v13 = vpop.f32.mrf.mxu1 }
 0x362   :  { %v3248_v2 = vrot.slane %v3247_v61, 1  ;;  %v2995_v6 = vadd.f32 %v2994_v18, %v2982_v20 }
 0x363   :  { %v2957_v26 = vpop.f32.mrf.mxu3 }
 0x364   :  { %v3249_v21 = vadd.f32 %v3248_v2, %v3247_v61  ;;  %v3178_v35 = vrot.slane %v2995_v6, 4 }
 0x366   :  { %v3277_v34 = vmul.f32 %v3249_v21, %v7403_v58  ;;  %v3179_v37 = vadd.f32 %v3178_v35, %v2995_v6 }
 0x368   :  { %v3286_v38 = vadd.f32 0.8, %v3277_v34  ;;  %v3180_v39 = vrot.slane %v3179_v37, 2 }
 0x369   :  { %v2996_v29 = vpop.f32.mrf.mxu2 }
 0x36a   :  { %6855 = vrsqrt.f32 %v3286_v38  ;;  %v3181_v40 = vadd.f32 %v3180_v39, %v3179_v37  ;;  %vm3327_vm11 = vweird.f32 %v3286_v38 }
 0x36c   :  { %v3182_v44 = vrot.slane %v3181_v40, 1 }
 0x36e   :  { %v3183_v41 = vadd.f32 %v3182_v44, %v3181_v40 }
 0x370   :  { %v6856_v47 = vpop.eup %6855  ;;  %v3206_v51 = vmul.f32 %v3183_v41, %v7403_v58 }
 0x371   :  { %v3322_v50 = vmul.f32 %v6856_v47, %v3286_v38  ;;  %vm3328_vm6 = vweird.f32 %v6856_v47  ;;  %v1448_v38 = vperm.slane %v7574_v12, 6 }
 0x372   :  { %v7632_v49 = vsub.f32 %v2995_v6, %v3206_v51  ;;  %vm3329_vm12 = vmor %vm3327_vm11, %vm3328_vm6  ;;  %vm3393_vm11 = vcmask 1045508  }
 0x373   :  { %v3323_v25 = vmul.f32 %v6856_v47, %v3322_v50 }
 0x374   :  { %v3222_v55 = vmul.f32 %v7632_v49, %v7632_v49 }
 0x375   :  { %v3324_v36 = vmul.f32 0.5, %v3323_v25 }
 0x376   :  { %v3250_v52 = vrot.slane %v3222_v55, 4 }
 0x377   :  { %v3020_v54 = vpop.f32.mrf.mxu0  ;;  %v3325_v28 = vsub.f32 1.5, %v3324_v36 }
 0x378   :  { %v3251_v59 = vadd.f32 %v3250_v52, %v3222_v55 }
 0x379   :  { %v3033_v56 = vpop.f32.mrf.mxu1  ;;  %v3326_v3 = vmul.f32 %v6856_v47, %v3325_v28 }
 0x37a   :  { %v3252_v1 = vrot.slane %v3251_v59, 2 }
 0x37b   :  { %v3330_v4 = vsel %vm3329_vm12, %v6856_v47, %v3326_v3  ;;  %v3007_v7 = vpop.f32.mrf.mxu3  ;;  %vm3395_vm12 = vcmask 1043456  }
 0x37c   :  { %v3381_v9 = vrot.slane %v3330_v4, 5  ;;  %v3008_v46 = vadd.f32 %v3007_v7, %v1447_v62  ;;  %v3253_v16 = vadd.f32 %v3252_v1, %v3251_v59  ;;  %v5891_v7 = vld [vmem:[#allocation21 + $0x70] sm:$0xf] }
 0x37d   :  { %v6083_v1 = vld [vmem:[#allocation21 + $0x1f0] sm:$0xf] }
 0x37e   :  { %v3387_v60 = vsel %vm1135_vm9, %v3380_v8, %v3381_v9  ;;  %v3021_v10 = vadd.f32 %v3020_v54, %v3008_v46  ;;  %v3254_v61 = vrot.slane %v3253_v16, 1  ;;  %v6698_v8 = vld [vmem:[#allocation21 + $0x74] sm:$0xf0]  ;;  %v5955_v9 = vld [vmem:[#allocation21 + $0xf0] sm:$0xf] }
 0x37f   :  { %v3022_v32 = vpop.f32.mrf.mxu0  ;;  %v7640_v11 = vsel %vm1137_vm10, %v7621_v5, %v3387_v60  ;;  %v6019_v60 = vld [vmem:[#allocation21 + $0x170] sm:$0xf] }
 0x380   :  { %v3034_v14 = vadd.f32 %v3033_v56, %v3021_v10  ;;  %v3255_v33 = vadd.f32 %v3254_v61, %v3253_v16  ;;  %v6714_v32 = vld [vmem:[#allocation21 + $0xf4] sm:$0xf0]  ;;  %v5883_v61 = vld [vmem:[#allocation21 + $0x60] sm:$0xf] }
 0x381   :  { %v3046_v0 = vpop.f32.mrf.mxu2  ;;  %v3035_v24 = vpop.f32.mrf.mxu1  ;;  %v5956_v10 = vor.u32 %v6714_v32, %v5955_v9  ;;  %v5867_v9 = vld [vmem:[#allocation21 + $0x40] sm:$0xf] }
 0x382   :  { %v3047_v15 = vadd.f32 %v3046_v0, %v3034_v14  ;;  %v3278_v21 = vmul.f32 %v3255_v33, %v7403_v58  ;;  %v5892_v0 = vor.u32 %v6698_v8, %v5891_v7  ;;  %v6730_v24 = vld [vmem:[#allocation21 + $0x174] sm:$0xf0] }
 0x383   :  { %v3009_v19 = vpop.f32.mrf.mxu3  ;;  %v6746_v14 = vld [vmem:[#allocation21 + $0x1f4] sm:$0xf0]  ;;  %4269 = vmatpush.bf16.msrb.mxu0 %v5956_v10 }
 0x384   :  { %v3184_v17 = vrot.slane %v3047_v15, 4  ;;  %v7646_v22 = vadd.f32 0.8, %v3278_v21  ;;  %4256 = vmatpush.bf16.msra.mxu3 %v5892_v0  ;;  %v6011_v21 = vld [vmem:[#allocation21 + $0x160] sm:$0xf] }
 0x385   :  { %v5931_v0 = vld [vmem:[#allocation21 + $0xc0] sm:$0xf] }
 0x386   :  { %v3185_v23 = vadd.f32 %v3184_v17, %v3047_v15  ;;  %6857 = vrsqrt.f32 %v7646_v22  ;;  %v6020_v17 = vor.u32 %v6730_v24, %v6019_v60  ;;  %vm3337_vm13 = vweird.f32 %v7646_v22  ;;  %v6708_v24 = vld [vmem:[#allocation21 + $0xc4] sm:$0xf0] }
 0x388   :  { %v3186_v30 = vrot.slane %v3185_v23, 2  ;;  %4282 = vmatpush.bf16.msrb.mxu1 %v6020_v17  ;;  %v5932_v17 = vor.u32 %v6708_v24, %v5931_v0  ;;  %v5907_v0 = vld [vmem:[#allocation21 + $0x90] sm:$0xf] }
 0x389   :  { %v3048_v18 = vpop.f32.mrf.mxu2 }
 0x38a   :  { %v3187_v13 = vadd.f32 %v3186_v30, %v3185_v23  ;;  %v6084_v18 = vor.u32 %v6746_v14, %v6083_v1  ;;  %v6696_v30 = vld [vmem:[#allocation21 + $0x64] sm:$0xf0]  ;;  %v5995_v1 = vld [vmem:[#allocation21 + $0x140] sm:$0xf] }
 0x38b   :  { %v6724_v14 = vld [vmem:[#allocation21 + $0x144] sm:$0xf0] }
 0x38c   :  { %v3188_v2 = vrot.slane %v3187_v13, 1  ;;  %v7652_v50 = vpop.eup %6857  ;;  %4295 = vmatpush.bf16.msrb.mxu2 %v6084_v18  ;;  %v5996_v18 = vor.u32 %v6724_v14, %v5995_v1 }
 0x38d   :  { %v3332_v53 = vmul.f32 %v7652_v50, %v7646_v22  ;;  %vm3338_vm9 = vweird.f32 %v7652_v50 }
 0x38e   :  { %v3189_v20 = vadd.f32 %v3188_v2, %v3187_v13  ;;  %v5947_v13 = vld [vmem:[#allocation21 + $0xe0] sm:$0xf]  ;;  %v5884_v2 = vor.u32 %v6696_v30, %v5883_v61  ;;  %vm7679_vm14 = vmor %vm3337_vm13, %vm3338_vm9  ;;  %v6740_v61 = vld [vmem:[#allocation21 + $0x1c4] sm:$0xf0] }
 0x38f   :  { %v3333_v52 = vmul.f32 %v7652_v50, %v3332_v53  ;;  %v6710_v53 = vld [vmem:[#allocation21 + $0xd4] sm:$0xf0] }
 0x390   :  { %v3207_v6 = vmul.f32 %v3189_v20, %v7403_v58  ;;  %v6712_v20 = vld [vmem:[#allocation21 + $0xe4] sm:$0xf0]  ;;  %4257 = vmatpush.bf16.msra.mxu3 %v5884_v2 }
 0x391   :  { %v3334_v4 = vmul.f32 0.5, %v3333_v52  ;;  %v6067_v52 = vld [vmem:[#allocation21 + $0x1d0] sm:$0xf] }
 0x392   :  { %v7644_v5 = vsub.f32 %v3047_v15, %v3207_v6 }
 0x393   :  { %v3335_v16 = vsub.f32 1.5, %v3334_v4 }
 0x394   :  { %v3223_v34 = vmul.f32 %v7644_v5, %v7644_v5 }
 0x396   :  { %v3256_v29 = vrot.slane %v3223_v34, 4 }
 0x397   :  { %v3072_v26 = vpop.f32.mrf.mxu0 }
 0x398   :  { %v3257_v37 = vadd.f32 %v3256_v29, %v3223_v34  ;;  %v6728_v34 = vld [vmem:[#allocation21 + $0x164] sm:$0xf0] }
 0x399   :  { %v3085_v35 = vpop.f32.mrf.mxu1  ;;  %v6744_v29 = vld [vmem:[#allocation21 + $0x1e4] sm:$0xf0] }
 0x39a   :  { %v3258_v39 = vrot.slane %v3257_v37, 2 }
 0x39b   :  { %v3059_v43 = vpop.f32.mrf.mxu3 }
 0x39c   :  { %v3060_v40 = vadd.f32 %v3059_v43, %v1448_v38  ;;  %v3259_v47 = vadd.f32 %v3258_v39, %v3257_v37  ;;  %v6012_v43 = vor.u32 %v6728_v34, %v6011_v21  ;;  %v5923_v34 = vld [vmem:[#allocation21 + $0xb0] sm:$0xf] }
 0x39e   :  { %v3073_v41 = vadd.f32 %v3072_v26, %v3060_v40  ;;  %v3260_v51 = vrot.slane %v3259_v47, 1  ;;  %v5948_v26 = vor.u32 %v6712_v20, %v5947_v13  ;;  %v3336_v40 = vmul.f32 %v7652_v50, %v3335_v16  ;;  %4283 = vmatpush.bf16.msrb.mxu1 %v6012_v43  ;;  %v5987_v43 = vld [vmem:[#allocation21 + $0x130] sm:$0xf] }
 0x39f   :  { %v3074_v44 = vpop.f32.mrf.mxu0 }
 0x3a0   :  { %v3086_v25 = vadd.f32 %v3085_v35, %v3073_v41  ;;  %v3261_v36 = vadd.f32 %v3260_v51, %v3259_v47  ;;  %v6075_v35 = vld [vmem:[#allocation21 + $0x1e0] sm:$0xf]  ;;  %4270 = vmatpush.bf16.msrb.mxu0 %v5948_v26  ;;  %v5875_v47 = vld [vmem:[#allocation21 + $0x50] sm:$0xf]  ;;  %v6694_v41 = vld [vmem:[#allocation21 + $0x54] sm:$0xf0] }
 0x3a1   :  { %v3098_v42 = vpop.f32.mrf.mxu2  ;;  %v3087_v48 = vpop.f32.mrf.mxu1  ;;  %v6076_v39 = vor.u32 %v6744_v29, %v6075_v35  ;;  %v5876_v51 = vor.u32 %v6694_v41, %v5875_v47  ;;  %v6690_v26 = vld [vmem:[#allocation21 + $0x34] sm:$0xf0] }
 0x3a2   :  { %v3099_v12 = vadd.f32 %v3098_v42, %v3086_v25  ;;  %v3279_v55 = vmul.f32 %v3261_v36, %v7403_v58  ;;  %v5939_v25 = vld [vmem:[#allocation21 + $0xd0] sm:$0xf]  ;;  %v6706_v29 = vld [vmem:[#allocation21 + $0xb4] sm:$0xf0] }
 0x3a3   :  { %v3061_v54 = vpop.f32.mrf.mxu3  ;;  %4296 = vmatpush.bf16.msrb.mxu2 %v6076_v39  ;;  %v6003_v36 = vld [vmem:[#allocation21 + $0x150] sm:$0xf]  ;;  %4258 = vmatpush.bf16.msra.mxu3 %v5876_v51  ;;  %v6722_v39 = vld [vmem:[#allocation21 + $0x134] sm:$0xf0]  ;;  %v5924_v47 = vor.u32 %v6706_v29, %v5923_v34  ;;  %v6027_v29 = vld [vmem:[#allocation21 + $0x180] sm:$0xf] }
 0x3a4   :  { %v3190_v56 = vrot.slane %v3099_v12, 4  ;;  %v7658_v62 = vadd.f32 0.8, %v3279_v55  ;;  %v6869_v55 = vld [vmem:[#allocation16] sm:$0xff]  ;;  %v5988_v41 = vor.u32 %v6722_v39, %v5987_v43 }
 0x3a5   :  { %v1449_v22 = vperm.slane %v6869_v55, 7  ;;  %v5915_v55 = vld [vmem:[#allocation21 + $0xa0] sm:$0xf]  ;;  %v6732_v43 = vld [vmem:[#allocation21 + $0x184] sm:$0xf0] }
 0x3a6   :  { %v3191_v63 = vadd.f32 %v3190_v56, %v3099_v12  ;;  %6859 = vrsqrt.f32 %v7658_v62  ;;  %vm3347_vm15 = vweird.f32 %v7658_v62  ;;  %v5940_v56 = vor.u32 %v6710_v53, %v5939_v25  ;;  %v5851_v53 = vld [vmem:[#allocation21 + $0x20] sm:$0xf] }
 0x3a7   :  { %v6028_v39 = vor.u32 %v6732_v43, %v6027_v29  ;;  %v6788_v29 = vld [vmem:[#allocation21 + $0x344] sm:$0xf0]  ;;  %v6315_v43 = vld [vmem:[#allocation21 + $0x3c0] sm:$0xf] }
 0x3a8   :  { %v3192_v3 = vrot.slane %v3191_v63, 2  ;;  %4271 = vmatpush.bf16.msrb.mxu0 %v5940_v56  ;;  %v5979_v56 = vld [vmem:[#allocation21 + $0x120] sm:$0xf] }
 0x3a9   :  { %v3100_v28 = vpop.f32.mrf.mxu2 }
 0x3aa   :  { %v3193_v59 = vadd.f32 %v3192_v3, %v3191_v63  ;;  %v6726_v28 = vld [vmem:[#allocation21 + $0x154] sm:$0xf0] }
 0x3ab   :  { %v6004_v4 = vor.u32 %v6726_v28, %v6003_v36  ;;  %v6688_v36 = vld [vmem:[#allocation21 + $0x24] sm:$0xf0] }
 0x3ac   :  { %v3194_v46 = vrot.slane %v3193_v59, 1  ;;  %v7661_v15 = vpop.eup %6859  ;;  %4272 = vmatpush.bf16.msrb.mxu0 %v5932_v17  ;;  %v6734_v17 = vld [vmem:[#allocation21 + $0x194] sm:$0xf0] }
 0x3ad   :  { %v3342_v23 = vmul.f32 %v7661_v15, %v7658_v62  ;;  %vm3348_vm10 = vweird.f32 %v7661_v15  ;;  %v3340_v62 = vsel %vm7679_vm14, %v7652_v50, %v3336_v40  ;;  %4284 = vmatpush.bf16.msrb.mxu1 %v6004_v4  ;;  %v6043_v4 = vld [vmem:[#allocation21 + $0x1a0] sm:$0xf] }
 0x3ae   :  { %v3195_v19 = vadd.f32 %v3194_v46, %v3193_v59  ;;  %vm7686_vm0 = vmor %vm3347_vm15, %vm3348_vm10  ;;  %v6742_v59 = vld [vmem:[#allocation21 + $0x1d4] sm:$0xf0]  ;;  %v6692_v46 = vld [vmem:[#allocation21 + $0x44] sm:$0xf0]  ;;  %v3382_v30 = vrot.slane %v3340_v62, 4 }
 0x3af   :  { %v3343_v6 = vmul.f32 %v7661_v15, %v3342_v23  ;;  %v6068_v8 = vor.u32 %v6742_v59, %v6067_v52  ;;  %v5868_v10 = vor.u32 %v6692_v46, %v5867_v9  ;;  %v6059_v23 = vld [vmem:[#allocation21 + $0x1c0] sm:$0xf]  ;;  %v6736_v62 = vld [vmem:[#allocation21 + $0x1a4] sm:$0xf0]  ;;  %v5843_v9 = vld [vmem:[#allocation21 + $0x10] sm:$0xf] }
 0x3b0   :  { %v3208_v33 = vmul.f32 %v3195_v19, %v7403_v58  ;;  %v6060_v2 = vor.u32 %v6740_v61, %v6059_v23  ;;  %4273 = vmatpush.bf16.msrb.mxu0 %v5924_v47  ;;  %v6686_v46 = vld [vmem:[#allocation21 + $0x14] sm:$0xf0]  ;;  %v5835_v61 = vld [vmem:[#allocation21] sm:$0xf]  ;;  %v6211_v47 = vld [vmem:[#allocation21 + $0x2f0] sm:$0xf] }
 0x3b1   :  { %v3344_v42 = vmul.f32 0.5, %v3343_v6  ;;  %4297 = vmatpush.bf16.msrb.mxu2 %v6068_v8  ;;  %4259 = vmatpush.bf16.msra.mxu3 %v5868_v10  ;;  %v5859_v6 = vld [vmem:[#allocation21 + $0x30] sm:$0xf]  ;;  %v6044_v8 = vor.u32 %v6736_v62, %v6043_v4  ;;  %v6267_v62 = vld [vmem:[#allocation21 + $0x360] sm:$0xf] }
 0x3b2   :  { %v7668_v38 = vsub.f32 %v3099_v12, %v3208_v33  ;;  %4285 = vmatpush.bf16.msrb.mxu1 %v5996_v18  ;;  %v5860_v35 = vor.u32 %v6690_v26, %v5859_v6  ;;  %v5971_v10 = vld [vmem:[#allocation21 + $0x110] sm:$0xf] }
 0x3b3   :  { %v3345_v54 = vsub.f32 1.5, %v3344_v42 }
 0x3b4   :  { %v3224_v48 = vmul.f32 %v7668_v38, %v7668_v38 }
 0x3b5   :  { %v3346_v7 = vmul.f32 %v7661_v15, %v3345_v54  ;;  %4298 = vmatpush.bf16.msrb.mxu2 %v6060_v2  ;;  %4260 = vmatpush.bf16.msra.mxu3 %v5860_v35  ;;  %v5852_v54 = vor.u32 %v6688_v36, %v5851_v53  ;;  %v6700_v2 = vld [vmem:[#allocation21 + $0x84] sm:$0xf0]  ;;  %v6794_v53 = vld [vmem:[#allocation21 + $0x374] sm:$0xf0] }
 0x3b6   :  { %v3262_v3 = vrot.slane %v3224_v48, 4  ;;  %4286 = vmatpush.bf16.msrb.mxu1 %v5988_v41 }
 0x3b7   :  { %v3350_v16 = vsel %vm7686_vm0, %v7661_v15, %v3346_v7 }
 0x3b8   :  { %v3263_v32 = vadd.f32 %v3262_v3, %v3224_v48  ;;  %v3383_v13 = vrot.slane %v3350_v16, 3  ;;  %v6738_v48 = vld [vmem:[#allocation21 + $0x1b4] sm:$0xf0]  ;;  %v6720_v3 = vld [vmem:[#allocation21 + $0x124] sm:$0xf0] }
 0x3b9   :  { %v3124_v37 = vpop.f32.mrf.mxu0  ;;  %4261 = vmatpush.bf16.msra.mxu3 %v5852_v54  ;;  %v5980_v59 = vor.u32 %v6720_v3, %v5979_v56  ;;  %v6718_v16 = vld [vmem:[#allocation21 + $0x114] sm:$0xf0]  ;;  %v6339_v54 = vld [vmem:[#allocation21 + $0x3f0] sm:$0xf]  ;;  %v6776_v3 = vld [vmem:[#allocation21 + $0x2e4] sm:$0xf0] }
 0x3ba   :  { %v7698_v15 = vsel %vm3389_vm1, %v3382_v30, %v3383_v13  ;;  %v3264_v40 = vrot.slane %v3263_v32, 2  ;;  %v6684_v30 = vld [vmem:[#allocation21 + $0x4] sm:$0xf0]  ;;  %v5899_v13 = vld [vmem:[#allocation21 + $0x80] sm:$0xf] }
 0x3bb   :  { %v7672_v44 = vpop.f32.mrf.mxu1  ;;  %4287 = vmatpush.bf16.msrb.mxu1 %v5980_v59  ;;  %v5900_v34 = vor.u32 %v6700_v2, %v5899_v13  ;;  %v6756_v2 = vld [vmem:[#allocation21 + $0x244] sm:$0xf0] }
 0x3bc   :  { %v3265_v28 = vadd.f32 %v3264_v40, %v3263_v32  ;;  %v6702_v32 = vld [vmem:[#allocation21 + $0x94] sm:$0xf0]  ;;  %v6147_v40 = vld [vmem:[#allocation21 + $0x270] sm:$0xf] }
 0x3bd   :  { %v3111_v60 = vpop.f32.mrf.mxu3  ;;  %v5908_v14 = vor.u32 %v6702_v32, %v5907_v0  ;;  %v6808_v0 = vld [vmem:[#allocation21 + $0x3e4] sm:$0xf0]  ;;  %v6131_v32 = vld [vmem:[#allocation21 + $0x250] sm:$0xf] }
 0x3be   :  { %v3112_v19 = vadd.f32 %v3111_v60, %v1449_v22  ;;  %v6704_v22 = vld [vmem:[#allocation21 + $0xa4] sm:$0xf0]  ;;  %v5844_v60 = vor.u32 %v6686_v46, %v5843_v9  ;;  %v3266_v24 = vrot.slane %v3265_v28, 1  ;;  %v6331_v46 = vld [vmem:[#allocation21 + $0x3e0] sm:$0xf] }
 0x3bf   :  { %v5916_v63 = vor.u32 %v6704_v22, %v5915_v55  ;;  %v6810_v55 = vld [vmem:[#allocation21 + $0x3f4] sm:$0xf0]  ;;  %v6139_v22 = vld [vmem:[#allocation21 + $0x260] sm:$0xf] }
 0x3c0   :  { %v3125_v20 = vadd.f32 %v3124_v37, %v3112_v19  ;;  %v6051_v37 = vld [vmem:[#allocation21 + $0x1b0] sm:$0xf]  ;;  %4262 = vmatpush.bf16.msra.mxu3 %v5844_v60  ;;  %v3267_v6 = vadd.f32 %v3266_v24, %v3265_v28  ;;  %v6332_v60 = vor.u32 %v6808_v0, %v6331_v46  ;;  %v6235_v46 = vld [vmem:[#allocation21 + $0x320] sm:$0xf]  ;;  %v6784_v0 = vld [vmem:[#allocation21 + $0x324] sm:$0xf0] }
 0x3c1   :  { %v3126_v33 = vpop.f32.mrf.mxu0  ;;  %v6052_v51 = vor.u32 %v6738_v48, %v6051_v37  ;;  %4274 = vmatpush.bf16.msrb.mxu0 %v5916_v63  ;;  %v6035_v19 = vld [vmem:[#allocation21 + $0x190] sm:$0xf]  ;;  %v6778_v48 = vld [vmem:[#allocation21 + $0x2f4] sm:$0xf0]  ;;  %v6203_v63 = vld [vmem:[#allocation21 + $0x2e0] sm:$0xf] }
 0x3c2   :  { %v3138_v42 = vadd.f32 %v7672_v44, %v3125_v20  ;;  %v6036_v23 = vor.u32 %v6734_v17, %v6035_v19  ;;  %v5836_v33 = vor.u32 %v6684_v30, %v5835_v61  ;;  %v5963_v20 = vld [vmem:[#allocation21 + $0x100] sm:$0xf]  ;;  %v6212_v36 = vor.u32 %v6778_v48, %v6211_v47  ;;  %v6195_v24 = vld [vmem:[#allocation21 + $0x2d0] sm:$0xf]  ;;  %v6774_v19 = vld [vmem:[#allocation21 + $0x2d4] sm:$0xf0] }
 0x3c3   :  { %v3150_v50 = vpop.f32.mrf.mxu2  ;;  %v3139_v21 = vpop.f32.mrf.mxu1  ;;  %4299 = vmatpush.bf16.msrb.mxu2 %v6052_v51  ;;  %v6275_v51 = vld [vmem:[#allocation21 + $0x370] sm:$0xf]  ;;  %v3280_v56 = vmul.f32 %v3267_v6, %v7403_v58  ;;  %v6204_v59 = vor.u32 %v6776_v3, %v6203_v63  ;;  %v6790_v17 = vld [vmem:[#allocation21 + $0x354] sm:$0xf0]  ;;  %v6107_v3 = vld [vmem:[#allocation21 + $0x220] sm:$0xf] }
 0x3c4   :  { %v7701_v25 = vadd.f32 %v3150_v50, %v3138_v42  ;;  %v5972_v50 = vor.u32 %v6718_v16, %v5971_v10  ;;  %v6716_v21 = vld [vmem:[#allocation21 + $0x104] sm:$0xf0]  ;;  %4263 = vmatpush.bf16.msra.mxu3 %v5836_v33  ;;  %v6762_v42 = vld [vmem:[#allocation21 + $0x274] sm:$0xf0]  ;;  %v6123_v33 = vld [vmem:[#allocation21 + $0x240] sm:$0xf] }
 0x3c5   :  { %v3113_v12 = vpop.f32.mrf.mxu3  ;;  %4275 = vmatpush.bf16.msrb.mxu0 %v5908_v14  ;;  %v5964_v35 = vor.u32 %v6716_v21, %v5963_v20  ;;  %v6148_v37 = vor.u32 %v6762_v42, %v6147_v40  ;;  %v6758_v10 = vld [vmem:[#allocation21 + $0x254] sm:$0xf0]  ;;  %v6187_v20 = vld [vmem:[#allocation21 + $0x2c0] sm:$0xf]  ;;  %v6124_v6 = vor.u32 %v6756_v2, %v6123_v33 }
 0x3c6   :  { %v3196_v44 = vrot.slane %v7701_v25, 4  ;;  %4288 = vmatpush.bf16.msrb.mxu1 %v5972_v50  ;;  %v6276_v12 = vor.u32 %v6794_v53, %v6275_v51  ;;  %v6132_v16 = vor.u32 %v6758_v10, %v6131_v32  ;;  %v6259_v50 = vld [vmem:[#allocation21 + $0x350] sm:$0xf]  ;;  %v6236_v10 = vor.u32 %v6784_v0, %v6235_v46  ;;  %v6782_v2 = vld [vmem:[#allocation21 + $0x314] sm:$0xf0] }
 0x3c7   :  { %4300 = vmatpush.bf16.msrb.mxu2 %v6044_v8  ;;  %v6260_v30 = vor.u32 %v6790_v17, %v6259_v50  ;;  %v6179_v53 = vld [vmem:[#allocation21 + $0x2b0] sm:$0xf] }
 0x3c8   :  { %v3197_v7 = vadd.f32 %v3196_v44, %v7701_v25  ;;  %4308 = vmatpush.bf16.msrb.mxu3 %v6148_v37  ;;  %v6340_v44 = vor.u32 %v6810_v55, %v6339_v54  ;;  %v6754_v37 = vld [vmem:[#allocation21 + $0x234] sm:$0xf0]  ;;  %v6099_v50 = vld [vmem:[#allocation21 + $0x210] sm:$0xf] }
 0x3c9   :  { %4276 = vmatpush.bf16.msrb.mxu0 %v5900_v34  ;;  %v6251_v34 = vld [vmem:[#allocation21 + $0x340] sm:$0xf]  ;;  %v6786_v55 = vld [vmem:[#allocation21 + $0x334] sm:$0xf0]  ;;  %v6163_v17 = vld [vmem:[#allocation21 + $0x290] sm:$0xf] }
 0x3ca   :  { %v3198_v1 = vrot.slane %v3197_v7, 2  ;;  %4289 = vmatpush.bf16.msrb.mxu1 %v5964_v35  ;;  %v6252_v42 = vor.u32 %v6788_v29, %v6251_v34  ;;  %v6748_v34 = vld [vmem:[#allocation21 + $0x204] sm:$0xf0] }
 0x3cb   :  { %v3152_v52 = vpop.f32.mrf.mxu2  ;;  %4301 = vmatpush.bf16.msrb.mxu2 %v6036_v23  ;;  %v6806_v23 = vld [vmem:[#allocation21 + $0x3d4] sm:$0xf0]  ;;  %v6764_v29 = vld [vmem:[#allocation21 + $0x284] sm:$0xf0] }
 0x3cc   :  { %v3199_v18 = vadd.f32 %v3198_v1, %v3197_v7  ;;  %v6760_v52 = vld [vmem:[#allocation21 + $0x264] sm:$0xf0]  ;;  %v7710_v1 = vadd.f32 0.8, %v3280_v56  ;;  %v6802_v56 = vld [vmem:[#allocation21 + $0x3b4] sm:$0xf0] }
 0x3cd   :  { %4321 = vmatpush.bf16.msra.mxu0 %v6212_v36  ;;  %v6140_v4 = vor.u32 %v6760_v52, %v6139_v22  ;;  %v6792_v7 = vld [vmem:[#allocation21 + $0x364] sm:$0xf0]  ;;  %v6770_v36 = vld [vmem:[#allocation21 + $0x2b4] sm:$0xf0]  ;;  %v6307_v22 = vld [vmem:[#allocation21 + $0x3b0] sm:$0xf] }
 0x3ce   :  { %v3200_v26 = vrot.slane %v3199_v18, 1  ;;  %4334 = vmatpush.bf16.msra.mxu1 %v6276_v12  ;;  %v6268_v9 = vor.u32 %v6792_v7, %v6267_v62  ;;  %6861 = vrsqrt.f32 %v7710_v1  ;;  %v6243_v12 = vld [vmem:[#allocation21 + $0x330] sm:$0xf]  ;;  %v6180_v54 = vor.u32 %v6770_v36, %v6179_v53 }
 0x3cf   :  { %4302 = vmatpush.bf16.msrb.mxu2 %v6028_v39  ;;  %4309 = vmatpush.bf16.msrb.mxu3 %v6140_v4  ;;  %v6804_v39 = vld [vmem:[#allocation21 + $0x3c4] sm:$0xf0]  ;;  %v6244_v52 = vor.u32 %v6786_v55, %v6243_v12  ;;  %v6308_v63 = vor.u32 %v6802_v56, %v6307_v22  ;;  %vm3357_vm3 = vweird.f32 %v7710_v1 }
 0x3d0   :  { %v3201_v41 = vadd.f32 %v3200_v26, %v3199_v18  ;;  %v6323_v18 = vld [vmem:[#allocation21 + $0x3d0] sm:$0xf]  ;;  %v6772_v26 = vld [vmem:[#allocation21 + $0x2c4] sm:$0xf0]  ;;  %v6316_v47 = vor.u32 %v6804_v39, %v6315_v43  ;;  %v6219_v43 = vld [vmem:[#allocation21 + $0x300] sm:$0xf] }
 0x3d1   :  { %4322 = vmatpush.bf16.msra.mxu0 %v6204_v59  ;;  %v6324_v13 = vor.u32 %v6806_v23, %v6323_v18  ;;  %v6188_v35 = vor.u32 %v6772_v26, %v6187_v20  ;;  %v6752_v4 = vld [vmem:[#allocation21 + $0x224] sm:$0xf0]  ;;  %v6171_v59 = vld [vmem:[#allocation21 + $0x2a0] sm:$0xf]  ;;  %v6291_v20 = vld [vmem:[#allocation21 + $0x390] sm:$0xf] }
 0x3d2   :  { %v3209_v28 = vmul.f32 %v3201_v41, %v7403_v58  ;;  %4335 = vmatpush.bf16.msra.mxu1 %v6268_v9  ;;  %v6115_v41 = vld [vmem:[#allocation21 + $0x230] sm:$0xf]  ;;  %v6108_v7 = vor.u32 %v6752_v4, %v6107_v3  ;;  %v6768_v9 = vld [vmem:[#allocation21 + $0x2a4] sm:$0xf0]  ;;  %v6091_v26 = vld [vmem:[#allocation21 + $0x200] sm:$0xf] }
 0x3d3   :  { %4347 = vmatpush.bf16.msra.mxu2 %v6340_v44  ;;  %4310 = vmatpush.bf16.msrb.mxu3 %v6132_v16  ;;  %v6116_v51 = vor.u32 %v6754_v37, %v6115_v41  ;;  %v6172_v32 = vor.u32 %v6768_v9, %v6171_v59  ;;  %v6780_v39 = vld [vmem:[#allocation21 + $0x304] sm:$0xf0]  ;;  %v3282_v59 = vld [vmem:[#allocation18] sm:$0xff]  ;;  %v7726_v9 = vld [vmem:[#allocation19] sm:$0xff] }
 0x3d4   :  { %v7708_v8 = vsub.f32 %v7701_v25, %v3209_v28  ;;  %v6196_v25 = vor.u32 %v6774_v19, %v6195_v24  ;;  %v7715_v28 = vpop.eup %6861  ;;  %v6299_v24 = vld [vmem:[#allocation21 + $0x3a0] sm:$0xf]  ;;  %v3427_v0 = vperm.slane %v7726_v9, 1 }
 0x3d5   :  { %vm3358_vm2 = vweird.f32 %v7715_v28 }
 0x3d6   :  { %v3225_v14 = vmul.f32 %v7708_v8, %v7708_v8  ;;  %4323 = vmatpush.bf16.msra.mxu0 %v6196_v25  ;;  %4336 = vmatpush.bf16.msra.mxu1 %v6260_v30  ;;  %v6750_v25 = vld [vmem:[#allocation21 + $0x214] sm:$0xf0]  ;;  %v6227_v30 = vld [vmem:[#allocation21 + $0x310] sm:$0xf]  ;;  %vm3359_vm8 = vmor %vm3357_vm3, %vm3358_vm2 }
 0x3d7   :  { %4348 = vmatpush.bf16.msra.mxu2 %v6332_v60  ;;  %4311 = vmatpush.bf16.msrb.mxu3 %v6124_v6  ;;  %v3352_v60 = vmul.f32 %v7715_v28, %v7710_v1  ;;  %v6100_v23 = vor.u32 %v6750_v25, %v6099_v50 }
 0x3d8   :  { %v3268_v61 = vrot.slane %v3225_v14, 4 }
 0x3da   :  { %v3269_v21 = vadd.f32 %v3268_v61, %v3225_v14  ;;  %4324 = vmatpush.bf16.msra.mxu0 %v6188_v35  ;;  %4337 = vmatpush.bf16.msra.mxu1 %v6252_v42  ;;  %v6800_v14 = vld [vmem:[#allocation21 + $0x3a4] sm:$0xf0]  ;;  %v6766_v61 = vld [vmem:[#allocation21 + $0x294] sm:$0xf0]  ;;  %v6155_v35 = vld [vmem:[#allocation21 + $0x280] sm:$0xf] }
 0x3db   :  { %4349 = vmatpush.bf16.msra.mxu2 %v6324_v13  ;;  %4312 = vmatpush.bf16.msrb.mxu3 %v6116_v51  ;;  %v6300_v19 = vor.u32 %v6800_v14, %v6299_v24  ;;  %v3353_v13 = vmul.f32 %v7715_v28, %v3352_v60  ;;  %v6164_v33 = vor.u32 %v6766_v61, %v6163_v17  ;;  %v6283_v42 = vld [vmem:[#allocation21 + $0x380] sm:$0xf]  ;;  %v3428_v60 = vperm.slane %v7726_v9, 2  ;;  %v5893_v61 = vld [vmem:[#allocation21 + $0x78] sm:$0xf0] }
 0x3dc   :  { %v3270_v40 = vrot.slane %v3269_v21, 2  ;;  %v6156_v37 = vor.u32 %v6764_v29, %v6155_v35 }
 0x3dd   :  { %v3354_v41 = vmul.f32 0.5, %v3353_v13  ;;  %v6713_v13 = vld [vmem:[#allocation21 + $0xf4] sm:$0xf] }
 0x3de   :  { %v3271_v48 = vadd.f32 %v3270_v40, %v3269_v21  ;;  %4325 = vmatpush.bf16.msra.mxu0 %v6180_v54  ;;  %4338 = vmatpush.bf16.msra.mxu1 %v6244_v52  ;;  %v6798_v21 = vld [vmem:[#allocation21 + $0x394] sm:$0xf0]  ;;  %v6092_v40 = vor.u32 %v6748_v34, %v6091_v26  ;;  %v6729_v26 = vld [vmem:[#allocation21 + $0x174] sm:$0xf] }
 0x3df   :  { %4350 = vmatpush.bf16.msra.mxu2 %v6316_v47  ;;  %4313 = vmatpush.bf16.msrb.mxu3 %v6108_v7  ;;  %v6292_v6 = vor.u32 %v6798_v21, %v6291_v20  ;;  %v6796_v47 = vld [vmem:[#allocation21 + $0x384] sm:$0xf0]  ;;  %v3355_v36 = vsub.f32 1.5, %v3354_v41 }
 0x3e0   :  { %v3272_v44 = vrot.slane %v3271_v48, 1  ;;  %v6284_v51 = vor.u32 %v6796_v47, %v6283_v42  ;;  %v3431_v42 = vperm.slane %v7726_v9, 5 }
 0x3e1   :  { %v3356_v55 = vmul.f32 %v7715_v28, %v3355_v36 }
 0x3e2   :  { %v3273_v62 = vadd.f32 %v3272_v44, %v3271_v48  ;;  %4326 = vmatpush.bf16.msra.mxu0 %v6172_v32  ;;  %4339 = vmatpush.bf16.msra.mxu1 %v6236_v10  ;;  %v6220_v48 = vor.u32 %v6780_v39, %v6219_v43 }
 0x3e3   :  { %4351 = vmatpush.bf16.msra.mxu2 %v6308_v63  ;;  %4314 = vmatpush.bf16.msrb.mxu3 %v6100_v23  ;;  %v3360_v44 = vsel %vm3359_vm8, %v7715_v28, %v3356_v55  ;;  %v3426_v28 = vperm.slane %v7726_v9, 0  ;;  %v6697_v23 = vld [vmem:[#allocation21 + $0x74] sm:$0xf]  ;;  %v5885_v55 = vld [vmem:[#allocation21 + $0x68] sm:$0xf0] }
 0x3e4   :  { %v3281_v16 = vmul.f32 %v3273_v62, %v7403_v58  ;;  %v6228_v58 = vor.u32 %v6782_v2, %v6227_v30  ;;  %v3384_v3 = vrot.slane %v3360_v44, 2 }
 0x3e6   :  { %v3290_v18 = vadd.f32 0.8, %v3281_v16  ;;  %4327 = vmatpush.bf16.msra.mxu0 %v6164_v33  ;;  %4340 = vmatpush.bf16.msra.mxu1 %v6228_v58  ;;  %v5957_v33 = vld [vmem:[#allocation21 + $0xf8] sm:$0xf0] }
 0x3e7   :  { %4352 = vmatpush.bf16.msra.mxu2 %v6300_v19  ;;  %4315 = vmatpush.bf16.msrb.mxu3 %v6092_v40  ;;  %v5960_v35 = vor.u32 %v6713_v13, %v5957_v33  ;;  %v6085_v40 = vld [vmem:[#allocation21 + $0x1f8] sm:$0xf0]  ;;  %v6723_v13 = vld [vmem:[#allocation21 + $0x144] sm:$0xf] }
 0x3e8   :  { %6863 = vrsqrt.f32 %v3290_v18  ;;  %vm3367_vm5 = vweird.f32 %v3290_v18 }
 0x3ea   :  { %4328 = vmatpush.bf16.msra.mxu0 %v6156_v37  ;;  %4341 = vmatpush.bf16.msra.mxu1 %v6220_v48  ;;  %v3432_v48 = vperm.slane %v7726_v9, 6 }
 0x3eb   :  { %4353 = vmatpush.bf16.msra.mxu2 %v6292_v6 }
 0x3ee   :  { %v6864_v53 = vpop.eup %6863 }
 0x3ef   :  { %v3362_v12 = vmul.f32 %v6864_v53, %v3290_v18  ;;  %4354 = vmatpush.bf16.msra.mxu2 %v6284_v51  ;;  %vm3368_vm4 = vweird.f32 %v6864_v53 }
 0x3f0   :  { %vm3369_vm6 = vmor %vm3367_vm5, %vm3368_vm4 }
 0x3f1   :  { %v3363_v54 = vmul.f32 %v6864_v53, %v3362_v12 }
 0x3f3   :  { %v3364_v22 = vmul.f32 0.5, %v3363_v54  ;;  %v6695_v54 = vld [vmem:[#allocation21 + $0x64] sm:$0xf] }
 0x3f5   :  { %v3365_v56 = vsub.f32 1.5, %v3364_v22  ;;  %v6711_v22 = vld [vmem:[#allocation21 + $0xe4] sm:$0xf] }
 0x3f7   :  { %v3366_v52 = vmul.f32 %v6864_v53, %v3365_v56 }
 0x3f9   :  { %v3370_v63 = vsel %vm3369_vm6, %v6864_v53, %v3366_v52  ;;  %v5949_v52 = vld [vmem:[#allocation21 + $0xe8] sm:$0xf0] }
 0x3fa   :  { %v3385_v4 = vrot.slane %v3370_v63, 1  ;;  %v6727_v63 = vld [vmem:[#allocation21 + $0x164] sm:$0xf] }
 0x3fc   :  { %v3392_v62 = vsel %vm3391_vm7, %v3384_v3, %v3385_v4  ;;  %v6013_v3 = vld [vmem:[#allocation21 + $0x168] sm:$0xf0] }
 0x3fd   :  { %v3394_v7 = vsel %vm3393_vm11, %v7698_v15, %v3392_v62  ;;  %v6743_v62 = vld [vmem:[#allocation21 + $0x1e4] sm:$0xf] }
 0x3fe   :  { %v3396_v1 = vsel %vm3395_vm12, %v7640_v11, %v3394_v7  ;;  %v3429_v11 = vperm.slane %v7726_v9, 3  ;;  %v6077_v7 = vld [vmem:[#allocation21 + $0x1e8] sm:$0xf0] }
 0x3ff   :  { %v7729_v46 = vmul.f32 %v3396_v1, %v3282_v59  ;;  %v3433_v59 = vperm.slane %v7726_v9, 7  ;;  %v5888_v1 = vor.u32 %v6695_v54, %v5885_v55 }
 0x401   :  { %v3407_v32 = vperm.slane %v7729_v46, 7  ;;  %v3400_v10 = vperm.slane %v7729_v46, 0  ;;  %v3401_v24 = vperm.slane %v7729_v46, 1  ;;  %v3402_v15 = vperm.slane %v7729_v46, 2 }
 0x402   :  { %v3403_v14 = vperm.slane %v7729_v46, 3  ;;  %v3404_v16 = vperm.slane %v7729_v46, 4  ;;  %v3405_v19 = vperm.slane %v7729_v46, 5  ;;  %v3406_v29 = vperm.slane %v7729_v46, 6  ;;  %v6693_v46 = vld [vmem:[#allocation21 + $0x54] sm:$0xf] }
 0x403   :  { %v7743_v50 = vmul.f32 %v3407_v32, %v7708_v8  ;;  %v3416_v25 = vmul.f32 %v3400_v10, %v7584_v27  ;;  %v3417_v17 = vmul.f32 %v3401_v24, %v7599_v45  ;;  %v3418_v18 = vmul.f32 %v3402_v15, %v7613_v31  ;;  %v6021_v45 = vld [vmem:[#allocation21 + $0x178] sm:$0xf0]  ;;  %v6709_v32 = vld [vmem:[#allocation21 + $0xd4] sm:$0xf] }
 0x404   :  { %v3419_v30 = vmul.f32 %v3403_v14, %v7625_v57  ;;  %v3420_v2 = vmul.f32 %v3404_v16, %v7632_v49  ;;  %v7751_v20 = vmul.f32 %v3405_v19, %v7644_v5  ;;  %v5896_v27 = vor.u32 %v6697_v23, %v5893_v61  ;;  %v6745_v57 = vld [vmem:[#allocation21 + $0x1f4] sm:$0xf]  ;;  %v6005_v15 = vld [vmem:[#allocation21 + $0x158] sm:$0xf0]  ;;  %v6707_v61 = vld [vmem:[#allocation21 + $0xc4] sm:$0xf] }
 0x405   :  { %v3442_v21 = vadd.f32 %v3426_v28, %v3416_v25  ;;  %v3443_v8 = vadd.f32 %v3427_v0, %v3417_v17  ;;  %v3444_v58 = vadd.f32 %v3428_v60, %v3418_v18  ;;  %v3430_v31 = vperm.slane %v7726_v9, 4  ;;  %v5877_v60 = vld [vmem:[#allocation21 + $0x58] sm:$0xf0]  ;;  %v6725_v24 = vld [vmem:[#allocation21 + $0x154] sm:$0xf] }
 0x406   :  { %v3445_v6 = vadd.f32 %v3429_v11, %v3419_v30  ;;  %v6024_v12 = vor.u32 %v6729_v26, %v6021_v45  ;;  %v6088_v44 = vor.u32 %v6745_v57, %v6085_v40  ;;  %v3422_v4 = vmul.f32 %v3406_v29, %v7668_v38  ;;  %v5941_v38 = vld [vmem:[#allocation21 + $0xd8] sm:$0xf0]  ;;  %v6741_v14 = vld [vmem:[#allocation21 + $0x1d4] sm:$0xf]  ;;  %v6691_v17 = vld [vmem:[#allocation21 + $0x44] sm:$0xf] }
 0x407   :  { %vm3450_vm9 = vcmp.gt.f32.partialorder %v3442_v21, 0.0  ;;  %v3458_v34 = vmul.f32 0.2, %v3442_v21  ;;  %vm3451_vm10 = vcmp.gt.f32.partialorder %v3443_v8, 0.0  ;;  %v3459_v49 = vmul.f32 0.2, %v3443_v8 }
 0x408   :  { %vm3452_vm13 = vcmp.gt.f32.partialorder %v3444_v58, 0.0  ;;  %v3460_v5 = vmul.f32 0.2, %v3444_v58  ;;  %vm3453_vm14 = vcmp.gt.f32.partialorder %v3445_v6, 0.0  ;;  %v3461_v39 = vmul.f32 0.2, %v3445_v6 }
 0x409   :  { %v3466_v43 = vsel %vm3450_vm9, %v3442_v21, %v3458_v34  ;;  %v3467_v41 = vsel %vm3451_vm10, %v3443_v8, %v3459_v49  ;;  %v5952_v28 = vor.u32 %v6711_v22, %v5949_v52  ;;  %v6016_v0 = vor.u32 %v6727_v63, %v6013_v3  ;;  %v6069_v25 = vld [vmem:[#allocation21 + $0x1d8] sm:$0xf0]  ;;  %v5869_v18 = vld [vmem:[#allocation21 + $0x48] sm:$0xf0]  ;;  %v6739_v8 = vld [vmem:[#allocation21 + $0x1c4] sm:$0xf] }
 0x40a   :  { %v7756_v47 = vpack.c.bf16 %v3466_v43, %v3466_v43  ;;  %v3468_v37 = vsel %vm3452_vm13, %v3444_v58, %v3460_v5  ;;  %v7759_v51 = vpack.c.bf16 %v3467_v41, %v3467_v41  ;;  %v3469_v36 = vsel %vm3453_vm14, %v3445_v6, %v3461_v39  ;;  %v5933_v30 = vld [vmem:[#allocation21 + $0xc8] sm:$0xf0]  ;;  %v5861_v29 = vld [vmem:[#allocation21 + $0x38] sm:$0xf0]  ;;  %v6705_v49 = vld [vmem:[#allocation21 + $0xb4] sm:$0xf] }
 0x40b   :  { %v7761_v53 = vpack.c.bf16 %v3468_v37, %v3468_v37  ;;  %v7764_v56 = vpack.c.bf16 %v3469_v36, %v3469_v36  ;;  %v3446_v10 = vadd.f32 %v3430_v31, %v3420_v2  ;;  %v6080_v9 = vor.u32 %v6743_v62, %v6077_v7  ;;  %v5997_v21 = vld [vmem:[#allocation21 + $0x148] sm:$0xf0]  ;;  %v6689_v31 = vld [vmem:[#allocation21 + $0x34] sm:$0xf]  ;;  %v5925_v5 = vld [vmem:[#allocation21 + $0xb8] sm:$0xf0] }
 0x40c   :  { %4264 = vmatmul.bf16.vlgmr.msra.gmra.mxu3 %v7756_v47  ;;  %4277 = vmatmul.bf16.vlgmr.msrb.gmra.mxu0 %v7759_v51  ;;  %v3447_v11 = vadd.f32 %v3431_v42, %v7751_v20  ;;  %v3448_v16 = vadd.f32 %v3432_v48, %v3422_v4  ;;  %v3449_v19 = vadd.f32 %v3433_v59, %v7743_v50  ;;  %v6061_v26 = vld [vmem:[#allocation21 + $0x1c8] sm:$0xf0]  ;;  %v6721_v42 = vld [vmem:[#allocation21 + $0x134] sm:$0xf]  ;;  %v5989_v41 = vld [vmem:[#allocation21 + $0x138] sm:$0xf0] }
 0x40d   :  { %4290 = vmatmul.bf16.vlgmr.msrb.gmra.mxu1 %v7761_v53  ;;  %4303 = vmatmul.bf16.vlgmr.msrb.gmra.mxu2 %v7764_v56  ;;  %v5880_v23 = vor.u32 %v6693_v46, %v5877_v60  ;;  %v5944_v33 = vor.u32 %v6709_v32, %v5941_v38  ;;  %v6008_v2 = vor.u32 %v6725_v24, %v6005_v15  ;;  %v3462_v58 = vmul.f32 0.2, %v3446_v10  ;;  %v6737_v48 = vld [vmem:[#allocation21 + $0x1b4] sm:$0xf]  ;;  %v6053_v36 = vld [vmem:[#allocation21 + $0x1b8] sm:$0xf0] }
 0x40e   :  { %4360 = vmatpush.bf16.msra.mxu3 %v5896_v27  ;;  %4373 = vmatpush.bf16.msrb.mxu0 %v5960_v35  ;;  %v6072_v20 = vor.u32 %v6741_v14, %v6069_v25  ;;  %vm3454_vm15 = vcmp.gt.f32.partialorder %v3446_v10, 0.0  ;;  %v3463_v6 = vmul.f32 0.2, %v3447_v11  ;;  %v3464_v50 = vmul.f32 0.2, %v3448_v16 }
 0x40f   :  { %4386 = vmatpush.bf16.msrb.mxu1 %v6024_v12  ;;  %4399 = vmatpush.bf16.msrb.mxu2 %v6088_v44  ;;  %v3465_v27 = vmul.f32 0.2, %v3449_v19  ;;  %vm3455_vm0 = vcmp.gt.f32.partialorder %v3447_v11, 0.0  ;;  %vm3456_vm1 = vcmp.gt.f32.partialorder %v3448_v16, 0.0  ;;  %vm3457_vm2 = vcmp.gt.f32.partialorder %v3449_v19, 0.0 }
 0x410   :  { %v5872_v45 = vor.u32 %v6691_v17, %v5869_v18  ;;  %v5936_v34 = vor.u32 %v6707_v61, %v5933_v30  ;;  %v6000_v35 = vor.u32 %v6723_v13, %v5997_v21  ;;  %v3470_v57 = vsel %vm3454_vm15, %v3446_v10, %v3462_v58  ;;  %v6687_v63 = vld [vmem:[#allocation21 + $0x24] sm:$0xf]  ;;  %v5853_v3 = vld [vmem:[#allocation21 + $0x28] sm:$0xf0]  ;;  %v6685_v10 = vld [vmem:[#allocation21 + $0x14] sm:$0xf] }
 0x411   :  { %v6064_v43 = vor.u32 %v6739_v8, %v6061_v26  ;;  %v3471_v39 = vsel %vm3455_vm0, %v3447_v11, %v3463_v6  ;;  %v3472_v40 = vsel %vm3456_vm1, %v3448_v16, %v3464_v50  ;;  %v3473_v37 = vsel %vm3457_vm2, %v3449_v19, %v3465_v27  ;;  %v6703_v4 = vld [vmem:[#allocation21 + $0xa4] sm:$0xf]  ;;  %v5917_v7 = vld [vmem:[#allocation21 + $0xa8] sm:$0xf0]  ;;  %v6701_v24 = vld [vmem:[#allocation21 + $0x94] sm:$0xf] }
 0x412   :  { %4361 = vmatpush.bf16.msra.mxu3 %v5888_v1  ;;  %4374 = vmatpush.bf16.msrb.mxu0 %v5952_v28  ;;  %v7776_v12 = vpack.c.bf16 %v3470_v57, %v3470_v57  ;;  %v5864_v54 = vor.u32 %v6689_v31, %v5861_v29  ;;  %v5928_v55 = vor.u32 %v6705_v49, %v5925_v5  ;;  %v6719_v1 = vld [vmem:[#allocation21 + $0x124] sm:$0xf]  ;;  %v5981_v46 = vld [vmem:[#allocation21 + $0x128] sm:$0xf0]  ;;  %v5909_v14 = vld [vmem:[#allocation21 + $0x98] sm:$0xf0] }
 0x413   :  { %4387 = vmatpush.bf16.msrb.mxu1 %v6016_v0  ;;  %4400 = vmatpush.bf16.msrb.mxu2 %v6080_v9  ;;  %v7778_v22 = vpack.c.bf16 %v3471_v39, %v3471_v39  ;;  %v7780_v44 = vpack.c.bf16 %v3472_v40, %v3472_v40  ;;  %v5992_v52 = vor.u32 %v6721_v42, %v5989_v41  ;;  %v6735_v28 = vld [vmem:[#allocation21 + $0x1a4] sm:$0xf]  ;;  %v6045_v0 = vld [vmem:[#allocation21 + $0x1a8] sm:$0xf0]  ;;  %v5845_v9 = vld [vmem:[#allocation21 + $0x18] sm:$0xf0] }
 0x414   :  { %v7783_v59 = vpack.c.bf16 %v3473_v37, %v3473_v37  ;;  %v6056_v62 = vor.u32 %v6737_v48, %v6053_v36  ;;  %v5856_v60 = vor.u32 %v6687_v63, %v5853_v3  ;;  %v5920_v32 = vor.u32 %v6703_v4, %v5917_v7  ;;  %v6717_v11 = vld [vmem:[#allocation21 + $0x114] sm:$0xf]  ;;  %v5973_v16 = vld [vmem:[#allocation21 + $0x118] sm:$0xf0]  ;;  %v6683_v18 = vld [vmem:[#allocation21 + $0x4] sm:$0xf] }
 0x415   :  { %v5984_v38 = vor.u32 %v6719_v1, %v5981_v46  ;;  %v6048_v15 = vor.u32 %v6735_v28, %v6045_v0  ;;  %v6733_v19 = vld [vmem:[#allocation21 + $0x194] sm:$0xf]  ;;  %v6037_v25 = vld [vmem:[#allocation21 + $0x198] sm:$0xf0]  ;;  %v5848_v17 = vor.u32 %v6685_v10, %v5845_v9  ;;  %v5912_v61 = vor.u32 %v6701_v24, %v5909_v14  ;;  %v6699_v13 = vld [vmem:[#allocation21 + $0x84] sm:$0xf] }
 0x416   :  { %4362 = vmatpush.bf16.msra.mxu3 %v5880_v23  ;;  %4375 = vmatpush.bf16.msrb.mxu0 %v5944_v33  ;;  %v5837_v23 = vld [vmem:[#allocation21 + $0x8] sm:$0xf0]  ;;  %v5976_v30 = vor.u32 %v6717_v11, %v5973_v16  ;;  %v6040_v21 = vor.u32 %v6733_v19, %v6037_v25  ;;  %v6731_v58 = vld [vmem:[#allocation21 + $0x184] sm:$0xf]  ;;  %v6761_v6 = vld [vmem:[#allocation21 + $0x274] sm:$0xf] }
 0x417   :  { %4388 = vmatpush.bf16.msrb.mxu1 %v6008_v2  ;;  %4401 = vmatpush.bf16.msrb.mxu2 %v6072_v20  ;;  %v5901_v33 = vld [vmem:[#allocation21 + $0x88] sm:$0xf0]  ;;  %v6715_v2 = vld [vmem:[#allocation21 + $0x104] sm:$0xf]  ;;  %v6149_v50 = vld [vmem:[#allocation21 + $0x278] sm:$0xf0]  ;;  %v5840_v26 = vor.u32 %v6683_v18, %v5837_v23 }
 0x418   :  { %v5965_v8 = vld [vmem:[#allocation21 + $0x108] sm:$0xf0]  ;;  %v6777_v27 = vld [vmem:[#allocation21 + $0x2f4] sm:$0xf]  ;;  %v6341_v49 = vld [vmem:[#allocation21 + $0x3f8] sm:$0xf0] }
 0x419   :  { %v6029_v20 = vld [vmem:[#allocation21 + $0x188] sm:$0xf0]  ;;  %v6793_v31 = vld [vmem:[#allocation21 + $0x374] sm:$0xf]  ;;  %v5968_v57 = vor.u32 %v6715_v2, %v5965_v8  ;;  %v6759_v42 = vld [vmem:[#allocation21 + $0x264] sm:$0xf] }
 0x41a   :  { %4363 = vmatpush.bf16.msra.mxu3 %v5872_v45  ;;  %4376 = vmatpush.bf16.msrb.mxu0 %v5936_v34  ;;  %v6213_v45 = vld [vmem:[#allocation21 + $0x2f8] sm:$0xf0]  ;;  %v6809_v29 = vld [vmem:[#allocation21 + $0x3f4] sm:$0xf]  ;;  %v6032_v5 = vor.u32 %v6731_v58, %v6029_v20  ;;  %v6141_v41 = vld [vmem:[#allocation21 + $0x268] sm:$0xf0] }
 0x41b   :  { %4389 = vmatpush.bf16.msrb.mxu1 %v6000_v35  ;;  %4402 = vmatpush.bf16.msrb.mxu2 %v6064_v43  ;;  %v6277_v34 = vld [vmem:[#allocation21 + $0x378] sm:$0xf0]  ;;  %v5904_v35 = vor.u32 %v6699_v13, %v5901_v33  ;;  %v6152_v43 = vor.u32 %v6761_v6, %v6149_v50  ;;  %v6216_v39 = vor.u32 %v6777_v27, %v6213_v45  ;;  %v6775_v37 = vld [vmem:[#allocation21 + $0x2e4] sm:$0xf]  ;;  %v6205_v36 = vld [vmem:[#allocation21 + $0x2e8] sm:$0xf0] }
 0x41c   :  { %4316 = vmatmul.bf16.vlgmr.msrb.gmra.mxu3 %v7776_v12  ;;  %4329 = vmatmul.bf16.vlgmr.msra.gmra.mxu0 %v7778_v22  ;;  %v6280_v40 = vor.u32 %v6793_v31, %v6277_v34  ;;  %v6344_v48 = vor.u32 %v6809_v29, %v6341_v49  ;;  %v6333_v63 = vld [vmem:[#allocation21 + $0x3e8] sm:$0xf0]  ;;  %v6144_v3 = vor.u32 %v6759_v42, %v6141_v41  ;;  %v6757_v7 = vld [vmem:[#allocation21 + $0x254] sm:$0xf]  ;;  %v6133_v1 = vld [vmem:[#allocation21 + $0x258] sm:$0xf0] }
 0x41d   :  { %4342 = vmatmul.bf16.vlgmr.msra.gmra.mxu1 %v7780_v44  ;;  %4355 = vmatmul.bf16.vlgmr.msra.gmra.mxu2 %v7783_v59  ;;  %v6208_v4 = vor.u32 %v6775_v37, %v6205_v36  ;;  %v6773_v46 = vld [vmem:[#allocation21 + $0x2d4] sm:$0xf]  ;;  %v6197_v0 = vld [vmem:[#allocation21 + $0x2d8] sm:$0xf0]  ;;  %v6136_v9 = vor.u32 %v6757_v7, %v6133_v1  ;;  %v6755_v14 = vld [vmem:[#allocation21 + $0x244] sm:$0xf] }
 0x41e   :  { %4364 = vmatpush.bf16.msra.mxu3 %v5864_v54  ;;  %4377 = vmatpush.bf16.msrb.mxu0 %v5928_v55  ;;  %v6791_v54 = vld [vmem:[#allocation21 + $0x364] sm:$0xf]  ;;  %v6269_v55 = vld [vmem:[#allocation21 + $0x368] sm:$0xf0]  ;;  %v6325_v10 = vld [vmem:[#allocation21 + $0x3d8] sm:$0xf0]  ;;  %v6200_v24 = vor.u32 %v6773_v46, %v6197_v0 }
 0x41f   :  { %4390 = vmatpush.bf16.msrb.mxu1 %v5992_v52  ;;  %4403 = vmatpush.bf16.msrb.mxu2 %v6056_v62  ;;  %v6807_v52 = vld [vmem:[#allocation21 + $0x3e4] sm:$0xf]  ;;  %v6272_v62 = vor.u32 %v6791_v54, %v6269_v55  ;;  %v6189_v19 = vld [vmem:[#allocation21 + $0x2c8] sm:$0xf0]  ;;  %v6769_v13 = vld [vmem:[#allocation21 + $0x2b4] sm:$0xf] }
 0x420   :  { %v6336_v28 = vor.u32 %v6807_v52, %v6333_v63  ;;  %v6771_v11 = vld [vmem:[#allocation21 + $0x2c4] sm:$0xf]  ;;  %v6181_v2 = vld [vmem:[#allocation21 + $0x2b8] sm:$0xf0]  ;;  %v6801_v58 = vld [vmem:[#allocation21 + $0x3b4] sm:$0xf] }
 0x421   :  { %v6787_v25 = vld [vmem:[#allocation21 + $0x344] sm:$0xf]  ;;  %v6245_v8 = vld [vmem:[#allocation21 + $0x338] sm:$0xf0]  ;;  %v6184_v50 = vor.u32 %v6769_v13, %v6181_v2  ;;  %v6109_v45 = vld [vmem:[#allocation21 + $0x228] sm:$0xf0] }
 0x422   :  { %4365 = vmatpush.bf16.msra.mxu3 %v5856_v60  ;;  %4378 = vmatpush.bf16.msrb.mxu0 %v5920_v32  ;;  %v6789_v60 = vld [vmem:[#allocation21 + $0x354] sm:$0xf]  ;;  %v6261_v32 = vld [vmem:[#allocation21 + $0x358] sm:$0xf0]  ;;  %v6767_v31 = vld [vmem:[#allocation21 + $0x2a4] sm:$0xf] }
 0x423   :  { %4391 = vmatpush.bf16.msrb.mxu1 %v5984_v38  ;;  %4404 = vmatpush.bf16.msrb.mxu2 %v6048_v15  ;;  %v6805_v38 = vld [vmem:[#allocation21 + $0x3d4] sm:$0xf]  ;;  %v6264_v15 = vor.u32 %v6789_v60, %v6261_v32  ;;  %v6309_v20 = vld [vmem:[#allocation21 + $0x3b8] sm:$0xf0]  ;;  %v6237_v29 = vld [vmem:[#allocation21 + $0x328] sm:$0xf0] }
 0x424   :  { %v6328_v16 = vor.u32 %v6805_v38, %v6325_v10  ;;  %v6312_v34 = vor.u32 %v6801_v58, %v6309_v20  ;;  %v6799_v49 = vld [vmem:[#allocation21 + $0x3a4] sm:$0xf]  ;;  %v6749_v42 = vld [vmem:[#allocation21 + $0x214] sm:$0xf]  ;;  %v6101_v41 = vld [vmem:[#allocation21 + $0x218] sm:$0xf0] }
 0x425   :  { %v6765_v37 = vld [vmem:[#allocation21 + $0x294] sm:$0xf]  ;;  %v6165_v36 = vld [vmem:[#allocation21 + $0x298] sm:$0xf0]  ;;  %v6747_v7 = vld [vmem:[#allocation21 + $0x204] sm:$0xf] }
 0x426   :  { %4366 = vmatpush.bf16.msra.mxu3 %v5848_v17  ;;  %4379 = vmatpush.bf16.msrb.mxu0 %v5912_v61  ;;  %v6803_v17 = vld [vmem:[#allocation21 + $0x3c4] sm:$0xf]  ;;  %v6753_v61 = vld [vmem:[#allocation21 + $0x234] sm:$0xf]  ;;  %v6229_v55 = vld [vmem:[#allocation21 + $0x318] sm:$0xf0] }
 0x427   :  { %4392 = vmatpush.bf16.msrb.mxu1 %v5976_v30  ;;  %4405 = vmatpush.bf16.msrb.mxu2 %v6040_v21  ;;  %v6117_v30 = vld [vmem:[#allocation21 + $0x238] sm:$0xf0]  ;;  %v6785_v21 = vld [vmem:[#allocation21 + $0x334] sm:$0xf]  ;;  %v6093_v1 = vld [vmem:[#allocation21 + $0x208] sm:$0xf0] }
 0x428   :  { %v6120_v6 = vor.u32 %v6753_v61, %v6117_v30  ;;  %v6248_v27 = vor.u32 %v6785_v21, %v6245_v8  ;;  %v6781_v54 = vld [vmem:[#allocation21 + $0x314] sm:$0xf]  ;;  %v6293_v63 = vld [vmem:[#allocation21 + $0x398] sm:$0xf0]  ;;  %v6763_v46 = vld [vmem:[#allocation21 + $0x284] sm:$0xf] }
 0x429   :  { %v6797_v52 = vld [vmem:[#allocation21 + $0x394] sm:$0xf]  ;;  %v6157_v0 = vld [vmem:[#allocation21 + $0x288] sm:$0xf0]  ;;  %v6779_v60 = vld [vmem:[#allocation21 + $0x304] sm:$0xf] }
 0x42a   :  { %4367 = vmatpush.bf16.msra.mxu3 %v5840_v26  ;;  %4380 = vmatpush.bf16.msrb.mxu0 %v5904_v35  ;;  %v6751_v26 = vld [vmem:[#allocation21 + $0x224] sm:$0xf]  ;;  %v6173_v35 = vld [vmem:[#allocation21 + $0x2a8] sm:$0xf0] }
 0x42b   :  { %4393 = vmatpush.bf16.msrb.mxu1 %v5968_v57  ;;  %4406 = vmatpush.bf16.msrb.mxu2 %v6032_v5  ;;  %v6783_v57 = vld [vmem:[#allocation21 + $0x324] sm:$0xf]  ;;  %v6301_v5 = vld [vmem:[#allocation21 + $0x3a8] sm:$0xf0] }
 0x42c   :  { %v6221_v32 = vld [vmem:[#allocation21 + $0x308] sm:$0xf0]  ;;  %v6795_v38 = vld [vmem:[#allocation21 + $0x384] sm:$0xf] }
 0x42d   :  { %4368 = vmatmul.bf16.vlgmr.msra.gmra.mxu3 %v7756_v47  ;;  %4381 = vmatmul.bf16.vlgmr.msrb.gmra.mxu0 %v7759_v51  ;;  %v6125_v47 = vld [vmem:[#allocation21 + $0x248] sm:$0xf0] }
 0x42e   :  { %4412 = vmatpush.bf16.msrb.mxu3 %v6152_v43  ;;  %4425 = vmatpush.bf16.msra.mxu0 %v6216_v39  ;;  %v6253_v51 = vld [vmem:[#allocation21 + $0x348] sm:$0xf0]  ;;  %v6128_v18 = vor.u32 %v6755_v14, %v6125_v47  ;;  %v6112_v43 = vor.u32 %v6751_v26, %v6109_v45  ;;  %v6176_v39 = vor.u32 %v6767_v31, %v6173_v35 }
 0x42f   :  { %4438 = vmatpush.bf16.msra.mxu1 %v6280_v40  ;;  %4451 = vmatpush.bf16.msra.mxu2 %v6344_v48  ;;  %v6256_v23 = vor.u32 %v6787_v25, %v6253_v51  ;;  %v6240_v40 = vor.u32 %v6783_v57, %v6237_v29  ;;  %v6304_v48 = vor.u32 %v6799_v49, %v6301_v5  ;;  %v6285_v10 = vld [vmem:[#allocation21 + $0x388] sm:$0xf0] }
 0x430   :  { %4394 = vmatmul.bf16.vlgmr.msrb.gmra.mxu1 %v7761_v53  ;;  %4407 = vmatmul.bf16.vlgmr.msrb.gmra.mxu2 %v7764_v56  ;;  %v6317_v53 = vld [vmem:[#allocation21 + $0x3c8] sm:$0xf0]  ;;  %v6192_v56 = vor.u32 %v6771_v11, %v6189_v19  ;;  %v6288_v14 = vor.u32 %v6795_v38, %v6285_v10 }
 0x431   :  { %v6320_v33 = vor.u32 %v6803_v17, %v6317_v53 }
 0x432   :  { %4413 = vmatpush.bf16.msrb.mxu3 %v6144_v3  ;;  %4426 = vmatpush.bf16.msra.mxu0 %v6208_v4  ;;  %v6104_v3 = vor.u32 %v6749_v42, %v6101_v41  ;;  %v6168_v4 = vor.u32 %v6765_v37, %v6165_v36 }
 0x433   :  { %4439 = vmatpush.bf16.msra.mxu1 %v6272_v62  ;;  %4452 = vmatpush.bf16.msra.mxu2 %v6336_v28  ;;  %v6232_v62 = vor.u32 %v6781_v54, %v6229_v55  ;;  %v6296_v28 = vor.u32 %v6797_v52, %v6293_v63 }
 0x436   :  { %4414 = vmatpush.bf16.msrb.mxu3 %v6136_v9  ;;  %4427 = vmatpush.bf16.msra.mxu0 %v6200_v24  ;;  %v6096_v9 = vor.u32 %v6747_v7, %v6093_v1  ;;  %v6160_v24 = vor.u32 %v6763_v46, %v6157_v0 }
 0x437   :  { %4440 = vmatpush.bf16.msra.mxu1 %v6264_v15  ;;  %4453 = vmatpush.bf16.msra.mxu2 %v6328_v16  ;;  %v6224_v15 = vor.u32 %v6779_v60, %v6221_v32  ;;  %v3610_v16 = vld [vmem:[#allocation22] sm:$0x3] }
 0x438   :  { %v3612_v19 = vperm.slane %v3610_v16, 0  ;;  %v3613_v5 = vperm.slane %v3610_v16, 1 }
 0x43a   :  { %4415 = vmatpush.bf16.msrb.mxu3 %v6128_v18  ;;  %4428 = vmatpush.bf16.msra.mxu0 %v6192_v56 }
 0x43b   :  { %4441 = vmatpush.bf16.msra.mxu1 %v6256_v23  ;;  %4454 = vmatpush.bf16.msra.mxu2 %v6320_v33 }
 0x43e   :  { %4416 = vmatpush.bf16.msrb.mxu3 %v6120_v6  ;;  %4429 = vmatpush.bf16.msra.mxu0 %v6184_v50 }
 0x43f   :  { %4442 = vmatpush.bf16.msra.mxu1 %v6248_v27  ;;  %4455 = vmatpush.bf16.msra.mxu2 %v6312_v34 }
 0x442   :  { %4417 = vmatpush.bf16.msrb.mxu3 %v6112_v43  ;;  %4430 = vmatpush.bf16.msra.mxu0 %v6176_v39 }
 0x443   :  { %4443 = vmatpush.bf16.msra.mxu1 %v6240_v40  ;;  %4456 = vmatpush.bf16.msra.mxu2 %v6304_v48 }
 0x446   :  { %4418 = vmatpush.bf16.msrb.mxu3 %v6104_v3  ;;  %4431 = vmatpush.bf16.msra.mxu0 %v6168_v4 }
 0x447   :  { %4444 = vmatpush.bf16.msra.mxu1 %v6232_v62  ;;  %4457 = vmatpush.bf16.msra.mxu2 %v6296_v28 }
 0x44a   :  { %4419 = vmatpush.bf16.msrb.mxu3 %v6096_v9  ;;  %4432 = vmatpush.bf16.msra.mxu0 %v6160_v24 }
 0x44b   :  { %4445 = vmatpush.bf16.msra.mxu1 %v6224_v15  ;;  %4458 = vmatpush.bf16.msra.mxu2 %v6288_v14 }
 0x44d   :  { %4420 = vmatmul.bf16.vlgmr.msrb.gmra.mxu3 %v7776_v12  ;;  %4433 = vmatmul.bf16.vlgmr.msra.gmra.mxu0 %v7778_v22 }
 0x44e   :  { %4446 = vmatmul.bf16.vlgmr.msra.gmra.mxu1 %v7780_v44  ;;  %4459 = vmatmul.bf16.vlgmr.msra.gmra.mxu2 %v7783_v59 }
 0x489   :  { %v4278_v47 = vpop.f32.mrf.mxu0 }
 0x48a   :  { %v4291_v11 = vpop.f32.mrf.mxu1 }
 0x48f   :  { %v4265_v25 = vpop.f32.mrf.mxu3 }
 0x490   :  { %v4304_v51 = vpop.f32.mrf.mxu2  ;;  %v4266_v17 = vadd.f32 %v4265_v25, %v3612_v19 }
 0x491   :  { %v4280_v53 = vpop.f32.mrf.mxu0 }
 0x492   :  { %v4293_v18 = vpop.f32.mrf.mxu1  ;;  %v4279_v56 = vadd.f32 %v4278_v47, %v4266_v17 }
 0x494   :  { %v4292_v30 = vadd.f32 %v4291_v11, %v4279_v56 }
 0x496   :  { %v4305_v22 = vadd.f32 %v4304_v51, %v4292_v30 }
 0x497   :  { %v4267_v23 = vpop.f32.mrf.mxu3 }
 0x498   :  { %v4306_v61 = vpop.f32.mrf.mxu2 }
 0x499   :  { %v4330_v12 = vpop.f32.mrf.mxu0 }
 0x49a   :  { %v4343_v13 = vpop.f32.mrf.mxu1 }
 0x49f   :  { %v4317_v33 = vpop.f32.mrf.mxu3 }
 0x4a0   :  { %v4318_v44 = vadd.f32 %v4317_v33, %v4305_v22  ;;  %v4356_v2 = vpop.f32.mrf.mxu2 }
 0x4a1   :  { %v4332_v21 = vpop.f32.mrf.mxu0 }
 0x4a2   :  { %v4331_v59 = vadd.f32 %v4330_v12, %v4318_v44  ;;  %v4345_v8 = vpop.f32.mrf.mxu1 }
 0x4a4   :  { %v4344_v58 = vadd.f32 %v4343_v13, %v4331_v59 }
 0x4a6   :  { %v4357_v20 = vadd.f32 %v4356_v2, %v4344_v58 }
 0x4a7   :  { %v4319_v6 = vpop.f32.mrf.mxu3 }
 0x4a8   :  { %6865 = vtanh.f32 %v4357_v20  ;;  %v4358_v50 = vpop.f32.mrf.mxu2 }
 0x4aa   :  { %v4382_v27 = vpop.f32.mrf.mxu0 }
 0x4ad   :  { %v4395_v26 = vpop.f32.mrf.mxu1 }
 0x4ae   :  { %v6866_v45 = vpop.eup %6865 }
 0x4af   :  { %4466 = vst [vmem:[%s7819_s17] sm:$0xff] %v6866_v45 }
 0x4b0   :  { %v4369_v31 = vpop.f32.mrf.mxu3 }
 0x4b1   :  { %v4370_v43 = vadd.f32 %v4369_v31, %v3613_v5 }
 0x4b2   :  { %v4384_v35 = vpop.f32.mrf.mxu0 }
 0x4b3   :  { %v4408_v34 = vpop.f32.mrf.mxu2  ;;  %v4383_v39 = vadd.f32 %v4382_v27, %v4370_v43 }
 0x4b5   :  { %v4397_v57 = vpop.f32.mrf.mxu1  ;;  %v4396_v40 = vadd.f32 %v4395_v26, %v4383_v39 }
 0x4b7   :  { %v4409_v37 = vadd.f32 %v4408_v34, %v4396_v40 }
 0x4b8   :  { %v4371_v29 = vpop.f32.mrf.mxu3 }
 0x4bb   :  { %v4410_v49 = vpop.f32.mrf.mxu2 }
 0x4ca   :  { %v4434_v42 = vpop.f32.mrf.mxu0 }
 0x4cb   :  { %v4447_v41 = vpop.f32.mrf.mxu1 }
 0x4d0   :  { %v4421_v48 = vpop.f32.mrf.mxu3 }
 0x4d1   :  { %v4422_v36 = vadd.f32 %v4421_v48, %v4409_v37  ;;  %v4460_v54 = vpop.f32.mrf.mxu2 }
 0x4d2   :  { %v4436_v52 = vpop.f32.mrf.mxu0 }
 0x4d3   :  { %v4435_v55 = vadd.f32 %v4434_v42, %v4422_v36  ;;  %v4449_v63 = vpop.f32.mrf.mxu1 }
 0x4d5   :  { %v4448_v3 = vadd.f32 %v4447_v41, %v4435_v55 }
 0x4d7   :  { %v4461_v4 = vadd.f32 %v4460_v54, %v4448_v3 }
 0x4d8   :  { %v4423_v62 = vpop.f32.mrf.mxu3 }
 0x4d9   :  { %6867 = vtanh.f32 %v4461_v4  ;;  %v4462_v7 = vpop.f32.mrf.mxu2 }
 0x4df   :  { %v6868_v1 = vpop.eup %6867 }
 0x4e0   :  { %4467 = vst [vmem:[%s7819_s17 + $0x8] sm:$0xff] %v6868_v1 }
 0x4e1   :  { %4472 = vsyncpa [#allocation3], 1 }
 0x4e2   :  { %4473 = vsyncpa [#allocation5], 1 }
 0x4e3   :  { %4474 = vsyncpa [#allocation8], 1 }
 0x4e4   :  { %4475 = vsyncpa [#allocation11], 1 }
 0x4e5   :  { %4476 = vsyncpa [#allocation14], 1 }
 0x4e6   :  { %4477 = vsyncpa [#allocation17], 1 }
 0x4e7   :  { %4478 = vsyncpa [#allocation20], 1 }
 0x4e8   :  { %4479 = vsyncpa [#allocation23], 1 }

</bundles_post_ra>
